<compile_context>
chip_gen: v6e
topology: v6e:2x2x1
jax: 0.10.0
libtpu: 0.0.40
codegen_flags: <defaults>
</compile_context>

<pallas_src>
import jax
import jax.numpy as jnp
from jax.experimental import pallas as pl
from jax.experimental.pallas import tpu as pltpu

IN_DIM = 28 * 28   # 784
K_PAD = 896        # 7 * 128 (lane-aligned contraction for layer 1)
HID = 512
OUT = 10
OUT_PAD = 128      # lane-dense output block
TM = 256           # batch tile (matches v6e/v7x 2x256 MXU; fine on v5e)


def mlp_kernel(x_ref, w1_ref, b1_ref, w2_ref, b2_ref, w3_ref, b3_ref, o_ref):
    # x_ref: (TM, K_PAD) bf16 tile; weights resident bf16; biases f32.
    x = x_ref[...]

    # Layer 1: Linear(784->512) + ReLU   (f32 accumulate, f32 epilogue)
    h = jnp.dot(x, w1_ref[...], preferred_element_type=jnp.float32) + b1_ref[...]
    h = jnp.maximum(h, 0.0).astype(jnp.bfloat16)

    # Layer 2: Linear(512->512) + ReLU
    h = jnp.dot(h, w2_ref[...], preferred_element_type=jnp.float32) + b2_ref[...]
    h = jnp.maximum(h, 0.0).astype(jnp.bfloat16)

    # Layer 3: Linear(512->10) (padded to 128 output lanes)
    y = jnp.dot(h, w3_ref[...], preferred_element_type=jnp.float32) + b3_ref[...]
    o_ref[...] = y.astype(o_ref.dtype)


def mlp_forward(x_nchw, params):
    w1, b1, w2, b2, w3, b3 = params
    B = x_nchw.shape[0]

    # Flatten (glue): NCHW -> (B, 784)
    x = x_nchw.reshape(B, -1).astype(jnp.float32)

    # Pad batch up to a multiple of TM and K up to 896; pad rows/cols are zero.
    B_pad = pl.cdiv(B, TM) * TM
    x_p = jnp.zeros((B_pad, K_PAD), jnp.bfloat16).at[:B, :IN_DIM].set(
        x.astype(jnp.bfloat16))

    # One-time weight prep: (in, out) layout, bf16, lane-aligned padding.
    w1_p = jnp.zeros((K_PAD, HID), jnp.bfloat16).at[:IN_DIM, :].set(
        w1.astype(jnp.bfloat16))
    w2_p = w2.astype(jnp.bfloat16)
    w3_p = jnp.zeros((HID, OUT_PAD), jnp.bfloat16).at[:, :OUT].set(
        w3.astype(jnp.bfloat16))
    b1_p = b1.astype(jnp.float32)
    b2_p = b2.astype(jnp.float32)
    b3_p = jnp.zeros((1, OUT_PAD), jnp.float32).at[:, :OUT].set(
        b3.astype(jnp.float32))

    const = lambda i: (0, 0)   # weights/biases: same block every step -> VMEM-resident

    out = pl.pallas_call(
        mlp_kernel,
        out_shape=jax.ShapeDtypeStruct((B_pad, OUT_PAD), jnp.float32),
        grid=(B_pad // TM,),
        in_specs=[
            pl.BlockSpec((TM, K_PAD), lambda i: (i, 0)),   # x tiles, pipelined
            pl.BlockSpec((K_PAD, HID), const),             # w1
            pl.BlockSpec((1, HID), const),                 # b1
            pl.BlockSpec((HID, HID), const),               # w2
            pl.BlockSpec((1, HID), const),                 # b2
            pl.BlockSpec((HID, OUT_PAD), const),           # w3 (zero-padded cols)
            pl.BlockSpec((1, OUT_PAD), const),             # b3 (zero-padded)
        ],
        out_specs=pl.BlockSpec((TM, OUT_PAD), lambda i: (i, 0)),
        compiler_params=pltpu.CompilerParams(
            dimension_semantics=("parallel",),
            vmem_limit_bytes=16 << 20,
        ),
    )(x_p, w1_p, b1_p, w2_p, b2_p, w3_p, b3_p)

    return out[:B, :OUT]


def init_params(key):
    # Deterministic, PyTorch-nn.Linear-style uniform(-1/sqrt(fan_in), 1/sqrt(fan_in)) init.
    def linear_init(k, fan_in, fan_out):
        kw, kb = jax.random.split(k)
        bound = 1.0 / jnp.sqrt(fan_in)
        w = jax.random.uniform(kw, (fan_in, fan_out), jnp.float32, -bound, bound)
        b = jax.random.uniform(kb, (1, fan_out), jnp.float32, -bound, bound)
        return w, b

    k1, k2, k3 = jax.random.split(key, 3)
    w1, b1 = linear_init(k1, IN_DIM, HID)
    w2, b2 = linear_init(k2, HID, HID)
    w3, b3 = linear_init(k3, HID, OUT)
    return (w1, b1, w2, b2, w3, b3)


if __name__ == "__main__":
    key = jax.random.PRNGKey(0)
    kx, kp = jax.random.split(key)

    B = 2
    x = jax.random.normal(kx, (B, 1, 28, 28), dtype=jnp.float32)  # NCHW, like PyTorch
    params = init_params(kp)

    out = mlp_forward(x, params)
    out = jax.block_until_ready(out)

    # Reference with the same bf16-weight / f32-accumulate numerics as the kernel.
    w1, b1, w2, b2, w3, b3 = params
    xf = x.reshape(B, -1).astype(jnp.bfloat16)
    h = jnp.dot(xf, w1.astype(jnp.bfloat16),
                preferred_element_type=jnp.float32) + b1
    h = jnp.maximum(h, 0.0).astype(jnp.bfloat16)
    h = jnp.dot(h, w2.astype(jnp.bfloat16),
                preferred_element_type=jnp.float32) + b2
    h = jnp.maximum(h, 0.0).astype(jnp.bfloat16)
    ref = jnp.dot(h, w3.astype(jnp.bfloat16),
                  preferred_element_type=jnp.float32) + b3

    assert out.shape == (B, OUT)
    assert jnp.allclose(out, ref, atol=2e-3, rtol=2e-3), (
        float(jnp.max(jnp.abs(out - ref))))

    print("KERNEL_OK")
</pallas_src>

<mosaic_0001>
module attributes {stable_mosaic.version = 11 : i64} {
  func.func @mlp_kernel(%arg0: i32, %arg1: memref<256x896xbf16, #tpu.memory_space<vmem>>, %arg2: memref<896x512xbf16, #tpu.memory_space<vmem>>, %arg3: memref<1x512xf32, #tpu.memory_space<vmem>>, %arg4: memref<512x512xbf16, #tpu.memory_space<vmem>>, %arg5: memref<1x512xf32, #tpu.memory_space<vmem>>, %arg6: memref<512x128xbf16, #tpu.memory_space<vmem>>, %arg7: memref<1x128xf32, #tpu.memory_space<vmem>>, %arg8: memref<256x128xf32, #tpu.memory_space<vmem>>) attributes {dimension_semantics = [#tpu.dimension_semantics<parallel>], iteration_bounds = array<i64: 1>, scalar_prefetch = 0 : i64, scratch_operands = 0 : i64, tpu.core_type = #tpu.core_type<tc>, window_params = [{transform_indices = @transform_0, window_bounds = array<i64: 256, 896>}, {pipeline_mode = #tpu.pipeline_mode<synchronous>, transform_indices = @transform_1, window_bounds = array<i64: 896, 512>}, {pipeline_mode = #tpu.pipeline_mode<synchronous>, transform_indices = @transform_2, window_bounds = array<i64: 1, 512>}, {pipeline_mode = #tpu.pipeline_mode<synchronous>, transform_indices = @transform_3, window_bounds = array<i64: 512, 512>}, {pipeline_mode = #tpu.pipeline_mode<synchronous>, transform_indices = @transform_4, window_bounds = array<i64: 1, 512>}, {pipeline_mode = #tpu.pipeline_mode<synchronous>, transform_indices = @transform_5, window_bounds = array<i64: 512, 128>}, {pipeline_mode = #tpu.pipeline_mode<synchronous>, transform_indices = @transform_6, window_bounds = array<i64: 1, 128>}, {transform_indices = @transform_7, window_bounds = array<i64: 256, 128>}]} {
    %c0 = arith.constant 0 : index
    %c0_0 = arith.constant 0 : index
    %0 = vector.load %arg1[%c0, %c0_0] : memref<256x896xbf16, #tpu.memory_space<vmem>>, vector<256x896xbf16>
    %c0_1 = arith.constant 0 : index
    %c0_2 = arith.constant 0 : index
    %1 = vector.load %arg2[%c0_1, %c0_2] : memref<896x512xbf16, #tpu.memory_space<vmem>>, vector<896x512xbf16>
    %cst = arith.constant dense<0.000000e+00> : vector<256x512xf32>
    %2 = tpu.matmul %0, %1, %cst {dimension_numbers = #tpu.dot_dimension_numbers<[1], [0], [0], [1], [0, 0, 1, 1], [], []>} : vector<256x896xbf16>, vector<896x512xbf16>, vector<256x512xf32> -> vector<256x512xf32>
    %c0_3 = arith.constant 0 : index
    %c0_4 = arith.constant 0 : index
    %3 = vector.load %arg3[%c0_3, %c0_4] : memref<1x512xf32, #tpu.memory_space<vmem>>, vector<1x512xf32>
    %4 = vector.broadcast %3 : vector<1x512xf32> to vector<256x512xf32>
    %5 = arith.addf %2, %4 : vector<256x512xf32>
    %cst_5 = arith.constant 0.000000e+00 : f32
    %6 = vector.broadcast %cst_5 : f32 to vector<256x512xf32>
    %7 = arith.maximumf %5, %6 : vector<256x512xf32>
    %8 = arith.truncf %7 : vector<256x512xf32> to vector<256x512xbf16>
    %c0_6 = arith.constant 0 : index
    %c0_7 = arith.constant 0 : index
    %9 = vector.load %arg4[%c0_6, %c0_7] : memref<512x512xbf16, #tpu.memory_space<vmem>>, vector<512x512xbf16>
    %cst_8 = arith.constant dense<0.000000e+00> : vector<256x512xf32>
    %10 = tpu.matmul %8, %9, %cst_8 {dimension_numbers = #tpu.dot_dimension_numbers<[1], [0], [0], [1], [0, 0, 1, 1], [], []>} : vector<256x512xbf16>, vector<512x512xbf16>, vector<256x512xf32> -> vector<256x512xf32>
    %c0_9 = arith.constant 0 : index
    %c0_10 = arith.constant 0 : index
    %11 = vector.load %arg5[%c0_9, %c0_10] : memref<1x512xf32, #tpu.memory_space<vmem>>, vector<1x512xf32>
    %12 = vector.broadcast %11 : vector<1x512xf32> to vector<256x512xf32>
    %13 = arith.addf %10, %12 : vector<256x512xf32>
    %cst_11 = arith.constant 0.000000e+00 : f32
    %14 = vector.broadcast %cst_11 : f32 to vector<256x512xf32>
    %15 = arith.maximumf %13, %14 : vector<256x512xf32>
    %16 = arith.truncf %15 : vector<256x512xf32> to vector<256x512xbf16>
    %c0_12 = arith.constant 0 : index
    %c0_13 = arith.constant 0 : index
    %17 = vector.load %arg6[%c0_12, %c0_13] : memref<512x128xbf16, #tpu.memory_space<vmem>>, vector<512x128xbf16>
    %cst_14 = arith.constant dense<0.000000e+00> : vector<256x128xf32>
    %18 = tpu.matmul %16, %17, %cst_14 {dimension_numbers = #tpu.dot_dimension_numbers<[1], [0], [0], [1], [0, 0, 1, 1], [], []>} : vector<256x512xbf16>, vector<512x128xbf16>, vector<256x128xf32> -> vector<256x128xf32>
    %c0_15 = arith.constant 0 : index
    %c0_16 = arith.constant 0 : index
    %19 = vector.load %arg7[%c0_15, %c0_16] : memref<1x128xf32, #tpu.memory_space<vmem>>, vector<1x128xf32>
    %20 = vector.broadcast %19 : vector<1x128xf32> to vector<256x128xf32>
    %21 = arith.addf %18, %20 : vector<256x128xf32>
    %c0_17 = arith.constant 0 : index
    %c0_18 = arith.constant 0 : index
    %22 = vector.load %arg8[%c0_17, %c0_18] : memref<256x128xf32, #tpu.memory_space<vmem>>, vector<256x128xf32>
    tpu.vector_store %arg8[%c0_17, %c0_18], %21 {strides = array<i32>} : memref<256x128xf32, #tpu.memory_space<vmem>>, vector<256x128xf32>,
    return
  }
  func.func @transform_0(%arg0: i32) -> (i32, i32) {
    %c0_i32 = arith.constant 0 : i32
    %c0_i32_0 = arith.constant 0 : i32
    return %arg0, %c0_i32 : i32, i32
  }
  func.func @transform_1(%arg0: i32) -> (i32, i32) {
    %c0_i32 = arith.constant 0 : i32
    %c0_i32_0 = arith.constant 0 : i32
    %c0_i32_1 = arith.constant 0 : i32
    return %c0_i32, %c0_i32_0 : i32, i32
  }
  func.func @transform_2(%arg0: i32) -> (i32, i32) {
    %c0_i32 = arith.constant 0 : i32
    %c0_i32_0 = arith.constant 0 : i32
    %c0_i32_1 = arith.constant 0 : i32
    return %c0_i32, %c0_i32_0 : i32, i32
  }
  func.func @transform_3(%arg0: i32) -> (i32, i32) {
    %c0_i32 = arith.constant 0 : i32
    %c0_i32_0 = arith.constant 0 : i32
    %c0_i32_1 = arith.constant 0 : i32
    return %c0_i32, %c0_i32_0 : i32, i32
  }
  func.func @transform_4(%arg0: i32) -> (i32, i32) {
    %c0_i32 = arith.constant 0 : i32
    %c0_i32_0 = arith.constant 0 : i32
    %c0_i32_1 = arith.constant 0 : i32
    return %c0_i32, %c0_i32_0 : i32, i32
  }
  func.func @transform_5(%arg0: i32) -> (i32, i32) {
    %c0_i32 = arith.constant 0 : i32
    %c0_i32_0 = arith.constant 0 : i32
    %c0_i32_1 = arith.constant 0 : i32
    return %c0_i32, %c0_i32_0 : i32, i32
  }
  func.func @transform_6(%arg0: i32) -> (i32, i32) {
    %c0_i32 = arith.constant 0 : i32
    %c0_i32_0 = arith.constant 0 : i32
    %c0_i32_1 = arith.constant 0 : i32
    return %c0_i32, %c0_i32_0 : i32, i32
  }
  func.func @transform_7(%arg0: i32) -> (i32, i32) {
    %c0_i32 = arith.constant 0 : i32
    %c0_i32_0 = arith.constant 0 : i32
    return %arg0, %c0_i32 : i32, i32
  }
}

</mosaic_0001>

<bundles_post_ra>
// kernel: tpu_custom_call.1
= control target key start
LH: loop header
LB: loop body
LE: loop exit
PB: predicated region body
PF: predicated region fallthrough
CT: control target
= control target key end

     0   :  { %12 = vsyncpa [#allocation3], 0  ;;  %s9639_s0 = inlined_call_operand.hbm [shape: bf16[256,896], index: 0, kind: input, shape index: {}]   ;;  %s9640_s1 = inlined_call_operand.hbm [shape: bf16[896,512], index: 1, kind: input, shape index: {}]   ;;  %s9641_s2 = inlined_call_operand.hbm [shape: f32[1,512], index: 2, kind: input, shape index: {}]   ;;  %s9642_s3 = inlined_call_operand.hbm [shape: bf16[512,512], index: 3, kind: input, shape index: {}]   ;;  %s9643_s4 = inlined_call_operand.vmem [shape: f32[1,512], index: 4, kind: input, shape index: {}]   ;;  %s9644_s5 = inlined_call_operand.hbm [shape: bf16[512,128], index: 5, kind: input, shape index: {}]   ;;  %s9645_s6 = inlined_call_operand.vmem [shape: f32[1,128], index: 6, kind: input, shape index: {}]   ;;  %s9646_s7 = inlined_call_operand.hbm [shape: f32[256,128], index: 7, kind: output, shape index: {}]  }
   0x1   :  { %13 = vsyncpa [#allocation6], 0 }
   0x2   :  { %14 = vsyncpa [#allocation9], 0 }
   0x3   :  { %15 = vsyncpa [#allocation4], 0  ;;  %s7987_s24 = smov [#allocation5]  }
   0x4   :  { %s33_s25 = sshll.u32 %s7987_s24, 4  ;;  %s34_s25 = int_to_ptr.vmem [resolvable:$true] %s33_s25 }
   0x5   :  { %s7867_s26 = scalar_lea.vmem %s34_s25, 28672  ;;  %p7872_p1 = scmp.lt.s32.totalorder %s34_s25, %s34_s25 }
   0x6   :  { %p7868_p0 = scmp.ne.s32.totalorder %s34_s25, %s7867_s26  ;;  %p7873_p2 = scmp.lt.s32.totalorder %s7867_s26, %s7867_s26 }
   0x8   :  { %p7874_p3 = por %p7873_p2, %p7872_p1 }
   0xa   :  { %p7875_p4 = pnand %p7874_p3, %p7868_p0 }
   0xc   :  { %7878 = shalt.err (!%p7875_p4)
}
   0xd   :  { %s7988_s27 = smov 256   ;;  %s7989_s28 = smov 16  }
   0xe   :  { %39 = dma.hbm_to_vmem [thread:$0]  %s9640_s1, 28672, %s34_s25, [#allocation6], %s7988_s27, %s7988_s27, %s7989_s28  }
   0xf   :  { %s7990_s8 = smov [#allocation8]   ;;  %s7991_s10 = smov [#allocation2]  }
  0x10   :  { %s55_s9 = sshll.u32 %s7990_s8, 4  ;;  %s21_s11 = sshll.u32 %s7991_s10, 4  ;;  %s56_s9 = int_to_ptr.vmem [resolvable:$true] %s55_s9  ;;  %s22_s11 = int_to_ptr.vmem [resolvable:$true] %s21_s11 }
  0x11   :  { %s7887_s12 = scalar_lea.vmem %s56_s9, 16384  ;;  %p7892_p6 = scmp.lt.s32.totalorder %s56_s9, %s56_s9 }
  0x12   :  { %p7888_p5 = scmp.ne.s32.totalorder %s56_s9, %s7887_s12  ;;  %p7893_p7 = scmp.lt.s32.totalorder %s7887_s12, %s7887_s12 }
  0x14   :  { %p7894_p8 = por %p7893_p7, %p7892_p6 }
  0x16   :  { %p7895_p9 = pnand %p7894_p8, %p7888_p5 }
  0x18   :  { %7898 = shalt.err (!%p7895_p9)
}
  0x19   :  { %61 = dma.hbm_to_vmem [thread:$0]  %s9642_s3, 16384, %s56_s9, [#allocation9], %s7988_s27, %s7988_s27, %s7989_s28  }
  0x1a   :  { %s7907_s15 = scalar_lea.vmem %s22_s11, 14336  ;;  %p7912_p11 = scmp.lt.s32.totalorder %s22_s11, %s22_s11 }
  0x1b   :  { %p7908_p10 = scmp.ne.s32.totalorder %s22_s11, %s7907_s15  ;;  %p7913_p12 = scmp.lt.s32.totalorder %s7907_s15, %s7907_s15 }
  0x1d   :  { %p7914_p13 = por %p7913_p12, %p7912_p11 }
  0x1f   :  { %p7915_p0 = pnand %p7914_p13, %p7908_p10 }
  0x21   :  { %7918 = shalt.err (!%p7915_p0)
}
  0x22   :  { %s7992_s1 = smov 448   ;;  %s7993_s16 = smov 28  }
  0x23   :  { %27 = dma.hbm_to_vmem [thread:$0]  %s9639_s0, 14336, %s22_s11, [#allocation3], %s7992_s1, %s7992_s1, %s7993_s16  }
  0x24   :  { %s7994_s19 = smov [#allocation7]   ;;  %s7995_s21 = smov [#allocation10]  }
  0x25   :  { %s46_s20 = sshll.u32 %s7994_s19, 4  ;;  %s69_s22 = sshll.u32 %s7995_s21, 4  ;;  %s47_s20 = int_to_ptr.vmem [resolvable:$true] %s46_s20  ;;  %s70_s22 = int_to_ptr.vmem [resolvable:$true] %s69_s22 }
  0x26   :  { %s7927_s3 = scalar_lea.vmem %s47_s20, 64  ;;  %p7932_p2 = scmp.lt.s32.totalorder %s47_s20, %s47_s20 }
  0x27   :  { %p7928_p1 = scmp.ne.s32.totalorder %s47_s20, %s7927_s3  ;;  %p7933_p3 = scmp.lt.s32.totalorder %s7927_s3, %s7927_s3 }
  0x29   :  { %p7934_p4 = por %p7933_p3, %p7932_p2 }
  0x2b   :  { %p7935_p5 = pnand %p7934_p4, %p7928_p1 }
  0x2d   :  { %7938 = shalt.err (!%p7935_p5)
}
  0x2e   :  { %49 = dma.hbm_to_vmem [thread:$0]  %s9641_s2, 64, %s47_s20, [#allocation6]  }
  0x2f   :  { %s7947_s25 = scalar_lea.vmem %s70_s22, 4096  ;;  %p7952_p7 = scmp.lt.s32.totalorder %s70_s22, %s70_s22 }
  0x30   :  { %p7948_p6 = scmp.ne.s32.totalorder %s70_s22, %s7947_s25  ;;  %p7953_p8 = scmp.lt.s32.totalorder %s7947_s25, %s7947_s25 }
  0x32   :  { %p7954_p9 = por %p7953_p8, %p7952_p7 }
  0x34   :  { %p7955_p10 = pnand %p7954_p9, %p7948_p6 }
  0x36   :  { %7958 = shalt.err (!%p7955_p10)
}
  0x37   :  { %s7996_s0 = smov 64   ;;  %s7997_s26 = smov 4  }
  0x38   :  { %75 = dma.hbm_to_vmem [thread:$0]  %s9644_s5, 4096, %s70_s22, [#allocation9], %s7996_s0, %s7996_s0, %s7997_s26  }
  0x39   :  { %7979 = dma.done.wait [#allocation3], 14336  }
  0x3a   :  { %7980 = vsyncadd [#allocation3], 4294952960 }
  0x3b   :  { %7981 = dma.done.wait [#allocation6], 28736  }
  0x3c   :  { %7982 = vsyncadd [#allocation6], 4294938560 }
  0x3d   :  { %7983 = dma.done.wait [#allocation9], 20480  }
  0x3e   :  { %7984 = vsyncadd [#allocation9], 4294946816  ;;  %v7026_v0 = vld [vmem:[#allocation5 + $0xe4] ss:$16 sps:$4 sm:$0xff]   ;;  %v7030_v2 = vld [vmem:[#allocation5 + $0xe0] ss:$16 sps:$4 sm:$0xff]  }
  0x3f   :  { %v7028_v1 = vld [vmem:[#allocation5 + $0x2e4] ss:$16 sps:$4 sm:$0xff]   ;;  %2164 = vmatprep.subr.bf16.mxu0 %v7026_v0  ;;  %v7031_v3 = vld [vmem:[#allocation5 + $0x2e0] ss:$16 sps:$4 sm:$0xff]   ;;  %v7127_v51 = vld [vmem:[#allocation2 + $0xc] ss:$28 sps:$4 sm:$0xff]  }
  0x40   :  { %2357 = vmatprep.subr.bf16.mxu1 %v7028_v1  ;;  %v7032_v4 = vld [vmem:[#allocation5 + $0xc4] ss:$16 sps:$4 sm:$0xff]   ;;  %2165 = vmatpush1.bf16.msra.mxu0 %v7030_v2  ;;  %v7036_v6 = vld [vmem:[#allocation5 + $0xc0] ss:$16 sps:$4 sm:$0xff]  }
  0x41   :  { %2358 = vmatpush1.bf16.msra.mxu1 %v7031_v3  ;;  %v7034_v5 = vld [vmem:[#allocation5 + $0x2c4] ss:$16 sps:$4 sm:$0xff]   ;;  %2166 = vmatprep.subr.bf16.mxu0 %v7032_v4  ;;  %v7037_v7 = vld [vmem:[#allocation5 + $0x2c0] ss:$16 sps:$4 sm:$0xff]  }
  0x42   :  { %2359 = vmatprep.subr.bf16.mxu1 %v7034_v5  ;;  %v7038_v8 = vld [vmem:[#allocation5 + $0xa4] ss:$16 sps:$4 sm:$0xff]   ;;  %v7042_v10 = vld [vmem:[#allocation5 + $0xa0] ss:$16 sps:$4 sm:$0xff]   ;;  %2389 = vmatprep.mubr.bf16.mxu1 %v7127_v51 }
  0x43   :  { %v7040_v9 = vld [vmem:[#allocation5 + $0x2a4] ss:$16 sps:$4 sm:$0xff]   ;;  %v7043_v11 = vld [vmem:[#allocation5 + $0x2a0] ss:$16 sps:$4 sm:$0xff]  }
  0x44   :  { %2167 = vmatpush1.bf16.msra.mxu0 %v7036_v6  ;;  %v7044_v12 = vld [vmem:[#allocation5 + $0x84] ss:$16 sps:$4 sm:$0xff]   ;;  %v7048_v14 = vld [vmem:[#allocation5 + $0x80] ss:$16 sps:$4 sm:$0xff]  }
  0x45   :  { %2360 = vmatpush1.bf16.msra.mxu1 %v7037_v7  ;;  %2168 = vmatprep.subr.bf16.mxu0 %v7038_v8  ;;  %v7046_v13 = vld [vmem:[#allocation5 + $0x284] ss:$16 sps:$4 sm:$0xff]   ;;  %v7049_v15 = vld [vmem:[#allocation5 + $0x280] ss:$16 sps:$4 sm:$0xff]   ;;  %v7134_v8 = vld [vmem:[#allocation2 + $0x3c] ss:$28 sps:$4 sm:$0xff]  }
  0x46   :  { %2361 = vmatprep.subr.bf16.mxu1 %v7040_v9  ;;  %v7050_v16 = vld [vmem:[#allocation5 + $0x64] ss:$16 sps:$4 sm:$0xff]   ;;  %v7054_v18 = vld [vmem:[#allocation5 + $0x60] ss:$16 sps:$4 sm:$0xff]  }
  0x47   :  { %v7052_v17 = vld [vmem:[#allocation5 + $0x264] ss:$16 sps:$4 sm:$0xff]   ;;  %v7055_v19 = vld [vmem:[#allocation5 + $0x260] ss:$16 sps:$4 sm:$0xff]  }
  0x48   :  { %2169 = vmatpush1.bf16.msra.mxu0 %v7042_v10  ;;  %v7056_v20 = vld [vmem:[#allocation5 + $0x44] ss:$16 sps:$4 sm:$0xff]   ;;  %v7060_v22 = vld [vmem:[#allocation5 + $0x40] ss:$16 sps:$4 sm:$0xff]  }
  0x49   :  { %2362 = vmatpush1.bf16.msra.mxu1 %v7043_v11  ;;  %2170 = vmatprep.subr.bf16.mxu0 %v7044_v12  ;;  %v7058_v21 = vld [vmem:[#allocation5 + $0x244] ss:$16 sps:$4 sm:$0xff]   ;;  %v7061_v23 = vld [vmem:[#allocation5 + $0x240] ss:$16 sps:$4 sm:$0xff]  }
  0x4a   :  { %2363 = vmatprep.subr.bf16.mxu1 %v7046_v13  ;;  %v7062_v24 = vld [vmem:[#allocation5 + $0x24] ss:$16 sps:$4 sm:$0xff]   ;;  %v7066_v26 = vld [vmem:[#allocation5 + $0x20] ss:$16 sps:$4 sm:$0xff]  }
  0x4b   :  { %v7064_v25 = vld [vmem:[#allocation5 + $0x224] ss:$16 sps:$4 sm:$0xff]   ;;  %v7067_v27 = vld [vmem:[#allocation5 + $0x220] ss:$16 sps:$4 sm:$0xff]  }
  0x4c   :  { %2171 = vmatpush1.bf16.msra.mxu0 %v7048_v14  ;;  %v7068_v28 = vld [vmem:[#allocation5 + $0x4] ss:$16 sps:$4 sm:$0xff]   ;;  %v7072_v30 = vld [vmem:[#allocation5] ss:$16 sps:$4 sm:$0xff]  }
  0x4d   :  { %2364 = vmatpush1.bf16.msra.mxu1 %v7049_v15  ;;  %2172 = vmatprep.subr.bf16.mxu0 %v7050_v16  ;;  %v7070_v29 = vld [vmem:[#allocation5 + $0x204] ss:$16 sps:$4 sm:$0xff]   ;;  %v7073_v31 = vld [vmem:[#allocation5 + $0x200] ss:$16 sps:$4 sm:$0xff]  }
  0x4e   :  { %2365 = vmatprep.subr.bf16.mxu1 %v7052_v17  ;;  %v7074_v32 = vld [vmem:[#allocation5 + $0x1e4] ss:$16 sps:$4 sm:$0xff]   ;;  %v7078_v34 = vld [vmem:[#allocation5 + $0x1e0] ss:$16 sps:$4 sm:$0xff]  }
  0x4f   :  { %v7076_v33 = vld [vmem:[#allocation5 + $0x3e4] ss:$16 sps:$4 sm:$0xff]   ;;  %v7079_v35 = vld [vmem:[#allocation5 + $0x3e0] ss:$16 sps:$4 sm:$0xff]  }
  0x50   :  { %2173 = vmatpush1.bf16.msra.mxu0 %v7054_v18  ;;  %v7080_v36 = vld [vmem:[#allocation5 + $0x1c4] ss:$16 sps:$4 sm:$0xff]   ;;  %v7084_v38 = vld [vmem:[#allocation5 + $0x1c0] ss:$16 sps:$4 sm:$0xff]  }
  0x51   :  { %2366 = vmatpush1.bf16.msra.mxu1 %v7055_v19  ;;  %2174 = vmatprep.subr.bf16.mxu0 %v7056_v20  ;;  %v7082_v37 = vld [vmem:[#allocation5 + $0x3c4] ss:$16 sps:$4 sm:$0xff]   ;;  %v7085_v39 = vld [vmem:[#allocation5 + $0x3c0] ss:$16 sps:$4 sm:$0xff]   ;;  %v7145_v19 = vld [vmem:[#allocation2 + $0x7c] ss:$28 sps:$4 sm:$0xff]  }
  0x52   :  { %2367 = vmatprep.subr.bf16.mxu1 %v7058_v21  ;;  %v7086_v40 = vld [vmem:[#allocation5 + $0x1a4] ss:$16 sps:$4 sm:$0xff]   ;;  %v7090_v42 = vld [vmem:[#allocation5 + $0x1a0] ss:$16 sps:$4 sm:$0xff]  }
  0x53   :  { %v7088_v41 = vld [vmem:[#allocation5 + $0x3a4] ss:$16 sps:$4 sm:$0xff]   ;;  %v7091_v43 = vld [vmem:[#allocation5 + $0x3a0] ss:$16 sps:$4 sm:$0xff]  }
  0x54   :  { %2175 = vmatpush1.bf16.msra.mxu0 %v7060_v22  ;;  %v7092_v44 = vld [vmem:[#allocation5 + $0x184] ss:$16 sps:$4 sm:$0xff]   ;;  %v7096_v46 = vld [vmem:[#allocation5 + $0x180] ss:$16 sps:$4 sm:$0xff]  }
  0x55   :  { %2368 = vmatpush1.bf16.msra.mxu1 %v7061_v23  ;;  %2176 = vmatprep.subr.bf16.mxu0 %v7062_v24  ;;  %v7094_v45 = vld [vmem:[#allocation5 + $0x384] ss:$16 sps:$4 sm:$0xff]   ;;  %v7097_v47 = vld [vmem:[#allocation5 + $0x380] ss:$16 sps:$4 sm:$0xff]  }
  0x56   :  { %2369 = vmatprep.subr.bf16.mxu1 %v7064_v25  ;;  %v7098_v48 = vld [vmem:[#allocation5 + $0x164] ss:$16 sps:$4 sm:$0xff]   ;;  %v7102_v52 = vld [vmem:[#allocation5 + $0x160] ss:$16 sps:$4 sm:$0xff]  }
  0x57   :  { %v7124_v49 = vld [vmem:[#allocation2 + $0x4] ss:$28 sps:$4 sm:$0xff]   ;;  %v7138_v16 = vld [vmem:[#allocation2 + $0x38] ss:$28 sps:$4 sm:$0xff]  }
  0x58   :  { %2177 = vmatpush1.bf16.msra.mxu0 %v7066_v26  ;;  %v7100_v50 = vld [vmem:[#allocation5 + $0x364] ss:$16 sps:$4 sm:$0xff]   ;;  %2196 = vmatprep.mubr.bf16.mxu0 %v7124_v49  ;;  %v7103_v53 = vld [vmem:[#allocation5 + $0x360] ss:$16 sps:$4 sm:$0xff]   ;;  %v7176_v49 = vld [vmem:[#allocation2 + $0x11c] ss:$28 sps:$4 sm:$0xff]  }
  0x59   :  { %2370 = vmatpush1.bf16.msra.mxu1 %v7067_v27  ;;  %2178 = vmatprep.subr.bf16.mxu0 %v7068_v28  ;;  %v7104_v54 = vld [vmem:[#allocation5 + $0x144] ss:$16 sps:$4 sm:$0xff]   ;;  %v7108_v56 = vld [vmem:[#allocation5 + $0x140] ss:$16 sps:$4 sm:$0xff]  }
  0x5a   :  { %2371 = vmatprep.subr.bf16.mxu1 %v7070_v29  ;;  %v7106_v55 = vld [vmem:[#allocation5 + $0x344] ss:$16 sps:$4 sm:$0xff]   ;;  %v7109_v57 = vld [vmem:[#allocation5 + $0x340] ss:$16 sps:$4 sm:$0xff]   ;;  %v7155_v29 = vld [vmem:[#allocation2 + $0xac] ss:$28 sps:$4 sm:$0xff]  }
  0x5b   :  { %v7110_v58 = vld [vmem:[#allocation5 + $0x124] ss:$16 sps:$4 sm:$0xff]   ;;  %v7114_v60 = vld [vmem:[#allocation5 + $0x120] ss:$16 sps:$4 sm:$0xff]  }
  0x5c   :  { %2179 = vmatpush1.bf16.msra.mxu0 %v7072_v30  ;;  %v7112_v59 = vld [vmem:[#allocation5 + $0x324] ss:$16 sps:$4 sm:$0xff]   ;;  %v7115_v61 = vld [vmem:[#allocation5 + $0x320] ss:$16 sps:$4 sm:$0xff]  }
  0x5d   :  { %2372 = vmatpush1.bf16.msra.mxu1 %v7073_v31  ;;  %2180 = vmatprep.subr.bf16.mxu0 %v7074_v32  ;;  %v7116_v62 = vld [vmem:[#allocation5 + $0x104] ss:$16 sps:$4 sm:$0xff]   ;;  %v7120_v0 = vld [vmem:[#allocation5 + $0x100] ss:$16 sps:$4 sm:$0xff]  }
  0x5e   :  { %2373 = vmatprep.subr.bf16.mxu1 %v7076_v33  ;;  %v7118_v63 = vld [vmem:[#allocation5 + $0x304] ss:$16 sps:$4 sm:$0xff]   ;;  %v7121_v1 = vld [vmem:[#allocation5 + $0x300] ss:$16 sps:$4 sm:$0xff]  }
  0x5f   :  { %v7130_v2 = vld [vmem:[#allocation5 + $0x4e4] ss:$16 sps:$4 sm:$0xff]   ;;  %v7122_v4 = vld [vmem:[#allocation2] ss:$28 sps:$4 sm:$0xff]   ;;  %v7147_v26 = vld [vmem:[#allocation2 + $0x70] ss:$28 sps:$4 sm:$0xff]  }
  0x60   :  { %2181 = vmatpush2.bf16.msra.mxu0 %v7078_v34  ;;  %v7133_v3 = vld [vmem:[#allocation5 + $0x6e4] ss:$16 sps:$4 sm:$0xff]   ;;  %v7128_v6 = vld [vmem:[#allocation5 + $0x4e0] ss:$16 sps:$4 sm:$0xff]  }
  0x61   :  { %2374 = vmatpush2.bf16.msra.mxu1 %v7079_v35  ;;  %2182 = vmatprep.subr.bf16.mxu0 %v7080_v36  ;;  %v7125_v5 = vld [vmem:[#allocation2 + $0x8] ss:$28 sps:$4 sm:$0xff]   ;;  %v7131_v7 = vld [vmem:[#allocation5 + $0x6e0] ss:$16 sps:$4 sm:$0xff]   ;;  %v7148_v28 = vld [vmem:[#allocation2 + $0x78] ss:$28 sps:$4 sm:$0xff]  }
  0x62   :  { %2375 = vmatprep.subr.bf16.mxu1 %v7082_v37  ;;  %v7136_v9 = vld [vmem:[#allocation2 + $0x44] ss:$28 sps:$4 sm:$0xff]   ;;  %v7143_v18 = vld [vmem:[#allocation2 + $0x74] ss:$28 sps:$4 sm:$0xff]  }
  0x63   :  { %v7142_v10 = vld [vmem:[#allocation5 + $0x4c4] ss:$16 sps:$4 sm:$0xff]   ;;  %v7140_v12 = vld [vmem:[#allocation5 + $0x4c0] ss:$16 sps:$4 sm:$0xff]  }
  0x64   :  { %2183 = vmatpush2.bf16.msra.mxu0 %v7084_v38  ;;  %v7154_v11 = vld [vmem:[#allocation5 + $0x6c4] ss:$16 sps:$4 sm:$0xff]   ;;  %v7152_v14 = vld [vmem:[#allocation5 + $0x6c0] ss:$16 sps:$4 sm:$0xff]  }
  0x65   :  { %2376 = vmatpush2.bf16.msra.mxu1 %v7085_v39  ;;  %2184 = vmatprep.subr.bf16.mxu0 %v7086_v40  ;;  %v7151_v13 = vld [vmem:[#allocation5 + $0x4a4] ss:$16 sps:$4 sm:$0xff]   ;;  %v7139_v17 = vld [vmem:[#allocation2 + $0x40] ss:$28 sps:$4 sm:$0xff]   ;;  %v7160_v38 = vld [vmem:[#allocation2 + $0xb0] ss:$28 sps:$4 sm:$0xff]  }
  0x66   :  { %2377 = vmatprep.subr.bf16.mxu1 %v7088_v41  ;;  %v7175_v15 = vld [vmem:[#allocation5 + $0x6a4] ss:$16 sps:$4 sm:$0xff]   ;;  %v7149_v20 = vld [vmem:[#allocation5 + $0x4a0] ss:$16 sps:$4 sm:$0xff]   ;;  %v7166_v40 = vld [vmem:[#allocation2 + $0xec] ss:$28 sps:$4 sm:$0xff]  }
  0x67   :  { %v7173_v21 = vld [vmem:[#allocation5 + $0x6a0] ss:$16 sps:$4 sm:$0xff]   ;;  %v7163_v22 = vld [vmem:[#allocation5 + $0x484] ss:$16 sps:$4 sm:$0xff]  }
  0x68   :  { %2185 = vmatpush2.bf16.msra.mxu0 %v7090_v42  ;;  %v7196_v23 = vld [vmem:[#allocation5 + $0x684] ss:$16 sps:$4 sm:$0xff]   ;;  %v7161_v24 = vld [vmem:[#allocation5 + $0x480] ss:$16 sps:$4 sm:$0xff]  }
  0x69   :  { %2378 = vmatpush2.bf16.msra.mxu1 %v7091_v43  ;;  %2186 = vmatprep.subr.bf16.mxu0 %v7092_v44  ;;  %v7194_v25 = vld [vmem:[#allocation5 + $0x680] ss:$16 sps:$4 sm:$0xff]   ;;  %v7172_v27 = vld [vmem:[#allocation5 + $0x464] ss:$16 sps:$4 sm:$0xff]  }
  0x6a   :  { %2379 = vmatprep.subr.bf16.mxu1 %v7094_v45  ;;  %v7157_v30 = vld [vmem:[#allocation2 + $0xb4] ss:$28 sps:$4 sm:$0xff]   ;;  %v7159_v37 = vld [vmem:[#allocation2 + $0xa8] ss:$28 sps:$4 sm:$0xff]   ;;  %v7168_v44 = vld [vmem:[#allocation2 + $0xe0] ss:$28 sps:$4 sm:$0xff]  }
  0x6b   :  { %v7170_v31 = vld [vmem:[#allocation5 + $0x460] ss:$16 sps:$4 sm:$0xff]   ;;  %v7184_v32 = vld [vmem:[#allocation5 + $0x444] ss:$16 sps:$4 sm:$0xff]  }
  0x6c   :  { %2187 = vmatpush2.bf16.msra.mxu0 %v7096_v46  ;;  %v7182_v33 = vld [vmem:[#allocation5 + $0x440] ss:$16 sps:$4 sm:$0xff]   ;;  %v7217_v35 = vld [vmem:[#allocation5 + $0x664] ss:$16 sps:$4 sm:$0xff]  }
  0x6d   :  { %2380 = vmatpush2.bf16.msra.mxu1 %v7097_v47  ;;  %2188 = vmatprep.subr.bf16.mxu0 %v7098_v48  ;;  %v7215_v34 = vld [vmem:[#allocation5 + $0x660] ss:$16 sps:$4 sm:$0xff]   ;;  %v7193_v36 = vld [vmem:[#allocation5 + $0x424] ss:$16 sps:$4 sm:$0xff]  }
  0x6e   :  { %2381 = vmatprep.subr.bf16.mxu1 %v7100_v50  ;;  %v7164_v39 = vld [vmem:[#allocation2 + $0xe4] ss:$28 sps:$4 sm:$0xff]  }
  0x6f   :  { %v7191_v41 = vld [vmem:[#allocation5 + $0x420] ss:$16 sps:$4 sm:$0xff]   ;;  %v7205_v42 = vld [vmem:[#allocation5 + $0x404] ss:$16 sps:$4 sm:$0xff]  }
  0x70   :  { %2189 = vmatpush2.bf16.msra.mxu0 %v7102_v52  ;;  %v7203_v43 = vld [vmem:[#allocation5 + $0x400] ss:$16 sps:$4 sm:$0xff]   ;;  %v7214_v45 = vld [vmem:[#allocation5 + $0x5e4] ss:$16 sps:$4 sm:$0xff]  }
  0x71   :  { %2382 = vmatpush2.bf16.msra.mxu1 %v7103_v53  ;;  %2190 = vmatprep.subr.bf16.mxu0 %v7104_v54  ;;  %v7236_v46 = vld [vmem:[#allocation5 + $0x640] ss:$16 sps:$4 sm:$0xff]   ;;  %v7238_v47 = vld [vmem:[#allocation5 + $0x644] ss:$16 sps:$4 sm:$0xff]  }
  0x72   :  { %2383 = vmatprep.subr.bf16.mxu1 %v7106_v55  ;;  %v7169_v48 = vld [vmem:[#allocation2 + $0xe8] ss:$28 sps:$4 sm:$0xff]   ;;  %v7212_v51 = vld [vmem:[#allocation5 + $0x5e0] ss:$16 sps:$4 sm:$0xff]   ;;  %v7180_v53 = vld [vmem:[#allocation2 + $0x118] ss:$28 sps:$4 sm:$0xff]  }
  0x73   :  { %v7178_v50 = vld [vmem:[#allocation2 + $0x124] ss:$28 sps:$4 sm:$0xff]  }
  0x74   :  { %2191 = vmatpush2.bf16.msra.mxu0 %v7108_v56  ;;  %v7226_v52 = vld [vmem:[#allocation5 + $0x5c4] ss:$16 sps:$4 sm:$0xff]   ;;  %v7181_v54 = vld [vmem:[#allocation2 + $0x120] ss:$28 sps:$4 sm:$0xff]  }
  0x75   :  { %2384 = vmatpush2.bf16.msra.mxu1 %v7109_v57  ;;  %2192 = vmatprep.subr.bf16.mxu0 %v7110_v58  ;;  %v7224_v55 = vld [vmem:[#allocation5 + $0x5c0] ss:$16 sps:$4 sm:$0xff]   ;;  %v7235_v57 = vld [vmem:[#allocation5 + $0x5a4] ss:$16 sps:$4 sm:$0xff]  }
  0x76   :  { %2385 = vmatprep.subr.bf16.mxu1 %v7112_v59  ;;  %v7185_v56 = vld [vmem:[#allocation2 + $0x154] ss:$28 sps:$4 sm:$0xff]  }
  0x77   :  { %v7257_v58 = vld [vmem:[#allocation5 + $0x620] ss:$16 sps:$4 sm:$0xff]   ;;  %v7259_v59 = vld [vmem:[#allocation5 + $0x624] ss:$16 sps:$4 sm:$0xff]  }
  0x78   :  { %2193 = vmatpush2.bf16.msra.mxu0 %v7114_v60  ;;  %v7187_v60 = vld [vmem:[#allocation2 + $0x15c] ss:$28 sps:$4 sm:$0xff]  }
  0x79   :  { %2386 = vmatpush2.bf16.msra.mxu1 %v7115_v61  ;;  %2194 = vmatprep.subr.bf16.mxu0 %v7116_v62  ;;  %v7233_v61 = vld [vmem:[#allocation5 + $0x5a0] ss:$16 sps:$4 sm:$0xff]   ;;  %v7247_v62 = vld [vmem:[#allocation5 + $0x584] ss:$16 sps:$4 sm:$0xff]  }
  0x7a   :  { %2387 = vmatprep.subr.bf16.mxu1 %v7118_v63  ;;  %v7189_v63 = vld [vmem:[#allocation2 + $0x150] ss:$28 sps:$4 sm:$0xff]  }
  0x7c   :  { %2195 = vmatpush2.bf16.msra.mxu0 %v7120_v0  ;;  %v7190_v0 = vld [vmem:[#allocation2 + $0x158] ss:$28 sps:$4 sm:$0xff]  }
  0x7d   :  { %2388 = vmatpush2.bf16.msra.mxu1 %v7121_v1  ;;  %2550 = vmatprep.subr.bf16.mxu0 %v7130_v2  ;;  %v7245_v1 = vld [vmem:[#allocation5 + $0x580] ss:$16 sps:$4 sm:$0xff]   ;;  %v7197_v2 = vld [vmem:[#allocation2 + $0x18c] ss:$28 sps:$4 sm:$0xff]  }
  0x7e   :  { %2743 = vmatprep.subr.bf16.mxu1 %v7133_v3  ;;  %v7256_v3 = vld [vmem:[#allocation5 + $0x564] ss:$16 sps:$4 sm:$0xff]  }
  0x7f   :  { %2197 = vmatmul.mubr.bf16.vlgmr.msra.gmra.mxu0 %v7122_v4  ;;  %v7199_v4 = vld [vmem:[#allocation2 + $0x194] ss:$28 sps:$4 sm:$0xff]  }
  0x80   :  { %2390 = vmatmul.mubr.bf16.vlgmr.msra.gmra.mxu1 %v7125_v5  ;;  %2551 = vmatpush1.bf16.msra.mxu0 %v7128_v6  ;;  %v7254_v5 = vld [vmem:[#allocation5 + $0x560] ss:$16 sps:$4 sm:$0xff]   ;;  %v7268_v6 = vld [vmem:[#allocation5 + $0x544] ss:$16 sps:$4 sm:$0xff]  }
  0x81   :  { %2744 = vmatpush1.bf16.msra.mxu1 %v7131_v7  ;;  %2206 = vmatprep.mubr.bf16.mxu0 %v7134_v8  ;;  %v7280_v7 = vld [vmem:[#allocation5 + $0x604] ss:$16 sps:$4 sm:$0xff]   ;;  %v7278_v8 = vld [vmem:[#allocation5 + $0x600] ss:$16 sps:$4 sm:$0xff]  }
  0x82   :  { %2399 = vmatprep.mubr.bf16.mxu1 %v7136_v9  ;;  %2552 = vmatprep.subr.bf16.mxu0 %v7142_v10  ;;  %v7201_v9 = vld [vmem:[#allocation2 + $0x188] ss:$28 sps:$4 sm:$0xff]   ;;  %v7266_v10 = vld [vmem:[#allocation5 + $0x540] ss:$16 sps:$4 sm:$0xff]  }
  0x83   :  { %2745 = vmatprep.subr.bf16.mxu1 %v7154_v11  ;;  %v7202_v11 = vld [vmem:[#allocation2 + $0x190] ss:$28 sps:$4 sm:$0xff]  }
  0x84   :  { %2553 = vmatpush1.bf16.msra.mxu0 %v7140_v12  ;;  %v7277_v12 = vld [vmem:[#allocation5 + $0x524] ss:$16 sps:$4 sm:$0xff]  }
  0x85   :  { %2746 = vmatpush1.bf16.msra.mxu1 %v7152_v14  ;;  %2554 = vmatprep.subr.bf16.mxu0 %v7151_v13  ;;  %v7206_v13 = vld [vmem:[#allocation2 + $0x1c4] ss:$28 sps:$4 sm:$0xff]   ;;  %v7208_v14 = vld [vmem:[#allocation2 + $0x1cc] ss:$28 sps:$4 sm:$0xff]  }
  0x86   :  { %2747 = vmatprep.subr.bf16.mxu1 %v7175_v15  ;;  %v7275_v15 = vld [vmem:[#allocation5 + $0x520] ss:$16 sps:$4 sm:$0xff]  }
  0x87   :  { %2207 = vmatmul.mubr.bf16.gmra.mxu0 %v7138_v16  ;;  %v7289_v16 = vld [vmem:[#allocation5 + $0x504] ss:$16 sps:$4 sm:$0xff]  }
  0x88   :  { %2400 = vmatmul.mubr.bf16.gmra.mxu1 %v7139_v17  ;;  %2216 = vmatprep.mubr.bf16.mxu0 %v7143_v18  ;;  %v7299_v17 = vld [vmem:[#allocation5 + $0x2ec] ss:$16 sps:$4 sm:$0xff]  }
  0x89   :  { %2409 = vmatprep.mubr.bf16.mxu1 %v7145_v19  ;;  %2555 = vmatpush1.bf16.msra.mxu0 %v7149_v20  ;;  %v7210_v18 = vld [vmem:[#allocation2 + $0x1c0] ss:$28 sps:$4 sm:$0xff]  }
  0x8a   :  { %2748 = vmatpush1.bf16.msra.mxu1 %v7173_v21  ;;  %2556 = vmatprep.subr.bf16.mxu0 %v7163_v22  ;;  %v7287_v19 = vld [vmem:[#allocation5 + $0x500] ss:$16 sps:$4 sm:$0xff]   ;;  %v7296_v20 = vld [vmem:[#allocation5 + $0xec] ss:$16 sps:$4 sm:$0xff]   ;;  %v7211_v21 = vld [vmem:[#allocation2 + $0x1c8] ss:$28 sps:$4 sm:$0xff]  }
  0x8b   :  { %2749 = vmatprep.subr.bf16.mxu1 %v7196_v23  ;;  %v7218_v22 = vld [vmem:[#allocation2 + $0x1fc] ss:$28 sps:$4 sm:$0xff]   ;;  %v7220_v23 = vld [vmem:[#allocation2 + $0x204] ss:$28 sps:$4 sm:$0xff]  }
  0x8d   :  { %2557 = vmatpush1.bf16.msra.mxu0 %v7161_v24  ;;  %v7222_v24 = vld [vmem:[#allocation2 + $0x1f8] ss:$28 sps:$4 sm:$0xff]  }
  0x8e   :  { %2750 = vmatpush1.bf16.msra.mxu1 %v7194_v25  ;;  %2558 = vmatprep.subr.bf16.mxu0 %v7172_v27  ;;  %v7223_v25 = vld [vmem:[#allocation2 + $0x200] ss:$28 sps:$4 sm:$0xff]  }
  0x8f   :  { %2217 = vmatmul.mubr.bf16.gmra.mxu0 %v7147_v26  ;;  %2751 = vmatprep.subr.bf16.mxu1 %v7217_v35  ;;  %v7227_v26 = vld [vmem:[#allocation2 + $0x234] ss:$28 sps:$4 sm:$0xff]   ;;  %v7229_v27 = vld [vmem:[#allocation2 + $0x23c] ss:$28 sps:$4 sm:$0xff]   ;;  %v7250_v35 = vld [vmem:[#allocation2 + $0x2ac] ss:$28 sps:$4 sm:$0xff]  }
  0x90   :  { %2410 = vmatmul.mubr.bf16.gmra.mxu1 %v7148_v28  ;;  %2226 = vmatprep.mubr.bf16.mxu0 %v7155_v29  ;;  %v7231_v28 = vld [vmem:[#allocation2 + $0x230] ss:$28 sps:$4 sm:$0xff]   ;;  %v7232_v29 = vld [vmem:[#allocation2 + $0x238] ss:$28 sps:$4 sm:$0xff]  }
  0x91   :  { %2419 = vmatprep.mubr.bf16.mxu1 %v7157_v30  ;;  %2559 = vmatpush1.bf16.msra.mxu0 %v7170_v31  ;;  %v7239_v30 = vld [vmem:[#allocation2 + $0x26c] ss:$28 sps:$4 sm:$0xff]   ;;  %v7241_v31 = vld [vmem:[#allocation2 + $0x274] ss:$28 sps:$4 sm:$0xff]  }
  0x92   :  { %2560 = vmatprep.subr.bf16.mxu0 %v7184_v32  ;;  %2752 = vmatpush1.bf16.msra.mxu1 %v7215_v34  ;;  %v7243_v32 = vld [vmem:[#allocation2 + $0x268] ss:$28 sps:$4 sm:$0xff]  }
  0x93   :  { %2753 = vmatprep.subr.bf16.mxu1 %v7238_v47  ;;  %v7248_v34 = vld [vmem:[#allocation2 + $0x2a4] ss:$28 sps:$4 sm:$0xff]   ;;  %v7283_v47 = vld [vmem:[#allocation2 + $0x354] ss:$28 sps:$4 sm:$0xff]  }
  0x95   :  { %2561 = vmatpush1.bf16.msra.mxu0 %v7182_v33  ;;  %v7244_v33 = vld [vmem:[#allocation2 + $0x270] ss:$28 sps:$4 sm:$0xff]  }
  0x96   :  { %2562 = vmatprep.subr.bf16.mxu0 %v7193_v36  ;;  %2754 = vmatpush1.bf16.msra.mxu1 %v7236_v46  ;;  %v7252_v36 = vld [vmem:[#allocation2 + $0x2a0] ss:$28 sps:$4 sm:$0xff]   ;;  %v7281_v46 = vld [vmem:[#allocation2 + $0x34c] ss:$28 sps:$4 sm:$0xff]  }
  0x97   :  { %2227 = vmatmul.mubr.bf16.gmra.mxu0 %v7159_v37  ;;  %2755 = vmatprep.subr.bf16.mxu1 %v7259_v59  ;;  %v7253_v37 = vld [vmem:[#allocation2 + $0x2a8] ss:$28 sps:$4 sm:$0xff]  }
  0x98   :  { %2420 = vmatmul.mubr.bf16.gmra.mxu1 %v7160_v38  ;;  %2236 = vmatprep.mubr.bf16.mxu0 %v7164_v39  ;;  %v7260_v38 = vld [vmem:[#allocation2 + $0x2dc] ss:$28 sps:$4 sm:$0xff]   ;;  %v7262_v39 = vld [vmem:[#allocation2 + $0x2e4] ss:$28 sps:$4 sm:$0xff]  }
  0x99   :  { %2429 = vmatprep.mubr.bf16.mxu1 %v7166_v40  ;;  %2563 = vmatpush1.bf16.msra.mxu0 %v7191_v41  ;;  %v7264_v40 = vld [vmem:[#allocation2 + $0x2d8] ss:$28 sps:$4 sm:$0xff]   ;;  %v7265_v41 = vld [vmem:[#allocation2 + $0x2e0] ss:$28 sps:$4 sm:$0xff]  }
  0x9a   :  { %2564 = vmatprep.subr.bf16.mxu0 %v7205_v42  ;;  %2756 = vmatpush1.bf16.msra.mxu1 %v7257_v58  ;;  %v7269_v42 = vld [vmem:[#allocation2 + $0x314] ss:$28 sps:$4 sm:$0xff]   ;;  %v7309_v58 = vld [vmem:[#allocation5 + $0x2cc] ss:$16 sps:$4 sm:$0xff]   ;;  %v7304_v59 = vld [vmem:[#allocation5 + $0xc8] ss:$16 sps:$4 sm:$0xff]  }
  0x9b   :  { %2757 = vmatprep.subr.bf16.mxu1 %v7280_v7  ;;  %v7327_v7 = vld [vmem:[#allocation5 + $0x288] ss:$16 sps:$4 sm:$0xff]  }
  0x9d   :  { %2565 = vmatpush1.bf16.msra.mxu0 %v7203_v43  ;;  %v7271_v43 = vld [vmem:[#allocation2 + $0x31c] ss:$28 sps:$4 sm:$0xff]  }
  0x9e   :  { %2566 = vmatprep.subr.bf16.mxu0 %v7214_v45  ;;  %2758 = vmatpush1.bf16.msra.mxu1 %v7278_v8  ;;  %v7274_v45 = vld [vmem:[#allocation2 + $0x318] ss:$28 sps:$4 sm:$0xff]   ;;  %v7312_v8 = vld [vmem:[#allocation2 + $0x80] ss:$28 sps:$4 sm:$0xff]  }
  0x9f   :  { %2237 = vmatmul.mubr.bf16.gmra.mxu0 %v7168_v44  ;;  %3129 = vmatprep.subr.bf16.mxu1 %v7299_v17  ;;  %v7273_v44 = vld [vmem:[#allocation2 + $0x310] ss:$28 sps:$4 sm:$0xff]   ;;  %v7344_v17 = vld [vmem:[#allocation5 + $0x48] ss:$16 sps:$4 sm:$0xff]  }
  0xa0   :  { %2430 = vmatmul.mubr.bf16.gmra.mxu1 %v7169_v48  ;;  %2246 = vmatprep.mubr.bf16.mxu0 %v7176_v49  ;;  %v7285_v48 = vld [vmem:[#allocation2 + $0x348] ss:$28 sps:$4 sm:$0xff]   ;;  %v7286_v49 = vld [vmem:[#allocation2 + $0x350] ss:$28 sps:$4 sm:$0xff]  }
  0xa1   :  { %2439 = vmatprep.mubr.bf16.mxu1 %v7178_v50  ;;  %2567 = vmatpush2.bf16.msra.mxu0 %v7212_v51  ;;  %v7292_v50 = vld [vmem:[#allocation2 + $0x14] ss:$28 sps:$4 sm:$0xff]   ;;  %v9649_v51 = vmov 0  }
  0xa2   :  { %2568 = vmatprep.subr.bf16.mxu0 %v7226_v52  ;;  %v7290_v52 = vld [vmem:[#allocation2 + $0x10] ss:$28 sps:$4 sm:$0xff]  }
  0xa5   :  { %2569 = vmatpush2.bf16.msra.mxu0 %v7224_v55  ;;  %v7297_v55 = vld [vmem:[#allocation5 + $0x2e8] ss:$16 sps:$4 sm:$0xff]  }
  0xa6   :  { %2570 = vmatprep.subr.bf16.mxu0 %v7235_v57  ;;  %v7306_v57 = vld [vmem:[#allocation5 + $0xcc] ss:$16 sps:$4 sm:$0xff]  }
  0xa7   :  { %2247 = vmatmul.mubr.bf16.gmra.mxu0 %v7180_v53  ;;  %v7293_v53 = vld [vmem:[#allocation2 + $0x18] ss:$28 sps:$4 sm:$0xff]  }
  0xa8   :  { %2440 = vmatmul.mubr.bf16.gmra.mxu1 %v7181_v54  ;;  %2256 = vmatprep.mubr.bf16.mxu0 %v7185_v56  ;;  %v7294_v54 = vld [vmem:[#allocation5 + $0xe8] ss:$16 sps:$4 sm:$0xff]  }
  0xa9   :  { %2449 = vmatprep.mubr.bf16.mxu1 %v7187_v60  ;;  %2571 = vmatpush2.bf16.msra.mxu0 %v7233_v61  ;;  %v7300_v56 = vld [vmem:[#allocation2 + $0x4c] ss:$28 sps:$4 sm:$0xff]  }
  0xaa   :  { %2572 = vmatprep.subr.bf16.mxu0 %v7247_v62  ;;  %v7307_v60 = vld [vmem:[#allocation5 + $0x2c8] ss:$16 sps:$4 sm:$0xff]   ;;  %v7316_v62 = vld [vmem:[#allocation5 + $0xac] ss:$16 sps:$4 sm:$0xff]  }
  0xab   :  { %v7302_v61 = vld [vmem:[#allocation2 + $0x48] ss:$28 sps:$4 sm:$0xff]  }
  0xad   :  { %2573 = vmatpush2.bf16.msra.mxu0 %v7245_v1  ;;  %v7310_v1 = vld [vmem:[#allocation2 + $0x84] ss:$28 sps:$4 sm:$0xff]  }
  0xae   :  { %2574 = vmatprep.subr.bf16.mxu0 %v7256_v3  ;;  %v7317_v3 = vld [vmem:[#allocation5 + $0x2a8] ss:$16 sps:$4 sm:$0xff]  }
  0xaf   :  { %2257 = vmatmul.mubr.bf16.gmra.mxu0 %v7189_v63  ;;  %v7319_v63 = vld [vmem:[#allocation5 + $0x2ac] ss:$16 sps:$4 sm:$0xff]  }
  0xb0   :  { %2450 = vmatmul.mubr.bf16.gmra.mxu1 %v7190_v0  ;;  %2266 = vmatprep.mubr.bf16.mxu0 %v7197_v2  ;;  %v7303_v0 = vld [vmem:[#allocation2 + $0x50] ss:$28 sps:$4 sm:$0xff]   ;;  %v7314_v2 = vld [vmem:[#allocation5 + $0xa8] ss:$16 sps:$4 sm:$0xff]  }
  0xb1   :  { %2459 = vmatprep.mubr.bf16.mxu1 %v7199_v4  ;;  %2575 = vmatpush2.bf16.msra.mxu0 %v7254_v5  ;;  %v7326_v4 = vld [vmem:[#allocation5 + $0x8c] ss:$16 sps:$4 sm:$0xff]  }
  0xb2   :  { %2576 = vmatprep.subr.bf16.mxu0 %v7268_v6  ;;  %v7329_v5 = vld [vmem:[#allocation5 + $0x28c] ss:$16 sps:$4 sm:$0xff]   ;;  %v7324_v6 = vld [vmem:[#allocation5 + $0x88] ss:$16 sps:$4 sm:$0xff]  }
  0xb5   :  { %2577 = vmatpush2.bf16.msra.mxu0 %v7266_v10  ;;  %v7320_v10 = vld [vmem:[#allocation2 + $0xbc] ss:$28 sps:$4 sm:$0xff]  }
  0xb6   :  { %2578 = vmatprep.subr.bf16.mxu0 %v7277_v12  ;;  %v7339_v12 = vld [vmem:[#allocation5 + $0x26c] ss:$16 sps:$4 sm:$0xff]  }
  0xb7   :  { %2267 = vmatmul.mubr.bf16.gmra.mxu0 %v7201_v9  ;;  %v7313_v9 = vld [vmem:[#allocation2 + $0x88] ss:$28 sps:$4 sm:$0xff]  }
  0xb8   :  { %2460 = vmatmul.mubr.bf16.gmra.mxu1 %v7202_v11  ;;  %2276 = vmatprep.mubr.bf16.mxu0 %v7206_v13  ;;  %v7336_v11 = vld [vmem:[#allocation5 + $0x6c] ss:$16 sps:$4 sm:$0xff]   ;;  %v7334_v13 = vld [vmem:[#allocation5 + $0x68] ss:$16 sps:$4 sm:$0xff]  }
  0xb9   :  { %2469 = vmatprep.mubr.bf16.mxu1 %v7208_v14  ;;  %2579 = vmatpush2.bf16.msra.mxu0 %v7275_v15  ;;  %v7337_v14 = vld [vmem:[#allocation5 + $0x268] ss:$16 sps:$4 sm:$0xff]   ;;  %v7346_v15 = vld [vmem:[#allocation5 + $0x4c] ss:$16 sps:$4 sm:$0xff]  }
  0xba   :  { %2580 = vmatprep.subr.bf16.mxu0 %v7289_v16  ;;  %v7349_v16 = vld [vmem:[#allocation5 + $0x24c] ss:$16 sps:$4 sm:$0xff]  }
  0xbd   :  { %2581 = vmatpush2.bf16.msra.mxu0 %v7287_v19  ;;  %v7322_v19 = vld [vmem:[#allocation2 + $0xb8] ss:$28 sps:$4 sm:$0xff]  }
  0xbe   :  { %2936 = vmatprep.subr.bf16.mxu0 %v7296_v20  ;;  %v7323_v20 = vld [vmem:[#allocation2 + $0xc0] ss:$28 sps:$4 sm:$0xff]  }
  0xbf   :  { %2277 = vmatmul.mubr.bf16.gmra.mxu0 %v7210_v18  ;;  %v7347_v18 = vld [vmem:[#allocation5 + $0x248] ss:$16 sps:$4 sm:$0xff]  }
  0xc0   :  { %2470 = vmatmul.mubr.bf16.gmra.mxu1 %v7211_v21  ;;  %2286 = vmatprep.mubr.bf16.mxu0 %v7218_v22  ;;  %v7330_v21 = vld [vmem:[#allocation2 + $0xf4] ss:$28 sps:$4 sm:$0xff]   ;;  %v7356_v22 = vld [vmem:[#allocation5 + $0x2c] ss:$16 sps:$4 sm:$0xff]  }
  0xc1   :  { %2479 = vmatprep.mubr.bf16.mxu1 %v7220_v23  ;;  %v7359_v23 = vld [vmem:[#allocation5 + $0x22c] ss:$16 sps:$4 sm:$0xff]  }
  0xc7   :  { %2287 = vmatmul.mubr.bf16.gmra.mxu0 %v7222_v24  ;;  %v7354_v24 = vld [vmem:[#allocation5 + $0x28] ss:$16 sps:$4 sm:$0xff]  }
  0xc8   :  { %2480 = vmatmul.mubr.bf16.gmra.mxu1 %v7223_v25  ;;  %2296 = vmatprep.mubr.bf16.mxu0 %v7227_v26  ;;  %v7357_v25 = vld [vmem:[#allocation5 + $0x228] ss:$16 sps:$4 sm:$0xff]   ;;  %v7366_v26 = vld [vmem:[#allocation5 + $0xc] ss:$16 sps:$4 sm:$0xff]  }
  0xc9   :  { %2489 = vmatprep.mubr.bf16.mxu1 %v7229_v27  ;;  %v7369_v27 = vld [vmem:[#allocation5 + $0x20c] ss:$16 sps:$4 sm:$0xff]  }
  0xcf   :  { %2297 = vmatmul.mubr.bf16.gmra.mxu0 %v7231_v28  ;;  %v7364_v28 = vld [vmem:[#allocation5 + $0x8] ss:$16 sps:$4 sm:$0xff]  }
  0xd0   :  { %2490 = vmatmul.mubr.bf16.gmra.mxu1 %v7232_v29  ;;  %2306 = vmatprep.mubr.bf16.mxu0 %v7239_v30  ;;  %v7367_v29 = vld [vmem:[#allocation5 + $0x208] ss:$16 sps:$4 sm:$0xff]   ;;  %v7332_v30 = vld [vmem:[#allocation2 + $0xf0] ss:$28 sps:$4 sm:$0xff]  }
  0xd1   :  { %2499 = vmatprep.mubr.bf16.mxu1 %v7241_v31  ;;  %v7333_v31 = vld [vmem:[#allocation2 + $0xf8] ss:$28 sps:$4 sm:$0xff]  }
  0xd7   :  { %2307 = vmatmul.mubr.bf16.gmra.mxu0 %v7243_v32  ;;  %v7340_v32 = vld [vmem:[#allocation2 + $0x12c] ss:$28 sps:$4 sm:$0xff]  }
  0xd8   :  { %2500 = vmatmul.mubr.bf16.gmra.mxu1 %v7244_v33  ;;  %2316 = vmatprep.mubr.bf16.mxu0 %v7248_v34  ;;  %v7376_v33 = vld [vmem:[#allocation5 + $0x1ec] ss:$16 sps:$4 sm:$0xff]  }
  0xd9   :  { %2509 = vmatprep.mubr.bf16.mxu1 %v7250_v35  ;;  %v7379_v34 = vld [vmem:[#allocation5 + $0x3ec] ss:$16 sps:$4 sm:$0xff]   ;;  %v7374_v35 = vld [vmem:[#allocation5 + $0x1e8] ss:$16 sps:$4 sm:$0xff]  }
  0xdf   :  { %2317 = vmatmul.mubr.bf16.gmra.mxu0 %v7252_v36  ;;  %v7377_v36 = vld [vmem:[#allocation5 + $0x3e8] ss:$16 sps:$4 sm:$0xff]  }
  0xe0   :  { %2510 = vmatmul.mubr.bf16.gmra.mxu1 %v7253_v37  ;;  %2326 = vmatprep.mubr.bf16.mxu0 %v7260_v38  ;;  %v7386_v37 = vld [vmem:[#allocation5 + $0x1cc] ss:$16 sps:$4 sm:$0xff]  }
  0xe1   :  { %2519 = vmatprep.mubr.bf16.mxu1 %v7262_v39  ;;  %v7389_v38 = vld [vmem:[#allocation5 + $0x3cc] ss:$16 sps:$4 sm:$0xff]   ;;  %v7384_v39 = vld [vmem:[#allocation5 + $0x1c8] ss:$16 sps:$4 sm:$0xff]  }
  0xe7   :  { %2327 = vmatmul.mubr.bf16.gmra.mxu0 %v7264_v40  ;;  %v7387_v40 = vld [vmem:[#allocation5 + $0x3c8] ss:$16 sps:$4 sm:$0xff]  }
  0xe8   :  { %2520 = vmatmul.mubr.bf16.gmra.mxu1 %v7265_v41  ;;  %2336 = vmatprep.mubr.bf16.mxu0 %v7269_v42  ;;  %v7342_v41 = vld [vmem:[#allocation2 + $0x128] ss:$28 sps:$4 sm:$0xff]   ;;  %v7343_v42 = vld [vmem:[#allocation2 + $0x130] ss:$28 sps:$4 sm:$0xff]  }
  0xe9   :  { %2529 = vmatprep.mubr.bf16.mxu1 %v7271_v43  ;;  %v7350_v43 = vld [vmem:[#allocation2 + $0x164] ss:$28 sps:$4 sm:$0xff]  }
  0xef   :  { %2337 = vmatmul.mubr.bf16.gmra.mxu0 %v7273_v44  ;;  %v7396_v44 = vld [vmem:[#allocation5 + $0x1ac] ss:$16 sps:$4 sm:$0xff]  }
  0xf0   :  { %2530 = vmatmul.mubr.bf16.gmra.mxu1 %v7274_v45  ;;  %2346 = vmatprep.mubr.bf16.mxu0 %v7281_v46  ;;  %v7399_v45 = vld [vmem:[#allocation5 + $0x3ac] ss:$16 sps:$4 sm:$0xff]   ;;  %v7394_v46 = vld [vmem:[#allocation5 + $0x1a8] ss:$16 sps:$4 sm:$0xff]  }
  0xf1   :  { %2539 = vmatprep.mubr.bf16.mxu1 %v7283_v47  ;;  %v7397_v47 = vld [vmem:[#allocation5 + $0x3a8] ss:$16 sps:$4 sm:$0xff]  }
  0xf7   :  { %2347 = vmatmul.mubr.bf16.gmra.mxu0 %v7285_v48  ;;  %v7406_v48 = vld [vmem:[#allocation5 + $0x18c] ss:$16 sps:$4 sm:$0xff]  }
  0xf8   :  { %2540 = vmatmul.mubr.bf16.gmra.mxu1 %v7286_v49  ;;  %2582 = vmatprep.mubr.bf16.mxu0 %v7292_v50  ;;  %v7409_v49 = vld [vmem:[#allocation5 + $0x38c] ss:$16 sps:$4 sm:$0xff]   ;;  %v7404_v50 = vld [vmem:[#allocation5 + $0x188] ss:$16 sps:$4 sm:$0xff]  }
  0xf9   :  { %2775 = vmatprep.mubr.bf16.mxu1 %v9649_v51 }
  0xff   :  { %2583 = vmatmul.mubr.bf16.vlgmr.msra.gmra.mxu0 %v7290_v52  ;;  %v7407_v52 = vld [vmem:[#allocation5 + $0x388] ss:$16 sps:$4 sm:$0xff]  }
 0x100   :  { %2776 = vmatmul.mubr.bf16.vlgmr.msra.gmra.mxu1 %v7293_v53  ;;  %2937 = vmatpush1.bf16.msra.mxu0 %v7294_v54  ;;  %v7352_v53 = vld [vmem:[#allocation2 + $0x160] ss:$28 sps:$4 sm:$0xff]   ;;  %v7353_v54 = vld [vmem:[#allocation2 + $0x168] ss:$28 sps:$4 sm:$0xff]  }
 0x101   :  { %3130 = vmatpush1.bf16.msra.mxu1 %v7297_v55  ;;  %2592 = vmatprep.mubr.bf16.mxu0 %v7300_v56  ;;  %v7360_v55 = vld [vmem:[#allocation2 + $0x19c] ss:$28 sps:$4 sm:$0xff]  }
 0x102   :  { %2785 = vmatprep.mubr.bf16.mxu1 %v9649_v51  ;;  %2938 = vmatprep.subr.bf16.mxu0 %v7306_v57  ;;  %v7416_v56 = vld [vmem:[#allocation5 + $0x16c] ss:$16 sps:$4 sm:$0xff]  }
 0x103   :  { %3131 = vmatprep.subr.bf16.mxu1 %v7309_v58  ;;  %v7419_v57 = vld [vmem:[#allocation5 + $0x36c] ss:$16 sps:$4 sm:$0xff]   ;;  %v7414_v58 = vld [vmem:[#allocation5 + $0x168] ss:$16 sps:$4 sm:$0xff]  }
 0x104   :  { %2939 = vmatpush1.bf16.msra.mxu0 %v7304_v59  ;;  %v7417_v59 = vld [vmem:[#allocation5 + $0x368] ss:$16 sps:$4 sm:$0xff]  }
 0x105   :  { %3132 = vmatpush1.bf16.msra.mxu1 %v7307_v60  ;;  %2940 = vmatprep.subr.bf16.mxu0 %v7316_v62  ;;  %v7426_v60 = vld [vmem:[#allocation5 + $0x14c] ss:$16 sps:$4 sm:$0xff]   ;;  %v7424_v62 = vld [vmem:[#allocation5 + $0x148] ss:$16 sps:$4 sm:$0xff]  }
 0x106   :  { %3133 = vmatprep.subr.bf16.mxu1 %v7319_v63  ;;  %v7427_v63 = vld [vmem:[#allocation5 + $0x348] ss:$16 sps:$4 sm:$0xff]  }
 0x107   :  { %2593 = vmatmul.mubr.bf16.gmra.mxu0 %v7302_v61  ;;  %v7429_v61 = vld [vmem:[#allocation5 + $0x34c] ss:$16 sps:$4 sm:$0xff]  }
 0x108   :  { %2786 = vmatmul.mubr.bf16.gmra.mxu1 %v7303_v0  ;;  %2602 = vmatprep.mubr.bf16.mxu0 %v7310_v1  ;;  %v448_v0 = vlaneseq  ;;  %v7362_v1 = vld [vmem:[#allocation2 + $0x198] ss:$28 sps:$4 sm:$0xff]  }
 0x109   :  { %2795 = vmatprep.mubr.bf16.mxu1 %v9649_v51  ;;  %2941 = vmatpush1.bf16.msra.mxu0 %v7314_v2  ;;  %v7363_v2 = vld [vmem:[#allocation2 + $0x1a0] ss:$28 sps:$4 sm:$0xff]  }
 0x10a   :  { %3134 = vmatpush1.bf16.msra.mxu1 %v7317_v3  ;;  %2942 = vmatprep.subr.bf16.mxu0 %v7326_v4  ;;  %v7370_v3 = vld [vmem:[#allocation2 + $0x1d4] ss:$28 sps:$4 sm:$0xff]   ;;  %v7436_v4 = vld [vmem:[#allocation5 + $0x12c] ss:$16 sps:$4 sm:$0xff]  }
 0x10b   :  { %3135 = vmatprep.subr.bf16.mxu1 %v7329_v5  ;;  %v7439_v5 = vld [vmem:[#allocation5 + $0x32c] ss:$16 sps:$4 sm:$0xff]  }
 0x10d   :  { %2943 = vmatpush1.bf16.msra.mxu0 %v7324_v6  ;;  %v7434_v6 = vld [vmem:[#allocation5 + $0x128] ss:$16 sps:$4 sm:$0xff]  }
 0x10e   :  { %3136 = vmatpush1.bf16.msra.mxu1 %v7327_v7  ;;  %2944 = vmatprep.subr.bf16.mxu0 %v7336_v11  ;;  %v7437_v7 = vld [vmem:[#allocation5 + $0x328] ss:$16 sps:$4 sm:$0xff]   ;;  %v446_v11 = vld [vmem:[#allocation7] sm:$0xf] }
 0x10f   :  { %3137 = vmatprep.subr.bf16.mxu1 %v7339_v12  ;;  %2603 = vmatmul.mubr.bf16.gmra.mxu0 %v7312_v8  ;;  %v8065_v8 = vshrl.u32 %v448_v0, 7  ;;  %v7444_v12 = vld [vmem:[#allocation5 + $0x108] ss:$16 sps:$4 sm:$0xff]  }
 0x110   :  { %2796 = vmatmul.mubr.bf16.gmra.mxu1 %v7313_v9  ;;  %2612 = vmatprep.mubr.bf16.mxu0 %v7320_v10  ;;  %v7446_v9 = vld [vmem:[#allocation5 + $0x10c] ss:$16 sps:$4 sm:$0xff]  }
 0x111   :  { %2805 = vmatprep.mubr.bf16.mxu1 %v9649_v51  ;;  %2945 = vmatpush1.bf16.msra.mxu0 %v7334_v13  ;;  %9687 = vst [vmem:[#allocation16_spill] sm:$0xff] %v8065_v8  ;;  %v7449_v10 = vld [vmem:[#allocation5 + $0x30c] ss:$16 sps:$4 sm:$0xff]   ;;  %v7447_v13 = vld [vmem:[#allocation5 + $0x308] ss:$16 sps:$4 sm:$0xff]  }
 0x112   :  { %3138 = vmatpush1.bf16.msra.mxu1 %v7337_v14  ;;  %2946 = vmatprep.subr.bf16.mxu0 %v7346_v15  ;;  %v9647_v14 = vsub.s32 0, %v8065_v8  ;;  %v7372_v15 = vld [vmem:[#allocation2 + $0x1d0] ss:$28 sps:$4 sm:$0xff]  }
 0x113   :  { %3139 = vmatprep.subr.bf16.mxu1 %v7349_v16  ;;  %v7373_v16 = vld [vmem:[#allocation2 + $0x1d8] ss:$28 sps:$4 sm:$0xff]  }
 0x115   :  { %2947 = vmatpush1.bf16.msra.mxu0 %v7344_v17  ;;  %v9648_v17 = vsub.s32 1, %v8065_v8 }
 0x116   :  { %3140 = vmatpush1.bf16.msra.mxu1 %v7347_v18  ;;  %2948 = vmatprep.subr.bf16.mxu0 %v7356_v22  ;;  %v7380_v18 = vld [vmem:[#allocation2 + $0x20c] ss:$28 sps:$4 sm:$0xff]  }
 0x117   :  { %3141 = vmatprep.subr.bf16.mxu1 %v7359_v23  ;;  %2613 = vmatmul.mubr.bf16.gmra.mxu0 %v7322_v19  ;;  %v7452_v19 = vld [vmem:[#allocation5 + $0x4ec] ss:$16 sps:$4 sm:$0xff]   ;;  %v8076_v22 = vrot.slane %v446_v11, %v9648_v17 }
 0x118   :  { %2806 = vmatmul.mubr.bf16.gmra.mxu1 %v7323_v20  ;;  %2622 = vmatprep.mubr.bf16.mxu0 %v7330_v21  ;;  %v7455_v20 = vld [vmem:[#allocation5 + $0x6ec] ss:$16 sps:$4 sm:$0xff]   ;;  %v8072_v21 = vrot.slane %v446_v11, %v9647_v14 }
 0x119   :  { %2815 = vmatprep.mubr.bf16.mxu1 %v9649_v51  ;;  %2949 = vmatpush1.bf16.msra.mxu0 %v7354_v24 }
 0x11a   :  { %3142 = vmatpush1.bf16.msra.mxu1 %v7357_v25  ;;  %2950 = vmatprep.subr.bf16.mxu0 %v7366_v26 }
 0x11b   :  { %3143 = vmatprep.subr.bf16.mxu1 %v7369_v27 }
 0x11d   :  { %2951 = vmatpush1.bf16.msra.mxu0 %v7364_v28  ;;  %v7382_v28 = vld [vmem:[#allocation2 + $0x208] ss:$28 sps:$4 sm:$0xff]  }
 0x11e   :  { %3144 = vmatpush1.bf16.msra.mxu1 %v7367_v29  ;;  %2952 = vmatprep.subr.bf16.mxu0 %v7376_v33  ;;  %v7383_v29 = vld [vmem:[#allocation2 + $0x210] ss:$28 sps:$4 sm:$0xff]  }
 0x11f   :  { %3145 = vmatprep.subr.bf16.mxu1 %v7379_v34  ;;  %2623 = vmatmul.mubr.bf16.gmra.mxu0 %v7332_v30 }
 0x120   :  { %2816 = vmatmul.mubr.bf16.gmra.mxu1 %v7333_v31  ;;  %2632 = vmatprep.mubr.bf16.mxu0 %v7340_v32 }
 0x121   :  { %2825 = vmatprep.mubr.bf16.mxu1 %v9649_v51  ;;  %2953 = vmatpush2.bf16.msra.mxu0 %v7374_v35 }
 0x122   :  { %3146 = vmatpush2.bf16.msra.mxu1 %v7377_v36  ;;  %2954 = vmatprep.subr.bf16.mxu0 %v7386_v37  ;;  %v7390_v36 = vld [vmem:[#allocation2 + $0x244] ss:$28 sps:$4 sm:$0xff]  }
 0x123   :  { %3147 = vmatprep.subr.bf16.mxu1 %v7389_v38 }
 0x125   :  { %2955 = vmatpush2.bf16.msra.mxu0 %v7384_v39 }
 0x126   :  { %3148 = vmatpush2.bf16.msra.mxu1 %v7387_v40  ;;  %2956 = vmatprep.subr.bf16.mxu0 %v7396_v44 }
 0x127   :  { %3149 = vmatprep.subr.bf16.mxu1 %v7399_v45  ;;  %2633 = vmatmul.mubr.bf16.gmra.mxu0 %v7342_v41 }
 0x128   :  { %2826 = vmatmul.mubr.bf16.gmra.mxu1 %v7343_v42  ;;  %2642 = vmatprep.mubr.bf16.mxu0 %v7350_v43 }
 0x129   :  { %2835 = vmatprep.mubr.bf16.mxu1 %v9649_v51  ;;  %2957 = vmatpush2.bf16.msra.mxu0 %v7394_v46 }
 0x12a   :  { %3150 = vmatpush2.bf16.msra.mxu1 %v7397_v47  ;;  %2958 = vmatprep.subr.bf16.mxu0 %v7406_v48  ;;  %v7392_v47 = vld [vmem:[#allocation2 + $0x240] ss:$28 sps:$4 sm:$0xff]   ;;  %v7393_v48 = vld [vmem:[#allocation2 + $0x248] ss:$28 sps:$4 sm:$0xff]  }
 0x12b   :  { %3151 = vmatprep.subr.bf16.mxu1 %v7409_v49 }
 0x12d   :  { %2959 = vmatpush2.bf16.msra.mxu0 %v7404_v50 }
 0x12e   :  { %3152 = vmatpush2.bf16.msra.mxu1 %v7407_v52  ;;  %2960 = vmatprep.subr.bf16.mxu0 %v7416_v56  ;;  %v7400_v56 = vld [vmem:[#allocation2 + $0x27c] ss:$28 sps:$4 sm:$0xff]  }
 0x12f   :  { %3153 = vmatprep.subr.bf16.mxu1 %v7419_v57  ;;  %2643 = vmatmul.mubr.bf16.gmra.mxu0 %v7352_v53 }
 0x130   :  { %2836 = vmatmul.mubr.bf16.gmra.mxu1 %v7353_v54  ;;  %2652 = vmatprep.mubr.bf16.mxu0 %v7360_v55 }
 0x131   :  { %2845 = vmatprep.mubr.bf16.mxu1 %v9649_v51  ;;  %2961 = vmatpush2.bf16.msra.mxu0 %v7414_v58 }
 0x132   :  { %3154 = vmatpush2.bf16.msra.mxu1 %v7417_v59  ;;  %2962 = vmatprep.subr.bf16.mxu0 %v7426_v60 }
 0x133   :  { %3155 = vmatprep.subr.bf16.mxu1 %v7429_v61 }
 0x135   :  { %2963 = vmatpush2.bf16.msra.mxu0 %v7424_v62 }
 0x136   :  { %3156 = vmatpush2.bf16.msra.mxu1 %v7427_v63  ;;  %2964 = vmatprep.subr.bf16.mxu0 %v7436_v4  ;;  %v7403_v4 = vld [vmem:[#allocation2 + $0x280] ss:$28 sps:$4 sm:$0xff]  }
 0x137   :  { %3157 = vmatprep.subr.bf16.mxu1 %v7439_v5  ;;  %2653 = vmatmul.mubr.bf16.gmra.mxu0 %v7362_v1 }
 0x138   :  { %2846 = vmatmul.mubr.bf16.gmra.mxu1 %v7363_v2  ;;  %2662 = vmatprep.mubr.bf16.mxu0 %v7370_v3  ;;  %v7402_v3 = vld [vmem:[#allocation2 + $0x278] ss:$28 sps:$4 sm:$0xff]  }
 0x139   :  { %2855 = vmatprep.mubr.bf16.mxu1 %v9649_v51  ;;  %2965 = vmatpush2.bf16.msra.mxu0 %v7434_v6 }
 0x13a   :  { %3158 = vmatpush2.bf16.msra.mxu1 %v7437_v7  ;;  %2966 = vmatprep.subr.bf16.mxu0 %v7446_v9 }
 0x13b   :  { %3159 = vmatprep.subr.bf16.mxu1 %v7449_v10 }
 0x13d   :  { %2967 = vmatpush2.bf16.msra.mxu0 %v7444_v12  ;;  %v7412_v12 = vld [vmem:[#allocation2 + $0x2b4] ss:$28 sps:$4 sm:$0xff]  }
 0x13e   :  { %3160 = vmatpush2.bf16.msra.mxu1 %v7447_v13  ;;  %3322 = vmatprep.subr.bf16.mxu0 %v7452_v19 }
 0x13f   :  { %3515 = vmatprep.subr.bf16.mxu1 %v7455_v20  ;;  %v2198_v23 = vpop.f32.mrf.mxu0  ;;  %2663 = vmatmul.mubr.bf16.gmra.mxu0 %v7372_v15 }
 0x140   :  { %v2391_v24 = vpop.f32.mrf.mxu1  ;;  %2856 = vmatmul.mubr.bf16.gmra.mxu1 %v7373_v16  ;;  %v2199_v25 = vadd.f32 %v2198_v23, %v8072_v21  ;;  %2672 = vmatprep.mubr.bf16.mxu0 %v7380_v18 }
 0x141   :  { %2865 = vmatprep.mubr.bf16.mxu1 %v9649_v51  ;;  %v2200_v26 = vpop.f32.mrf.mxu0 }
 0x142   :  { %v2393_v27 = vpop.f32.mrf.mxu1  ;;  %v8080_v30 = vadd.f32 %v2391_v24, %v2199_v25  ;;  %v2201_v31 = vadd.f32 %v2200_v26, %v8076_v22 }
 0x143   :  { %v2202_v32 = vpop.f32.mrf.mxu0 }
 0x144   :  { %v2395_v33 = vpop.f32.mrf.mxu1  ;;  %v8083_v34 = vadd.f32 %v2393_v27, %v2201_v31  ;;  %v2203_v35 = vadd.f32 %v2202_v32, %v8072_v21  ;;  %v7410_v27 = vld [vmem:[#allocation2 + $0x2b0] ss:$28 sps:$4 sm:$0xff]  }
 0x145   :  { %v2204_v37 = vpop.f32.mrf.mxu0 }
 0x146   :  { %v2397_v38 = vpop.f32.mrf.mxu1  ;;  %v8086_v39 = vadd.f32 %v2395_v33, %v2203_v35  ;;  %v2205_v40 = vadd.f32 %v2204_v37, %v8076_v22  ;;  %v7422_v37 = vld [vmem:[#allocation2 + $0x2ec] ss:$28 sps:$4 sm:$0xff]  }
 0x147   :  { %v2208_v41 = vpop.f32.mrf.mxu0  ;;  %2673 = vmatmul.mubr.bf16.gmra.mxu0 %v7382_v28  ;;  %v7413_v28 = vld [vmem:[#allocation2 + $0x2b8] ss:$28 sps:$4 sm:$0xff]  }
 0x148   :  { %v2401_v42 = vpop.f32.mrf.mxu1  ;;  %2866 = vmatmul.mubr.bf16.gmra.mxu1 %v7383_v29  ;;  %v8089_v43 = vadd.f32 %v2397_v38, %v2205_v40  ;;  %v2209_v44 = vadd.f32 %v2208_v41, %v8072_v21  ;;  %2682 = vmatprep.mubr.bf16.mxu0 %v7390_v36 }
 0x149   :  { %2875 = vmatprep.mubr.bf16.mxu1 %v9649_v51  ;;  %v2210_v45 = vpop.f32.mrf.mxu0 }
 0x14a   :  { %v2403_v46 = vpop.f32.mrf.mxu1  ;;  %v8093_v49 = vadd.f32 %v2401_v42, %v2209_v44  ;;  %v2211_v50 = vadd.f32 %v2210_v45, %v8076_v22 }
 0x14b   :  { %v2212_v52 = vpop.f32.mrf.mxu0 }
 0x14c   :  { %v2405_v53 = vpop.f32.mrf.mxu1  ;;  %v8096_v54 = vadd.f32 %v2403_v46, %v2211_v50  ;;  %v2213_v55 = vadd.f32 %v2212_v52, %v8072_v21 }
 0x14d   :  { %v2214_v57 = vpop.f32.mrf.mxu0 }
 0x14e   :  { %v2407_v58 = vpop.f32.mrf.mxu1  ;;  %v8099_v59 = vadd.f32 %v2405_v53, %v2213_v55  ;;  %v2215_v60 = vadd.f32 %v2214_v57, %v8076_v22  ;;  %v7420_v57 = vld [vmem:[#allocation2 + $0x2e8] ss:$28 sps:$4 sm:$0xff]  }
 0x14f   :  { %v2218_v61 = vpop.f32.mrf.mxu0  ;;  %2683 = vmatmul.mubr.bf16.gmra.mxu0 %v7392_v47 }
 0x150   :  { %v2411_v62 = vpop.f32.mrf.mxu1  ;;  %2876 = vmatmul.mubr.bf16.gmra.mxu1 %v7393_v48  ;;  %v8102_v63 = vadd.f32 %v2407_v58, %v2215_v60  ;;  %v2219_v0 = vadd.f32 %v2218_v61, %v8072_v21  ;;  %2692 = vmatprep.mubr.bf16.mxu0 %v7400_v56  ;;  %v7423_v58 = vld [vmem:[#allocation2 + $0x2f0] ss:$28 sps:$4 sm:$0xff]  }
 0x151   :  { %2885 = vmatprep.mubr.bf16.mxu1 %v9649_v51  ;;  %v2220_v1 = vpop.f32.mrf.mxu0 }
 0x152   :  { %v2413_v2 = vpop.f32.mrf.mxu1  ;;  %v8106_v5 = vadd.f32 %v2411_v62, %v2219_v0  ;;  %v2221_v6 = vadd.f32 %v2220_v1, %v8076_v22  ;;  %v7432_v62 = vld [vmem:[#allocation2 + $0x324] ss:$28 sps:$4 sm:$0xff]  }
 0x153   :  { %v2222_v7 = vpop.f32.mrf.mxu0 }
 0x154   :  { %v2415_v9 = vpop.f32.mrf.mxu1  ;;  %v8109_v10 = vadd.f32 %v2413_v2, %v2221_v6  ;;  %v2223_v11 = vadd.f32 %v2222_v7, %v8072_v21 }
 0x155   :  { %v2224_v13 = vpop.f32.mrf.mxu0 }
 0x156   :  { %v2417_v15 = vpop.f32.mrf.mxu1  ;;  %v8112_v16 = vadd.f32 %v2415_v9, %v2223_v11  ;;  %v2225_v18 = vadd.f32 %v2224_v13, %v8076_v22 }
 0x157   :  { %v2228_v19 = vpop.f32.mrf.mxu0  ;;  %2693 = vmatmul.mubr.bf16.gmra.mxu0 %v7402_v3 }
 0x158   :  { %v2421_v20 = vpop.f32.mrf.mxu1  ;;  %2886 = vmatmul.mubr.bf16.gmra.mxu1 %v7403_v4  ;;  %v8115_v23 = vadd.f32 %v2417_v15, %v2225_v18  ;;  %v2229_v24 = vadd.f32 %v2228_v19, %v8072_v21  ;;  %2702 = vmatprep.mubr.bf16.mxu0 %v7412_v12 }
 0x159   :  { %2895 = vmatprep.mubr.bf16.mxu1 %v9649_v51  ;;  %v2230_v25 = vpop.f32.mrf.mxu0 }
 0x15a   :  { %v2423_v26 = vpop.f32.mrf.mxu1  ;;  %v8119_v29 = vadd.f32 %v2421_v20, %v2229_v24  ;;  %v2231_v31 = vadd.f32 %v2230_v25, %v8076_v22  ;;  %v7430_v20 = vld [vmem:[#allocation2 + $0x320] ss:$28 sps:$4 sm:$0xff]   ;;  %v7433_v24 = vld [vmem:[#allocation2 + $0x328] ss:$28 sps:$4 sm:$0xff]  }
 0x15b   :  { %v2232_v32 = vpop.f32.mrf.mxu0 }
 0x15c   :  { %v2425_v33 = vpop.f32.mrf.mxu1  ;;  %v8122_v35 = vadd.f32 %v2423_v26, %v2231_v31  ;;  %v2233_v36 = vadd.f32 %v2232_v32, %v8072_v21 }
 0x15d   :  { %v2234_v38 = vpop.f32.mrf.mxu0 }
 0x15e   :  { %v2427_v40 = vpop.f32.mrf.mxu1  ;;  %v8125_v41 = vadd.f32 %v2425_v33, %v2233_v36  ;;  %v2235_v42 = vadd.f32 %v2234_v38, %v8076_v22 }
 0x15f   :  { %v2238_v44 = vpop.f32.mrf.mxu0  ;;  %2703 = vmatmul.mubr.bf16.gmra.mxu0 %v7410_v27  ;;  %v7442_v27 = vld [vmem:[#allocation2 + $0x35c] ss:$28 sps:$4 sm:$0xff]  }
 0x160   :  { %v2431_v45 = vpop.f32.mrf.mxu1  ;;  %2896 = vmatmul.mubr.bf16.gmra.mxu1 %v7413_v28  ;;  %v8128_v46 = vadd.f32 %v2427_v40, %v2235_v42  ;;  %v2239_v47 = vadd.f32 %v2238_v44, %v8072_v21  ;;  %2712 = vmatprep.mubr.bf16.mxu0 %v7422_v37 }
 0x161   :  { %2905 = vmatprep.mubr.bf16.mxu1 %v9649_v51  ;;  %v2240_v48 = vpop.f32.mrf.mxu0 }
 0x162   :  { %v2433_v50 = vpop.f32.mrf.mxu1  ;;  %v8132_v52 = vadd.f32 %v2431_v45, %v2239_v47  ;;  %v2241_v53 = vadd.f32 %v2240_v48, %v8076_v22 }
 0x163   :  { %v2242_v55 = vpop.f32.mrf.mxu0 }
 0x164   :  { %v2435_v56 = vpop.f32.mrf.mxu1  ;;  %v8135_v60 = vadd.f32 %v2433_v50, %v2241_v53  ;;  %v2243_v61 = vadd.f32 %v2242_v55, %v8072_v21  ;;  %v7440_v53 = vld [vmem:[#allocation2 + $0x358] ss:$28 sps:$4 sm:$0xff]   ;;  %v7443_v55 = vld [vmem:[#allocation2 + $0x360] ss:$28 sps:$4 sm:$0xff]  }
 0x165   :  { %v2244_v0 = vpop.f32.mrf.mxu0 }
 0x166   :  { %v2437_v1 = vpop.f32.mrf.mxu1  ;;  %v8138_v2 = vadd.f32 %v2435_v56, %v2243_v61  ;;  %v2245_v3 = vadd.f32 %v2244_v0, %v8076_v22 }
 0x167   :  { %v2248_v4 = vpop.f32.mrf.mxu0  ;;  %2713 = vmatmul.mubr.bf16.gmra.mxu0 %v7420_v57 }
 0x168   :  { %v2441_v6 = vpop.f32.mrf.mxu1  ;;  %2906 = vmatmul.mubr.bf16.gmra.mxu1 %v7423_v58  ;;  %v8141_v7 = vadd.f32 %v2437_v1, %v2245_v3  ;;  %v2249_v9 = vadd.f32 %v2248_v4, %v8072_v21  ;;  %2722 = vmatprep.mubr.bf16.mxu0 %v7432_v62 }
 0x169   :  { %2915 = vmatprep.mubr.bf16.mxu1 %v9649_v51  ;;  %v2250_v11 = vpop.f32.mrf.mxu0 }
 0x16a   :  { %v2443_v12 = vpop.f32.mrf.mxu1  ;;  %v8145_v13 = vadd.f32 %v2441_v6, %v2249_v9  ;;  %v2251_v15 = vadd.f32 %v2250_v11, %v8076_v22  ;;  %v7746_v9 = vld [vmem:[#allocation2 + $0x4] ss:$28 sps:$4 sm:$0xff]   ;;  %v7747_v11 = vld [vmem:[#allocation2 + $0xc] ss:$28 sps:$4 sm:$0xff]  }
 0x16b   :  { %v2252_v18 = vpop.f32.mrf.mxu0 }
 0x16c   :  { %v2445_v19 = vpop.f32.mrf.mxu1  ;;  %v8148_v25 = vadd.f32 %v2443_v12, %v2251_v15  ;;  %v2253_v26 = vadd.f32 %v2252_v18, %v8072_v21 }
 0x16d   :  { %v2254_v28 = vpop.f32.mrf.mxu0 }
 0x16e   :  { %v2447_v31 = vpop.f32.mrf.mxu1  ;;  %v8151_v32 = vadd.f32 %v2445_v19, %v2253_v26  ;;  %v2255_v33 = vadd.f32 %v2254_v28, %v8076_v22  ;;  %v7450_v28 = vld [vmem:[#allocation5 + $0x4e8] ss:$16 sps:$4 sm:$0xff]  }
 0x16f   :  { %v2258_v36 = vpop.f32.mrf.mxu0  ;;  %2723 = vmatmul.mubr.bf16.gmra.mxu0 %v7430_v20 }
 0x170   :  { %v2451_v37 = vpop.f32.mrf.mxu1  ;;  %2916 = vmatmul.mubr.bf16.gmra.mxu1 %v7433_v24  ;;  %v8154_v38 = vadd.f32 %v2447_v31, %v2255_v33  ;;  %v2259_v40 = vadd.f32 %v2258_v36, %v8072_v21  ;;  %2732 = vmatprep.mubr.bf16.mxu0 %v7442_v27  ;;  %v7453_v31 = vld [vmem:[#allocation5 + $0x6e8] ss:$16 sps:$4 sm:$0xff]  }
 0x171   :  { %2925 = vmatprep.mubr.bf16.mxu1 %v9649_v51  ;;  %v2260_v42 = vpop.f32.mrf.mxu0 }
 0x172   :  { %v2453_v44 = vpop.f32.mrf.mxu1  ;;  %v8158_v45 = vadd.f32 %v2451_v37, %v2259_v40  ;;  %v2261_v47 = vadd.f32 %v2260_v42, %v8076_v22  ;;  %v7458_v42 = vld [vmem:[#allocation5 + $0x4cc] ss:$16 sps:$4 sm:$0xff]  }
 0x173   :  { %v2262_v48 = vpop.f32.mrf.mxu0 }
 0x174   :  { %v2455_v50 = vpop.f32.mrf.mxu1  ;;  %v8161_v56 = vadd.f32 %v2453_v44, %v2261_v47  ;;  %v2263_v57 = vadd.f32 %v2262_v48, %v8072_v21  ;;  %v7464_v44 = vld [vmem:[#allocation5 + $0x6cc] ss:$16 sps:$4 sm:$0xff]  }
 0x175   :  { %v2264_v58 = vpop.f32.mrf.mxu0 }
 0x176   :  { %v2457_v61 = vpop.f32.mrf.mxu1  ;;  %v8164_v62 = vadd.f32 %v2455_v50, %v2263_v57  ;;  %v2265_v0 = vadd.f32 %v2264_v58, %v8076_v22  ;;  %v7748_v50 = vld [vmem:[#allocation2] ss:$28 sps:$4 sm:$0xff]   ;;  %v7456_v58 = vld [vmem:[#allocation5 + $0x4c8] ss:$16 sps:$4 sm:$0xff]  }
 0x177   :  { %v2268_v1 = vpop.f32.mrf.mxu0  ;;  %2733 = vmatmul.mubr.bf16.gmra.mxu0 %v7440_v53  ;;  %v7749_v53 = vld [vmem:[#allocation2 + $0x8] ss:$28 sps:$4 sm:$0xff]  }
 0x178   :  { %v2461_v3 = vpop.f32.mrf.mxu1  ;;  %2926 = vmatmul.mubr.bf16.gmra.mxu1 %v7443_v55  ;;  %v8167_v4 = vadd.f32 %v2457_v61, %v2265_v0  ;;  %v2269_v6 = vadd.f32 %v2268_v1, %v8072_v21  ;;  %2968 = vmatprep.mubr.bf16.mxu0 %v7746_v9  ;;  %v7462_v61 = vld [vmem:[#allocation5 + $0x6c8] ss:$16 sps:$4 sm:$0xff]   ;;  %v7461_v9 = vld [vmem:[#allocation5 + $0x4ac] ss:$16 sps:$4 sm:$0xff]  }
 0x179   :  { %3161 = vmatprep.mubr.bf16.mxu1 %v7747_v11  ;;  %v2270_v12 = vpop.f32.mrf.mxu0  ;;  %v7473_v11 = vld [vmem:[#allocation5 + $0x6ac] ss:$16 sps:$4 sm:$0xff]  }
 0x17a   :  { %v2463_v15 = vpop.f32.mrf.mxu1  ;;  %v8170_v18 = vadd.f32 %v2461_v3, %v2269_v6  ;;  %v2271_v19 = vadd.f32 %v2270_v12, %v8076_v22  ;;  %v7750_v3 = vld [vmem:[#allocation2 + $0x3c] ss:$28 sps:$4 sm:$0xff]   ;;  %v7751_v6 = vld [vmem:[#allocation2 + $0x44] ss:$28 sps:$4 sm:$0xff]  }
 0x17b   :  { %v2272_v20 = vpop.f32.mrf.mxu0 }
 0x17c   :  { %v2465_v24 = vpop.f32.mrf.mxu1  ;;  %v8173_v26 = vadd.f32 %v2463_v15, %v2271_v19  ;;  %v2273_v27 = vadd.f32 %v2272_v20, %v8072_v21 }
 0x17d   :  { %v2274_v33 = vpop.f32.mrf.mxu0 }
 0x17e   :  { %v2467_v36 = vpop.f32.mrf.mxu1  ;;  %v8176_v37 = vadd.f32 %v2465_v24, %v2273_v27  ;;  %v2275_v40 = vadd.f32 %v2274_v33, %v8076_v22  ;;  %v7459_v33 = vld [vmem:[#allocation5 + $0x4a8] ss:$16 sps:$4 sm:$0xff]  }
 0x17f   :  { %v2278_v47 = vpop.f32.mrf.mxu0  ;;  %2969 = vmatmul.mubr.bf16.vlgmr.msra.gmra.mxu0 %v7748_v50 }
 0x180   :  { %v2471_v48 = vpop.f32.mrf.mxu1  ;;  %3162 = vmatmul.mubr.bf16.vlgmr.msra.gmra.mxu1 %v7749_v53  ;;  %v8179_v55 = vadd.f32 %v2467_v36, %v2275_v40  ;;  %v2279_v57 = vadd.f32 %v2278_v47, %v8072_v21  ;;  %3323 = vmatpush1.bf16.msra.mxu0 %v7450_v28  ;;  %v7471_v36 = vld [vmem:[#allocation5 + $0x6a8] ss:$16 sps:$4 sm:$0xff]  }
 0x181   :  { %3516 = vmatpush1.bf16.msra.mxu1 %v7453_v31  ;;  %v2280_v0 = vpop.f32.mrf.mxu0  ;;  %2978 = vmatprep.mubr.bf16.mxu0 %v7750_v3  ;;  %v7752_v53 = vld [vmem:[#allocation2 + $0x38] ss:$28 sps:$4 sm:$0xff]  }
 0x182   :  { %v2473_v1 = vpop.f32.mrf.mxu1  ;;  %3171 = vmatprep.mubr.bf16.mxu1 %v7751_v6  ;;  %v8182_v12 = vadd.f32 %v2471_v48, %v2279_v57  ;;  %v2281_v15 = vadd.f32 %v2280_v0, %v8076_v22  ;;  %3324 = vmatprep.subr.bf16.mxu0 %v7458_v42  ;;  %v7467_v42 = vld [vmem:[#allocation5 + $0x48c] ss:$16 sps:$4 sm:$0xff]   ;;  %v7754_v0 = vld [vmem:[#allocation2 + $0x74] ss:$28 sps:$4 sm:$0xff]  }
 0x183   :  { %3517 = vmatprep.subr.bf16.mxu1 %v7464_v44  ;;  %v2282_v19 = vpop.f32.mrf.mxu0  ;;  %v7482_v44 = vld [vmem:[#allocation5 + $0x68c] ss:$16 sps:$4 sm:$0xff]  }
 0x184   :  { %v2475_v20 = vpop.f32.mrf.mxu1  ;;  %v8185_v24 = vadd.f32 %v2473_v1, %v2281_v15  ;;  %v2283_v27 = vadd.f32 %v2282_v19, %v8072_v21  ;;  %3325 = vmatpush1.bf16.msra.mxu0 %v7456_v58  ;;  %v7753_v57 = vld [vmem:[#allocation2 + $0x40] ss:$28 sps:$4 sm:$0xff]  }
 0x185   :  { %3518 = vmatpush1.bf16.msra.mxu1 %v7462_v61  ;;  %v2284_v28 = vpop.f32.mrf.mxu0  ;;  %3326 = vmatprep.subr.bf16.mxu0 %v7461_v9  ;;  %v7755_v1 = vld [vmem:[#allocation2 + $0x7c] ss:$28 sps:$4 sm:$0xff]  }
 0x186   :  { %v2477_v31 = vpop.f32.mrf.mxu1  ;;  %3519 = vmatprep.subr.bf16.mxu1 %v7473_v11  ;;  %v8188_v40 = vadd.f32 %v2475_v20, %v2283_v27  ;;  %v2285_v47 = vadd.f32 %v2284_v28, %v8076_v22  ;;  %v7465_v9 = vld [vmem:[#allocation5 + $0x488] ss:$16 sps:$4 sm:$0xff]   ;;  %v7470_v20 = vld [vmem:[#allocation5 + $0x46c] ss:$16 sps:$4 sm:$0xff]  }
 0x187   :  { %v2288_v48 = vpop.f32.mrf.mxu0  ;;  %2979 = vmatmul.mubr.bf16.gmra.mxu0 %v7752_v53  ;;  %v7480_v11 = vld [vmem:[#allocation5 + $0x688] ss:$16 sps:$4 sm:$0xff]   ;;  %v7491_v27 = vld [vmem:[#allocation5 + $0x66c] ss:$16 sps:$4 sm:$0xff]  }
 0x188   :  { %v2481_v50 = vpop.f32.mrf.mxu1  ;;  %3172 = vmatmul.mubr.bf16.gmra.mxu1 %v7753_v57  ;;  %v8191_v58 = vadd.f32 %v2477_v31, %v2285_v47  ;;  %v2289_v61 = vadd.f32 %v2288_v48, %v8072_v21  ;;  %2988 = vmatprep.mubr.bf16.mxu0 %v7754_v0 }
 0x189   :  { %3181 = vmatprep.mubr.bf16.mxu1 %v7755_v1  ;;  %v2290_v3 = vpop.f32.mrf.mxu0  ;;  %3327 = vmatpush1.bf16.msra.mxu0 %v7459_v33  ;;  %v7468_v33 = vld [vmem:[#allocation5 + $0x468] ss:$16 sps:$4 sm:$0xff]  }
 0x18a   :  { %v2483_v6 = vpop.f32.mrf.mxu1  ;;  %3520 = vmatpush1.bf16.msra.mxu1 %v7471_v36  ;;  %v8194_v15 = vadd.f32 %v2481_v50, %v2289_v61  ;;  %v2291_v19 = vadd.f32 %v2290_v3, %v8076_v22  ;;  %3328 = vmatprep.subr.bf16.mxu0 %v7467_v42  ;;  %v7489_v36 = vld [vmem:[#allocation5 + $0x668] ss:$16 sps:$4 sm:$0xff]   ;;  %v7476_v42 = vld [vmem:[#allocation5 + $0x44c] ss:$16 sps:$4 sm:$0xff]  }
 0x18b   :  { %3521 = vmatprep.subr.bf16.mxu1 %v7482_v44  ;;  %v2292_v28 = vpop.f32.mrf.mxu0  ;;  %v7500_v44 = vld [vmem:[#allocation5 + $0x64c] ss:$16 sps:$4 sm:$0xff]  }
 0x18c   :  { %v2485_v31 = vpop.f32.mrf.mxu1  ;;  %v8197_v47 = vadd.f32 %v2483_v6, %v2291_v19  ;;  %v2293_v48 = vadd.f32 %v2292_v28, %v8072_v21  ;;  %v7756_v3 = vld [vmem:[#allocation2 + $0x70] ss:$28 sps:$4 sm:$0xff]   ;;  %v7757_v6 = vld [vmem:[#allocation2 + $0x78] ss:$28 sps:$4 sm:$0xff]  }
 0x18d   :  { %v2294_v53 = vpop.f32.mrf.mxu0  ;;  %3329 = vmatpush1.bf16.msra.mxu0 %v7465_v9  ;;  %v7759_v28 = vld [vmem:[#allocation2 + $0xb4] ss:$28 sps:$4 sm:$0xff]  }
 0x18e   :  { %v2487_v57 = vpop.f32.mrf.mxu1  ;;  %3522 = vmatpush1.bf16.msra.mxu1 %v7480_v11  ;;  %v8200_v50 = vadd.f32 %v2485_v31, %v2293_v48  ;;  %v2295_v61 = vadd.f32 %v2294_v53, %v8076_v22  ;;  %3330 = vmatprep.subr.bf16.mxu0 %v7470_v20  ;;  %v7758_v11 = vld [vmem:[#allocation2 + $0xac] ss:$28 sps:$4 sm:$0xff]  }
 0x18f   :  { %3523 = vmatprep.subr.bf16.mxu1 %v7491_v27  ;;  %v2298_v0 = vpop.f32.mrf.mxu0  ;;  %2989 = vmatmul.mubr.bf16.gmra.mxu0 %v7756_v3  ;;  %v7474_v20 = vld [vmem:[#allocation5 + $0x448] ss:$16 sps:$4 sm:$0xff]  }
 0x190   :  { %v2491_v1 = vpop.f32.mrf.mxu1  ;;  %3182 = vmatmul.mubr.bf16.gmra.mxu1 %v7757_v6  ;;  %v8203_v19 = vadd.f32 %v2487_v57, %v2295_v61  ;;  %v2299_v9 = vadd.f32 %v2298_v0, %v8072_v21  ;;  %2998 = vmatprep.mubr.bf16.mxu0 %v7758_v11  ;;  %v7498_v27 = vld [vmem:[#allocation5 + $0x648] ss:$16 sps:$4 sm:$0xff]   ;;  %v7479_v6 = vld [vmem:[#allocation5 + $0x42c] ss:$16 sps:$4 sm:$0xff]  }
 0x191   :  { %3191 = vmatprep.mubr.bf16.mxu1 %v7759_v28  ;;  %v2300_v31 = vpop.f32.mrf.mxu0  ;;  %3331 = vmatpush1.bf16.msra.mxu0 %v7468_v33  ;;  %v7509_v57 = vld [vmem:[#allocation5 + $0x62c] ss:$16 sps:$4 sm:$0xff]   ;;  %v7477_v33 = vld [vmem:[#allocation5 + $0x428] ss:$16 sps:$4 sm:$0xff]  }
 0x192   :  { %v2493_v48 = vpop.f32.mrf.mxu1  ;;  %3524 = vmatpush1.bf16.msra.mxu1 %v7489_v36  ;;  %v8206_v53 = vadd.f32 %v2491_v1, %v2299_v9  ;;  %v2301_v3 = vadd.f32 %v2300_v31, %v8076_v22  ;;  %3332 = vmatprep.subr.bf16.mxu0 %v7476_v42  ;;  %v7507_v36 = vld [vmem:[#allocation5 + $0x628] ss:$16 sps:$4 sm:$0xff]   ;;  %v7485_v42 = vld [vmem:[#allocation5 + $0x40c] ss:$16 sps:$4 sm:$0xff]  }
 0x193   :  { %3525 = vmatprep.subr.bf16.mxu1 %v7500_v44  ;;  %v2302_v61 = vpop.f32.mrf.mxu0  ;;  %v7518_v44 = vld [vmem:[#allocation5 + $0x60c] ss:$16 sps:$4 sm:$0xff]  }
 0x194   :  { %v2495_v0 = vpop.f32.mrf.mxu1  ;;  %v8209_v14 = vadd.f32 %v2493_v48, %v2301_v3  ;;  %v2303_v11 = vadd.f32 %v2302_v61, %v8072_v21  ;;  %v7760_v48 = vld [vmem:[#allocation2 + $0xa8] ss:$28 sps:$4 sm:$0xff]   ;;  %v7761_v3 = vld [vmem:[#allocation2 + $0xb0] ss:$28 sps:$4 sm:$0xff]  }
 0x195   :  { %v2304_v28 = vpop.f32.mrf.mxu0  ;;  %3333 = vmatpush1.bf16.msra.mxu0 %v7474_v20 }
 0x196   :  { %v2497_v17 = vpop.f32.mrf.mxu1  ;;  %3526 = vmatpush1.bf16.msra.mxu1 %v7498_v27  ;;  %v8212_v1 = vadd.f32 %v2495_v0, %v2303_v11  ;;  %v2305_v9 = vadd.f32 %v2304_v28, %v8076_v22  ;;  %3334 = vmatprep.subr.bf16.mxu0 %v7479_v6  ;;  %v7762_v27 = vld [vmem:[#allocation2 + $0xe4] ss:$28 sps:$4 sm:$0xff]   ;;  %v7763_v0 = vld [vmem:[#allocation2 + $0xec] ss:$28 sps:$4 sm:$0xff]  }
 0x197   :  { %3527 = vmatprep.subr.bf16.mxu1 %v7509_v57  ;;  %v2308_v31 = vpop.f32.mrf.mxu0  ;;  %2999 = vmatmul.mubr.bf16.gmra.mxu0 %v7760_v48  ;;  %v7483_v6 = vld [vmem:[#allocation5 + $0x408] ss:$16 sps:$4 sm:$0xff]  }
 0x198   :  { %v2501_v51 = vpop.f32.mrf.mxu1  ;;  %3192 = vmatmul.mubr.bf16.gmra.mxu1 %v7761_v3  ;;  %v8215_v61 = vadd.f32 %v2497_v17, %v2305_v9  ;;  %v2309_v20 = vadd.f32 %v2308_v31, %v8072_v21  ;;  %3008 = vmatprep.mubr.bf16.mxu0 %v7762_v27  ;;  %v7516_v57 = vld [vmem:[#allocation5 + $0x608] ss:$16 sps:$4 sm:$0xff]   ;;  %v7488_v3 = vld [vmem:[#allocation5 + $0x5ec] ss:$16 sps:$4 sm:$0xff]  }
 0x199   :  { %3201 = vmatprep.mubr.bf16.mxu1 %v7763_v0  ;;  %v2310_v11 = vpop.f32.mrf.mxu0  ;;  %3335 = vmatpush1.bf16.msra.mxu0 %v7477_v33  ;;  %v7486_v33 = vld [vmem:[#allocation5 + $0x5e8] ss:$16 sps:$4 sm:$0xff]  }
 0x19a   :  { %9688 = vst [vmem:[#allocation17_spill] sm:$0xff] %v8215_v61  ;;  %v2503_v28 = vpop.f32.mrf.mxu1  ;;  %3528 = vmatpush1.bf16.msra.mxu1 %v7507_v36  ;;  %v8218_v8 = vadd.f32 %v2501_v51, %v2309_v20  ;;  %v2311_v48 = vadd.f32 %v2310_v11, %v8076_v22  ;;  %3336 = vmatprep.subr.bf16.mxu0 %v7485_v42  ;;  %v7494_v20 = vld [vmem:[#allocation5 + $0x5cc] ss:$16 sps:$4 sm:$0xff]  }
 0x19b   :  { %3529 = vmatprep.subr.bf16.mxu1 %v7518_v44  ;;  %v2312_v17 = vpop.f32.mrf.mxu0  ;;  %v7764_v44 = vld [vmem:[#allocation2 + $0xe0] ss:$28 sps:$4 sm:$0xff]  }
 0x19c   :  { %9689 = vst [vmem:[#allocation18_spill] sm:$0xff] %v8218_v8  ;;  %v2505_v9 = vpop.f32.mrf.mxu1  ;;  %v8221_v31 = vadd.f32 %v2503_v28, %v2311_v48  ;;  %v2313_v27 = vadd.f32 %v2312_v17, %v8072_v21  ;;  %v7765_v8 = vld [vmem:[#allocation2 + $0xe8] ss:$28 sps:$4 sm:$0xff]   ;;  %v7766_v17 = vld [vmem:[#allocation2 + $0x11c] ss:$28 sps:$4 sm:$0xff]  }
 0x19d   :  { %v2314_v0 = vpop.f32.mrf.mxu0  ;;  %3337 = vmatpush1.bf16.msra.mxu0 %v7483_v6  ;;  %v7767_v6 = vld [vmem:[#allocation2 + $0x124] ss:$28 sps:$4 sm:$0xff]  }
 0x19e   :  { %v2507_v61 = vpop.f32.mrf.mxu1  ;;  %3530 = vmatpush1.bf16.msra.mxu1 %v7516_v57  ;;  %v8224_v36 = vadd.f32 %v2505_v9, %v2313_v27  ;;  %v2315_v51 = vadd.f32 %v2314_v0, %v8076_v22  ;;  %3338 = vmatprep.subr.bf16.mxu0 %v7488_v3  ;;  %v7492_v27 = vld [vmem:[#allocation5 + $0x5c8] ss:$16 sps:$4 sm:$0xff]  }
 0x19f   :  { %v2318_v42 = vpop.f32.mrf.mxu0  ;;  %3009 = vmatmul.mubr.bf16.gmra.mxu0 %v7764_v44  ;;  %v7497_v44 = vld [vmem:[#allocation5 + $0x5ac] ss:$16 sps:$4 sm:$0xff]  }
 0x1a0   :  { %9690 = vst [vmem:[#allocation19_spill] sm:$0xff] %v8224_v36  ;;  %v2511_v11 = vpop.f32.mrf.mxu1  ;;  %3202 = vmatmul.mubr.bf16.gmra.mxu1 %v7765_v8  ;;  %v8227_v28 = vadd.f32 %v2507_v61, %v2315_v51  ;;  %v2319_v48 = vadd.f32 %v2318_v42, %v8072_v21  ;;  %3018 = vmatprep.mubr.bf16.mxu0 %v7766_v17 }
 0x1a1   :  { %3211 = vmatprep.mubr.bf16.mxu1 %v7767_v6  ;;  %v2320_v57 = vpop.f32.mrf.mxu0  ;;  %3339 = vmatpush2.bf16.msra.mxu0 %v7486_v33  ;;  %v7495_v6 = vld [vmem:[#allocation5 + $0x5a8] ss:$16 sps:$4 sm:$0xff]  }
 0x1a2   :  { %9691 = vst [vmem:[#allocation20_spill] sm:$0xff] %v8227_v28  ;;  %v2513_v9 = vpop.f32.mrf.mxu1  ;;  %v8230_v3 = vadd.f32 %v2511_v11, %v2319_v48  ;;  %v2321_v0 = vadd.f32 %v2320_v57, %v8076_v22  ;;  %3340 = vmatprep.subr.bf16.mxu0 %v7494_v20  ;;  %v7503_v11 = vld [vmem:[#allocation5 + $0x58c] ss:$16 sps:$4 sm:$0xff]   ;;  %v7768_v20 = vld [vmem:[#allocation2 + $0x118] ss:$28 sps:$4 sm:$0xff]  }
 0x1a3   :  { %v2322_v36 = vpop.f32.mrf.mxu0 }
 0x1a4   :  { %9692 = vst [vmem:[#allocation21_spill] sm:$0xff] %v8230_v3  ;;  %v2515_v8 = vpop.f32.mrf.mxu1  ;;  %v8233_v61 = vadd.f32 %v2513_v9, %v2321_v0  ;;  %v2323_v51 = vadd.f32 %v2322_v36, %v8072_v21  ;;  %v7769_v3 = vld [vmem:[#allocation2 + $0x120] ss:$28 sps:$4 sm:$0xff]   ;;  %v7770_v0 = vld [vmem:[#allocation2 + $0x154] ss:$28 sps:$4 sm:$0xff]  }
 0x1a5   :  { %v2324_v42 = vpop.f32.mrf.mxu0  ;;  %3341 = vmatpush2.bf16.msra.mxu0 %v7492_v27  ;;  %v7771_v27 = vld [vmem:[#allocation2 + $0x15c] ss:$28 sps:$4 sm:$0xff]  }
 0x1a6   :  { %9693 = vst [vmem:[#allocation22_spill] sm:$0xff] %v8233_v61  ;;  %v2517_v17 = vpop.f32.mrf.mxu1  ;;  %v8236_v28 = vadd.f32 %v2515_v8, %v2323_v51  ;;  %v2325_v33 = vadd.f32 %v2324_v42, %v8076_v22  ;;  %3342 = vmatprep.subr.bf16.mxu0 %v7497_v44  ;;  %v7501_v42 = vld [vmem:[#allocation5 + $0x588] ss:$16 sps:$4 sm:$0xff]  }
 0x1a7   :  { %v2328_v48 = vpop.f32.mrf.mxu0  ;;  %3019 = vmatmul.mubr.bf16.gmra.mxu0 %v7768_v20  ;;  %v7506_v20 = vld [vmem:[#allocation5 + $0x56c] ss:$16 sps:$4 sm:$0xff]  }
 0x1a8   :  { %9694 = vst [vmem:[#allocation23_spill] sm:$0xff] %v8236_v28  ;;  %v2521_v57 = vpop.f32.mrf.mxu1  ;;  %3212 = vmatmul.mubr.bf16.gmra.mxu1 %v7769_v3  ;;  %v8239_v9 = vadd.f32 %v2517_v17, %v2325_v33  ;;  %v2329_v36 = vadd.f32 %v2328_v48, %v8072_v21  ;;  %3028 = vmatprep.mubr.bf16.mxu0 %v7770_v0 }
 0x1a9   :  { %3221 = vmatprep.mubr.bf16.mxu1 %v7771_v27  ;;  %v2330_v8 = vpop.f32.mrf.mxu0  ;;  %3343 = vmatpush2.bf16.msra.mxu0 %v7495_v6  ;;  %v7504_v27 = vld [vmem:[#allocation5 + $0x568] ss:$16 sps:$4 sm:$0xff]  }
 0x1aa   :  { %9695 = vst [vmem:[#allocation24_spill] sm:$0xff] %v8239_v9  ;;  %v2523_v51 = vpop.f32.mrf.mxu1  ;;  %v8242_v44 = vadd.f32 %v2521_v57, %v2329_v36  ;;  %v2331_v28 = vadd.f32 %v2330_v8, %v8076_v22  ;;  %3344 = vmatprep.subr.bf16.mxu0 %v7503_v11  ;;  %v7512_v57 = vld [vmem:[#allocation5 + $0x54c] ss:$16 sps:$4 sm:$0xff]  }
 0x1ab   :  { %v2332_v61 = vpop.f32.mrf.mxu0  ;;  %v7772_v11 = vld [vmem:[#allocation2 + $0x150] ss:$28 sps:$4 sm:$0xff]  }
 0x1ac   :  { %9696 = vst [vmem:[#allocation25_spill] sm:$0xff] %v8242_v44  ;;  %v2525_v3 = vpop.f32.mrf.mxu1  ;;  %v8245_v17 = vadd.f32 %v2523_v51, %v2331_v28  ;;  %v2333_v33 = vadd.f32 %v2332_v61, %v8072_v21  ;;  %v7773_v44 = vld [vmem:[#allocation2 + $0x158] ss:$28 sps:$4 sm:$0xff]   ;;  %v7774_v51 = vld [vmem:[#allocation2 + $0x18c] ss:$28 sps:$4 sm:$0xff]  }
 0x1ad   :  { %v2334_v48 = vpop.f32.mrf.mxu0  ;;  %3345 = vmatpush2.bf16.msra.mxu0 %v7501_v42  ;;  %v7775_v42 = vld [vmem:[#allocation2 + $0x194] ss:$28 sps:$4 sm:$0xff]  }
 0x1ae   :  { %9697 = vst [vmem:[#allocation26_spill] sm:$0xff] %v8245_v17  ;;  %v2527_v0 = vpop.f32.mrf.mxu1  ;;  %v8248_v9 = vadd.f32 %v2525_v3, %v2333_v33  ;;  %v2335_v6 = vadd.f32 %v2334_v48, %v8076_v22  ;;  %3346 = vmatprep.subr.bf16.mxu0 %v7506_v20  ;;  %v7510_v48 = vld [vmem:[#allocation5 + $0x548] ss:$16 sps:$4 sm:$0xff]  }
 0x1af   :  { %v2338_v36 = vpop.f32.mrf.mxu0  ;;  %3029 = vmatmul.mubr.bf16.gmra.mxu0 %v7772_v11  ;;  %v7515_v11 = vld [vmem:[#allocation5 + $0x52c] ss:$16 sps:$4 sm:$0xff]  }
 0x1b0   :  { %9698 = vst [vmem:[#allocation27_spill] sm:$0xff] %v8248_v9  ;;  %v2531_v8 = vpop.f32.mrf.mxu1  ;;  %3222 = vmatmul.mubr.bf16.gmra.mxu1 %v7773_v44  ;;  %v8251_v28 = vadd.f32 %v2527_v0, %v2335_v6  ;;  %v2339_v61 = vadd.f32 %v2338_v36, %v8072_v21  ;;  %3038 = vmatprep.mubr.bf16.mxu0 %v7774_v51 }
 0x1b1   :  { %3231 = vmatprep.mubr.bf16.mxu1 %v7775_v42  ;;  %v2340_v3 = vpop.f32.mrf.mxu0  ;;  %3347 = vmatpush2.bf16.msra.mxu0 %v7504_v27  ;;  %v7513_v42 = vld [vmem:[#allocation5 + $0x528] ss:$16 sps:$4 sm:$0xff]  }
 0x1b2   :  { %9699 = vst [vmem:[#allocation28_spill] sm:$0xff] %v8251_v28  ;;  %v2533_v33 = vpop.f32.mrf.mxu1  ;;  %v8254_v20 = vadd.f32 %v2531_v8, %v2339_v61  ;;  %v2341_v9 = vadd.f32 %v2340_v3, %v8076_v22  ;;  %3348 = vmatprep.subr.bf16.mxu0 %v7512_v57  ;;  %v7521_v8 = vld [vmem:[#allocation5 + $0x50c] ss:$16 sps:$4 sm:$0xff]   ;;  %v7776_v57 = vld [vmem:[#allocation2 + $0x188] ss:$28 sps:$4 sm:$0xff]  }
 0x1b3   :  { %v2342_v17 = vpop.f32.mrf.mxu0 }
 0x1b4   :  { %9700 = vst [vmem:[#allocation29_spill] sm:$0xff] %v8254_v20  ;;  %v2535_v44 = vpop.f32.mrf.mxu1  ;;  %v8257_v0 = vadd.f32 %v2533_v33, %v2341_v9  ;;  %v2343_v6 = vadd.f32 %v2342_v17, %v8072_v21  ;;  %v7777_v20 = vld [vmem:[#allocation2 + $0x190] ss:$28 sps:$4 sm:$0xff]   ;;  %v7778_v33 = vld [vmem:[#allocation2 + $0x1c4] ss:$28 sps:$4 sm:$0xff]  }
 0x1b5   :  { %v2344_v36 = vpop.f32.mrf.mxu0  ;;  %3349 = vmatpush2.bf16.msra.mxu0 %v7510_v48  ;;  %v7779_v48 = vld [vmem:[#allocation2 + $0x1cc] ss:$28 sps:$4 sm:$0xff]  }
 0x1b6   :  { %9701 = vst [vmem:[#allocation30_spill] sm:$0xff] %v8257_v0  ;;  %v2537_v51 = vpop.f32.mrf.mxu1  ;;  %v8260_v28 = vadd.f32 %v2535_v44, %v2343_v6  ;;  %v2345_v27 = vadd.f32 %v2344_v36, %v8076_v22  ;;  %3350 = vmatprep.subr.bf16.mxu0 %v7515_v11  ;;  %v7519_v36 = vld [vmem:[#allocation5 + $0x508] ss:$16 sps:$4 sm:$0xff]  }
 0x1b7   :  { %v2348_v61 = vpop.f32.mrf.mxu0  ;;  %3039 = vmatmul.mubr.bf16.gmra.mxu0 %v7776_v57 }
 0x1b8   :  { %9702 = vst [vmem:[#allocation31_spill] sm:$0xff] %v8260_v28  ;;  %v2541_v3 = vpop.f32.mrf.mxu1  ;;  %3232 = vmatmul.mubr.bf16.gmra.mxu1 %v7777_v20  ;;  %v8263_v9 = vadd.f32 %v2537_v51, %v2345_v27  ;;  %v2349_v17 = vadd.f32 %v2348_v61, %v8072_v21  ;;  %3048 = vmatprep.mubr.bf16.mxu0 %v7778_v33  ;;  %v7524_v33 = vld [vmem:[#allocation8 + $0xe4] ss:$16 sps:$4 sm:$0xff]  }
 0x1b9   :  { %3241 = vmatprep.mubr.bf16.mxu1 %v7779_v48  ;;  %v2350_v44 = vpop.f32.mrf.mxu0  ;;  %3351 = vmatpush2.bf16.msra.mxu0 %v7513_v42 }
 0x1ba   :  { %9703 = vst [vmem:[#allocation32_spill] sm:$0xff] %v8263_v9  ;;  %v2543_v6 = vpop.f32.mrf.mxu1  ;;  %v8266_v11 = vadd.f32 %v2541_v3, %v2349_v17  ;;  %v2351_v28 = vadd.f32 %v2350_v44, %v8076_v22  ;;  %3352 = vmatprep.subr.bf16.mxu0 %v7521_v8  ;;  %v7780_v17 = vld [vmem:[#allocation2 + $0x1c0] ss:$28 sps:$4 sm:$0xff]   ;;  %v7781_v44 = vld [vmem:[#allocation2 + $0x1c8] ss:$28 sps:$4 sm:$0xff]  }
 0x1bb   :  { %v2352_v57 = vpop.f32.mrf.mxu0 }
 0x1bc   :  { %v2545_v0 = vpop.f32.mrf.mxu1  ;;  %v8269_v20 = vadd.f32 %v2543_v6, %v2351_v28  ;;  %v2353_v51 = vadd.f32 %v2352_v57, %v8072_v21  ;;  %v7782_v6 = vld [vmem:[#allocation2 + $0x1fc] ss:$28 sps:$4 sm:$0xff]   ;;  %v7783_v21 = vld [vmem:[#allocation2 + $0x204] ss:$28 sps:$4 sm:$0xff]  }
 0x1bd   :  { %v2354_v27 = vpop.f32.mrf.mxu0  ;;  %3353 = vmatpush2.bf16.msra.mxu0 %v7519_v36 }
 0x1be   :  { %v2547_v61 = vpop.f32.mrf.mxu1  ;;  %v8272_v48 = vadd.f32 %v2545_v0, %v2353_v51  ;;  %v2355_v42 = vadd.f32 %v2354_v27, %v8076_v22  ;;  %4690 = vmatprep.subr.bf16.mxu0 %v7524_v33 }
 0x1bf   :  { %v2584_v9 = vpop.f32.mrf.mxu0  ;;  %3049 = vmatmul.mubr.bf16.gmra.mxu0 %v7780_v17 }
 0x1c0   :  { %9704 = vst [vmem:[#allocation33_spill] sm:$0xff] %v8272_v48  ;;  %v2777_v3 = vpop.f32.mrf.mxu1  ;;  %3242 = vmatmul.mubr.bf16.gmra.mxu1 %v7781_v44  ;;  %v8275_v8 = vadd.f32 %v2547_v61, %v2355_v42  ;;  %v2585_v28 = vadd.f32 %v2584_v9, %v8080_v30  ;;  %3058 = vmatprep.mubr.bf16.mxu0 %v7782_v6 }
 0x1c1   :  { %3251 = vmatprep.mubr.bf16.mxu1 %v7783_v21  ;;  %v2586_v36 = vpop.f32.mrf.mxu0  ;;  %v7785_v21 = vld [vmem:[#allocation2 + $0x200] ss:$28 sps:$4 sm:$0xff]  }
 0x1c2   :  { %9705 = vst [vmem:[#allocation34_spill] sm:$0xff] %v8275_v8  ;;  %v2779_v57 = vpop.f32.mrf.mxu1  ;;  %v2778_v0 = vadd.f32 %v2777_v3, %v2585_v28  ;;  %v2587_v22 = vadd.f32 %v2586_v36, %v8083_v34  ;;  %v7784_v8 = vld [vmem:[#allocation2 + $0x1f8] ss:$28 sps:$4 sm:$0xff]  }
 0x1c3   :  { %v2588_v51 = vpop.f32.mrf.mxu0  ;;  %v7786_v36 = vld [vmem:[#allocation2 + $0x234] ss:$28 sps:$4 sm:$0xff]  }
 0x1c4   :  { %v2781_v27 = vpop.f32.mrf.mxu1  ;;  %v2780_v48 = vadd.f32 %v2779_v57, %v2587_v22  ;;  %v2589_v17 = vadd.f32 %v2588_v51, %v8086_v39  ;;  %v3708_v33 = vmax.f32 %v2778_v0, 0.0  ;;  %v7787_v57 = vld [vmem:[#allocation2 + $0x23c] ss:$28 sps:$4 sm:$0xff]  }
 0x1c5   :  { %v2590_v44 = vpop.f32.mrf.mxu0 }
 0x1c6   :  { %v2783_v61 = vpop.f32.mrf.mxu1  ;;  %v2782_v42 = vadd.f32 %v2781_v27, %v2589_v17  ;;  %v2591_v30 = vadd.f32 %v2590_v44, %v8089_v43  ;;  %v3709_v39 = vmax.f32 %v2780_v48, 0.0 }
 0x1c7   :  { %v2594_v9 = vpop.f32.mrf.mxu0  ;;  %3059 = vmatmul.mubr.bf16.gmra.mxu0 %v7784_v8 }
 0x1c8   :  { %v2787_v6 = vpop.f32.mrf.mxu1  ;;  %3252 = vmatmul.mubr.bf16.gmra.mxu1 %v7785_v21  ;;  %v3712_v3 = vmax.f32 %v2782_v42, 0.0  ;;  %v2784_v28 = vadd.f32 %v2783_v61, %v2591_v30  ;;  %v2595_v34 = vadd.f32 %v2594_v9, %v8093_v49  ;;  %3068 = vmatprep.mubr.bf16.mxu0 %v7786_v36 }
 0x1c9   :  { %3261 = vmatprep.mubr.bf16.mxu1 %v7787_v57  ;;  %v2596_v22 = vpop.f32.mrf.mxu0 }
 0x1ca   :  { %v2789_v51 = vpop.f32.mrf.mxu1  ;;  %v8282_v27 = vpack.c.bf16 %v3712_v3, %v3708_v33  ;;  %v3713_v43 = vmax.f32 %v2784_v28, 0.0  ;;  %v2788_v17 = vadd.f32 %v2787_v6, %v2595_v34  ;;  %v2597_v8 = vadd.f32 %v2596_v22, %v8096_v54  ;;  %v7788_v33 = vld [vmem:[#allocation2 + $0x230] ss:$28 sps:$4 sm:$0xff]   ;;  %v7789_v3 = vld [vmem:[#allocation2 + $0x238] ss:$28 sps:$4 sm:$0xff]  }
 0x1cb   :  { %v2598_v44 = vpop.f32.mrf.mxu0  ;;  %v7790_v22 = vld [vmem:[#allocation2 + $0x26c] ss:$28 sps:$4 sm:$0xff]  }
 0x1cc   :  { %9706 = vst [vmem:[#allocation35_spill] sm:$0xff] %v8282_v27  ;;  %v2791_v21 = vpop.f32.mrf.mxu1  ;;  %v2790_v0 = vadd.f32 %v2789_v51, %v2597_v8  ;;  %v2599_v61 = vadd.f32 %v2598_v44, %v8099_v59  ;;  %v8286_v42 = vpack.c.bf16 %v3713_v43, %v3709_v39  ;;  %v3716_v6 = vmax.f32 %v2788_v17, 0.0  ;;  %v7791_v59 = vld [vmem:[#allocation2 + $0x274] ss:$28 sps:$4 sm:$0xff]  }
 0x1cd   :  { %v2600_v49 = vpop.f32.mrf.mxu0 }
 0x1ce   :  { %9707 = vst [vmem:[#allocation36_spill] sm:$0xff] %v8286_v42  ;;  %v2793_v30 = vpop.f32.mrf.mxu1  ;;  %v2792_v9 = vadd.f32 %v2791_v21, %v2599_v61  ;;  %v2601_v48 = vadd.f32 %v2600_v49, %v8102_v63  ;;  %v3717_v39 = vmax.f32 %v2790_v0, 0.0  ;;  %v7539_v61 = vld [vmem:[#allocation8 + $0x2e4] ss:$16 sps:$4 sm:$0xff]  }
 0x1cf   :  { %v2604_v36 = vpop.f32.mrf.mxu0  ;;  %3069 = vmatmul.mubr.bf16.gmra.mxu0 %v7788_v33  ;;  %4883 = vmatprep.subr.bf16.mxu1 %v7539_v61 }
 0x1d0   :  { %v2797_v57 = vpop.f32.mrf.mxu1  ;;  %3262 = vmatmul.mubr.bf16.gmra.mxu1 %v7789_v3  ;;  %v3720_v54 = vmax.f32 %v2792_v9, 0.0  ;;  %v2794_v28 = vadd.f32 %v2793_v30, %v2601_v48  ;;  %v2605_v34 = vadd.f32 %v2604_v36, %v8106_v5  ;;  %3078 = vmatprep.mubr.bf16.mxu0 %v7790_v22 }
 0x1d1   :  { %3271 = vmatprep.mubr.bf16.mxu1 %v7791_v59  ;;  %v2606_v51 = vpop.f32.mrf.mxu0  ;;  %v7795_v59 = vld [vmem:[#allocation2 + $0x2ac] ss:$28 sps:$4 sm:$0xff]  }
 0x1d2   :  { %v2799_v43 = vpop.f32.mrf.mxu1  ;;  %v8290_v8 = vpack.c.bf16 %v3720_v54, %v3716_v6  ;;  %v3721_v63 = vmax.f32 %v2794_v28, 0.0  ;;  %v2798_v44 = vadd.f32 %v2797_v57, %v2605_v34  ;;  %v2607_v21 = vadd.f32 %v2606_v51, %v8109_v10  ;;  %v7792_v54 = vld [vmem:[#allocation2 + $0x268] ss:$28 sps:$4 sm:$0xff]   ;;  %v7793_v57 = vld [vmem:[#allocation2 + $0x270] ss:$28 sps:$4 sm:$0xff]  }
 0x1d3   :  { %v2608_v49 = vpop.f32.mrf.mxu0 }
 0x1d4   :  { %9708 = vst [vmem:[#allocation37_spill] sm:$0xff] %v8290_v8  ;;  %v2801_v17 = vpop.f32.mrf.mxu1  ;;  %v2800_v9 = vadd.f32 %v2799_v43, %v2607_v21  ;;  %v2609_v30 = vadd.f32 %v2608_v49, %v8112_v16  ;;  %v8294_v5 = vpack.c.bf16 %v3721_v63, %v3717_v39  ;;  %v3724_v10 = vmax.f32 %v2798_v44, 0.0  ;;  %v7794_v16 = vld [vmem:[#allocation2 + $0x2a4] ss:$28 sps:$4 sm:$0xff]  }
 0x1d5   :  { %v2610_v48 = vpop.f32.mrf.mxu0 }
 0x1d6   :  { %9709 = vst [vmem:[#allocation38_spill] sm:$0xff] %v8294_v5  ;;  %v2803_v36 = vpop.f32.mrf.mxu1  ;;  %v2802_v0 = vadd.f32 %v2801_v17, %v2609_v30  ;;  %v2611_v33 = vadd.f32 %v2610_v48, %v8115_v23  ;;  %v3725_v39 = vmax.f32 %v2800_v9, 0.0 }
 0x1d7   :  { %v2614_v3 = vpop.f32.mrf.mxu0  ;;  %3079 = vmatmul.mubr.bf16.gmra.mxu0 %v7792_v54  ;;  %v7796_v54 = vld [vmem:[#allocation2 + $0x2a0] ss:$28 sps:$4 sm:$0xff]  }
 0x1d8   :  { %v2807_v6 = vpop.f32.mrf.mxu1  ;;  %3272 = vmatmul.mubr.bf16.gmra.mxu1 %v7793_v57  ;;  %v3728_v28 = vmax.f32 %v2802_v0, 0.0  ;;  %v2804_v34 = vadd.f32 %v2803_v36, %v2611_v33  ;;  %v2615_v22 = vadd.f32 %v2614_v3, %v8119_v29  ;;  %3088 = vmatprep.mubr.bf16.mxu0 %v7794_v16  ;;  %v7797_v57 = vld [vmem:[#allocation2 + $0x2a8] ss:$28 sps:$4 sm:$0xff]  }
 0x1d9   :  { %3281 = vmatprep.mubr.bf16.mxu1 %v7795_v59  ;;  %v2616_v51 = vpop.f32.mrf.mxu0 }
 0x1da   :  { %v2809_v43 = vpop.f32.mrf.mxu1  ;;  %v8298_v63 = vpack.c.bf16 %v3728_v28, %v3724_v10  ;;  %v3729_v23 = vmax.f32 %v2804_v34, 0.0  ;;  %v2808_v21 = vadd.f32 %v2807_v6, %v2615_v22  ;;  %v2617_v61 = vadd.f32 %v2616_v51, %v8122_v35  ;;  %v7798_v34 = vld [vmem:[#allocation2 + $0x2dc] ss:$28 sps:$4 sm:$0xff]  }
 0x1db   :  { %v2618_v49 = vpop.f32.mrf.mxu0 }
 0x1dc   :  { %9710 = vst [vmem:[#allocation39_spill] sm:$0xff] %v8298_v63  ;;  %v2811_v17 = vpop.f32.mrf.mxu1  ;;  %v2810_v44 = vadd.f32 %v2809_v43, %v2617_v61  ;;  %v2619_v30 = vadd.f32 %v2618_v49, %v8125_v41  ;;  %v8302_v48 = vpack.c.bf16 %v3729_v23, %v3725_v39  ;;  %v3732_v6 = vmax.f32 %v2808_v21, 0.0  ;;  %v7799_v41 = vld [vmem:[#allocation2 + $0x2e4] ss:$28 sps:$4 sm:$0xff]  }
 0x1dd   :  { %v2620_v29 = vpop.f32.mrf.mxu0 }
 0x1de   :  { %9711 = vst [vmem:[#allocation40_spill] sm:$0xff] %v8302_v48  ;;  %v2813_v36 = vpop.f32.mrf.mxu1  ;;  %v2812_v0 = vadd.f32 %v2811_v17, %v2619_v30  ;;  %v2621_v9 = vadd.f32 %v2620_v29, %v8128_v46  ;;  %v3733_v22 = vmax.f32 %v2810_v44, 0.0 }
 0x1df   :  { %v2624_v33 = vpop.f32.mrf.mxu0  ;;  %3089 = vmatmul.mubr.bf16.gmra.mxu0 %v7796_v54 }
 0x1e0   :  { %v2817_v3 = vpop.f32.mrf.mxu1  ;;  %3282 = vmatmul.mubr.bf16.gmra.mxu1 %v7797_v57  ;;  %v3736_v35 = vmax.f32 %v2812_v0, 0.0  ;;  %v2814_v10 = vadd.f32 %v2813_v36, %v2621_v9  ;;  %v2625_v28 = vadd.f32 %v2624_v33, %v8132_v52  ;;  %3098 = vmatprep.mubr.bf16.mxu0 %v7798_v34  ;;  %v7800_v9 = vld [vmem:[#allocation2 + $0x2d8] ss:$28 sps:$4 sm:$0xff]   ;;  %v7801_v33 = vld [vmem:[#allocation2 + $0x2e0] ss:$28 sps:$4 sm:$0xff]  }
 0x1e1   :  { %3291 = vmatprep.mubr.bf16.mxu1 %v7799_v41  ;;  %v2626_v16 = vpop.f32.mrf.mxu0 }
 0x1e2   :  { %v2819_v59 = vpop.f32.mrf.mxu1  ;;  %v8306_v39 = vpack.c.bf16 %v3736_v35, %v3732_v6  ;;  %v3737_v46 = vmax.f32 %v2814_v10, 0.0  ;;  %v2818_v51 = vadd.f32 %v2817_v3, %v2625_v28  ;;  %v2627_v43 = vadd.f32 %v2626_v16, %v8135_v60  ;;  %v7802_v6 = vld [vmem:[#allocation2 + $0x314] ss:$28 sps:$4 sm:$0xff]  }
 0x1e3   :  { %v2628_v23 = vpop.f32.mrf.mxu0 }
 0x1e4   :  { %9712 = vst [vmem:[#allocation41_spill] sm:$0xff] %v8306_v39  ;;  %v2821_v61 = vpop.f32.mrf.mxu1  ;;  %v2820_v21 = vadd.f32 %v2819_v59, %v2627_v43  ;;  %v2629_v49 = vadd.f32 %v2628_v23, %v8138_v2  ;;  %v8310_v17 = vpack.c.bf16 %v3737_v46, %v3733_v22  ;;  %v3740_v3 = vmax.f32 %v2818_v51, 0.0  ;;  %v7803_v2 = vld [vmem:[#allocation2 + $0x31c] ss:$28 sps:$4 sm:$0xff]  }
 0x1e5   :  { %v2630_v52 = vpop.f32.mrf.mxu0 }
 0x1e6   :  { %9713 = vst [vmem:[#allocation42_spill] sm:$0xff] %v8310_v17  ;;  %v2823_v30 = vpop.f32.mrf.mxu1  ;;  %v2822_v29 = vadd.f32 %v2821_v61, %v2629_v49  ;;  %v2631_v44 = vadd.f32 %v2630_v52, %v8141_v7  ;;  %v3741_v35 = vmax.f32 %v2820_v21, 0.0 }
 0x1e7   :  { %v2634_v36 = vpop.f32.mrf.mxu0  ;;  %3099 = vmatmul.mubr.bf16.gmra.mxu0 %v7800_v9  ;;  %v7806_v9 = vld [vmem:[#allocation2 + $0x34c] ss:$28 sps:$4 sm:$0xff]  }
 0x1e8   :  { %v2827_v0 = vpop.f32.mrf.mxu1  ;;  %3292 = vmatmul.mubr.bf16.gmra.mxu1 %v7801_v33  ;;  %v3744_v60 = vmax.f32 %v2822_v29, 0.0  ;;  %v2824_v54 = vadd.f32 %v2823_v30, %v2631_v44  ;;  %v2635_v57 = vadd.f32 %v2634_v36, %v8145_v13  ;;  %3108 = vmatprep.mubr.bf16.mxu0 %v7802_v6  ;;  %v7804_v30 = vld [vmem:[#allocation2 + $0x310] ss:$28 sps:$4 sm:$0xff]   ;;  %v7805_v29 = vld [vmem:[#allocation2 + $0x318] ss:$28 sps:$4 sm:$0xff]  }
 0x1e9   :  { %3301 = vmatprep.mubr.bf16.mxu1 %v7803_v2  ;;  %v2636_v10 = vpop.f32.mrf.mxu0 }
 0x1ea   :  { %v2829_v28 = vpop.f32.mrf.mxu1  ;;  %v8314_v34 = vpack.c.bf16 %v3744_v60, %v3740_v3  ;;  %v3745_v7 = vmax.f32 %v2824_v54, 0.0  ;;  %v2828_v41 = vadd.f32 %v2827_v0, %v2635_v57  ;;  %v2637_v22 = vadd.f32 %v2636_v10, %v8148_v25 }
 0x1eb   :  { %v2638_v16 = vpop.f32.mrf.mxu0 }
 0x1ec   :  { %9714 = vst [vmem:[#allocation43_spill] sm:$0xff] %v8314_v34  ;;  %v2831_v59 = vpop.f32.mrf.mxu1  ;;  %v2830_v46 = vadd.f32 %v2829_v28, %v2637_v22  ;;  %v2639_v51 = vadd.f32 %v2638_v16, %v8151_v32  ;;  %v8318_v43 = vpack.c.bf16 %v3745_v7, %v3741_v35  ;;  %v3748_v44 = vmax.f32 %v2828_v41, 0.0  ;;  %v7807_v32 = vld [vmem:[#allocation2 + $0x354] ss:$28 sps:$4 sm:$0xff]  }
 0x1ed   :  { %v2640_v13 = vpop.f32.mrf.mxu0 }
 0x1ee   :  { %9715 = vst [vmem:[#allocation44_spill] sm:$0xff] %v8318_v43  ;;  %v2833_v23 = vpop.f32.mrf.mxu1  ;;  %v2832_v61 = vadd.f32 %v2831_v59, %v2639_v51  ;;  %v2641_v21 = vadd.f32 %v2640_v13, %v8154_v38  ;;  %v3749_v33 = vmax.f32 %v2830_v46, 0.0  ;;  %v7808_v51 = vld [vmem:[#allocation2 + $0x348] ss:$28 sps:$4 sm:$0xff]   ;;  %v7809_v13 = vld [vmem:[#allocation2 + $0x350] ss:$28 sps:$4 sm:$0xff]  }
 0x1ef   :  { %v2644_v49 = vpop.f32.mrf.mxu0  ;;  %3109 = vmatmul.mubr.bf16.gmra.mxu0 %v7804_v30 }
 0x1f0   :  { %v2837_v52 = vpop.f32.mrf.mxu1  ;;  %3302 = vmatmul.mubr.bf16.gmra.mxu1 %v7805_v29  ;;  %v3752_v25 = vmax.f32 %v2832_v61, 0.0  ;;  %v2834_v36 = vadd.f32 %v2833_v23, %v2641_v21  ;;  %v2645_v0 = vadd.f32 %v2644_v49, %v8158_v45  ;;  %3118 = vmatprep.mubr.bf16.mxu0 %v7806_v9  ;;  %v7810_v49 = vld [vmem:[#allocation2 + $0x14] ss:$28 sps:$4 sm:$0xff]  }
 0x1f1   :  { %3311 = vmatprep.mubr.bf16.mxu1 %v7807_v32  ;;  %v2646_v3 = vpop.f32.mrf.mxu0 }
 0x1f2   :  { %v2839_v60 = vpop.f32.mrf.mxu1  ;;  %v8322_v54 = vpack.c.bf16 %v3752_v25, %v3748_v44  ;;  %v3753_v38 = vmax.f32 %v2834_v36, 0.0  ;;  %v2838_v57 = vadd.f32 %v2837_v52, %v2645_v0  ;;  %v2647_v6 = vadd.f32 %v2646_v3, %v8161_v56 }
 0x1f3   :  { %v2648_v2 = vpop.f32.mrf.mxu0 }
 0x1f4   :  { %9716 = vst [vmem:[#allocation45_spill] sm:$0xff] %v8322_v54  ;;  %v2841_v35 = vpop.f32.mrf.mxu1  ;;  %v2840_v10 = vadd.f32 %v2839_v60, %v2647_v6  ;;  %v2649_v28 = vadd.f32 %v2648_v2, %v8164_v62  ;;  %v8326_v7 = vpack.c.bf16 %v3753_v38, %v3749_v33  ;;  %v3756_v23 = vmax.f32 %v2838_v57, 0.0  ;;  %v7522_v38 = vld [vmem:[#allocation8 + $0xe0] ss:$16 sps:$4 sm:$0xff]  }
 0x1f5   :  { %v2650_v45 = vpop.f32.mrf.mxu0  ;;  %v9718_v62 = vmov 0   ;;  %v7537_v57 = vld [vmem:[#allocation8 + $0x2e0] ss:$16 sps:$4 sm:$0xff]  }
 0x1f6   :  { %9717 = vst [vmem:[#allocation46_spill] sm:$0xff] %v8326_v7  ;;  %v2843_v41 = vpop.f32.mrf.mxu1  ;;  %v2842_v22 = vadd.f32 %v2841_v35, %v2649_v28  ;;  %v2651_v16 = vadd.f32 %v2650_v45, %v8167_v4  ;;  %v3757_v52 = vmax.f32 %v2840_v10, 0.0  ;;  %v7527_v35 = vld [vmem:[#allocation8 + $0xc4] ss:$16 sps:$4 sm:$0xff]  }
 0x1f7   :  { %v2654_v59 = vpop.f32.mrf.mxu0  ;;  %3119 = vmatmul.mubr.bf16.gmra.mxu0 %v7808_v51  ;;  %v7548_v10 = vld [vmem:[#allocation8 + $0x2c4] ss:$16 sps:$4 sm:$0xff]  }
 0x1f8   :  { %v2847_v46 = vpop.f32.mrf.mxu1  ;;  %3312 = vmatmul.mubr.bf16.gmra.mxu1 %v7809_v13  ;;  %v3760_v56 = vmax.f32 %v2842_v22, 0.0  ;;  %v2844_v61 = vadd.f32 %v2843_v41, %v2651_v16  ;;  %v2655_v21 = vadd.f32 %v2654_v59, %v8170_v18  ;;  %3354 = vmatprep.mubr.bf16.mxu0 %v7810_v49  ;;  %v7811_v41 = vld [vmem:[#allocation2 + $0x10] ss:$28 sps:$4 sm:$0xff]  }
 0x1f9   :  { %3547 = vmatprep.mubr.bf16.mxu1 %v9718_v62  ;;  %v2656_v30 = vpop.f32.mrf.mxu0 }
 0x1fa   :  { %v2849_v29 = vpop.f32.mrf.mxu1  ;;  %v8331_v44 = vpack.c.bf16 %v3760_v56, %v3756_v23  ;;  %v3761_v4 = vmax.f32 %v2844_v61, 0.0  ;;  %v2848_v25 = vadd.f32 %v2847_v46, %v2655_v21  ;;  %v2657_v36 = vadd.f32 %v2656_v30, %v8173_v26  ;;  %v7812_v26 = vld [vmem:[#allocation2 + $0x18] ss:$28 sps:$4 sm:$0xff]   ;;  %v7813_v46 = vld [vmem:[#allocation2 + $0x4c] ss:$28 sps:$4 sm:$0xff]  }
 0x1fb   :  { %v2658_v0 = vpop.f32.mrf.mxu0  ;;  %v7525_v23 = vld [vmem:[#allocation8 + $0xc0] ss:$16 sps:$4 sm:$0xff]   ;;  %v7530_v30 = vld [vmem:[#allocation8 + $0xa4] ss:$16 sps:$4 sm:$0xff]  }
 0x1fc   :  { %9719 = vst [vmem:[#allocation47_spill] sm:$0xff] %v8331_v44  ;;  %v2851_v9 = vpop.f32.mrf.mxu1  ;;  %v2850_v32 = vadd.f32 %v2849_v29, %v2657_v36  ;;  %v2659_v33 = vadd.f32 %v2658_v0, %v8176_v37  ;;  %v8335_v3 = vpack.c.bf16 %v3761_v4, %v3757_v52  ;;  %v3764_v22 = vmax.f32 %v2848_v25, 0.0  ;;  %v7546_v56 = vld [vmem:[#allocation8 + $0x2c0] ss:$16 sps:$4 sm:$0xff]  }
 0x1fd   :  { %v2660_v18 = vpop.f32.mrf.mxu0 }
 0x1fe   :  { %9720 = vst [vmem:[#allocation48_spill] sm:$0xff] %v8335_v3  ;;  %v2853_v60 = vpop.f32.mrf.mxu1  ;;  %v2852_v6 = vadd.f32 %v2851_v9, %v2659_v33  ;;  %v2661_v2 = vadd.f32 %v2660_v18, %v8179_v55  ;;  %v3765_v51 = vmax.f32 %v2850_v32, 0.0  ;;  %v7528_v33 = vld [vmem:[#allocation8 + $0xa0] ss:$16 sps:$4 sm:$0xff]  }
 0x1ff   :  { %v2664_v28 = vpop.f32.mrf.mxu0  ;;  %3355 = vmatmul.mubr.bf16.vlgmr.msra.gmra.mxu0 %v7811_v41  ;;  %v7555_v18 = vld [vmem:[#allocation8 + $0x2a0] ss:$16 sps:$4 sm:$0xff]  }
 0x200   :  { %v2857_v45 = vpop.f32.mrf.mxu1  ;;  %3548 = vmatmul.mubr.bf16.vlgmr.msra.gmra.mxu1 %v7812_v26  ;;  %v3768_v16 = vmax.f32 %v2852_v6, 0.0  ;;  %v2854_v37 = vadd.f32 %v2853_v60, %v2661_v2  ;;  %v2665_v59 = vadd.f32 %v2664_v28, %v8182_v12  ;;  %3364 = vmatprep.mubr.bf16.mxu0 %v7813_v46  ;;  %v7557_v12 = vld [vmem:[#allocation8 + $0x2a4] ss:$16 sps:$4 sm:$0xff]   ;;  %v7816_v26 = vld [vmem:[#allocation2 + $0x84] ss:$28 sps:$4 sm:$0xff]  }
 0x201   :  { %3557 = vmatprep.mubr.bf16.mxu1 %v9718_v62  ;;  %v2666_v13 = vpop.f32.mrf.mxu0  ;;  %4691 = vmatpush1.bf16.msra.mxu0 %v7522_v38  ;;  %v7533_v38 = vld [vmem:[#allocation8 + $0x84] ss:$16 sps:$4 sm:$0xff]  }
 0x202   :  { %v2859_v55 = vpop.f32.mrf.mxu1  ;;  %4884 = vmatpush1.bf16.msra.mxu1 %v7537_v57  ;;  %v8340_v61 = vpack.c.bf16 %v3768_v16, %v3764_v22  ;;  %v3769_v21 = vmax.f32 %v2854_v37, 0.0  ;;  %v2858_v49 = vadd.f32 %v2857_v45, %v2665_v59  ;;  %v2667_v52 = vadd.f32 %v2666_v13, %v8185_v24  ;;  %4692 = vmatprep.subr.bf16.mxu0 %v7527_v35  ;;  %v7566_v57 = vld [vmem:[#allocation8 + $0x284] ss:$16 sps:$4 sm:$0xff]   ;;  %v7531_v37 = vld [vmem:[#allocation8 + $0x80] ss:$16 sps:$4 sm:$0xff]  }
 0x203   :  { %4885 = vmatprep.subr.bf16.mxu1 %v7548_v10  ;;  %v2668_v29 = vpop.f32.mrf.mxu0  ;;  %v7814_v35 = vld [vmem:[#allocation2 + $0x48] ss:$28 sps:$4 sm:$0xff]  }
 0x204   :  { %9721 = vst [vmem:[#allocation49_spill] sm:$0xff] %v8340_v61  ;;  %v2861_v4 = vpop.f32.mrf.mxu1  ;;  %v2860_v25 = vadd.f32 %v2859_v55, %v2667_v52  ;;  %v2669_v36 = vadd.f32 %v2668_v29, %v8188_v40  ;;  %v8344_v0 = vpack.c.bf16 %v3769_v21, %v3765_v51  ;;  %v7815_v40 = vld [vmem:[#allocation2 + $0x50] ss:$28 sps:$4 sm:$0xff]   ;;  %v3772_v10 = vmax.f32 %v2858_v49, 0.0  ;;  %v7564_v59 = vld [vmem:[#allocation8 + $0x280] ss:$16 sps:$4 sm:$0xff]  }
 0x205   :  { %v2670_v9 = vpop.f32.mrf.mxu0  ;;  %4693 = vmatpush1.bf16.msra.mxu0 %v7525_v23  ;;  %v7536_v23 = vld [vmem:[#allocation8 + $0x64] ss:$16 sps:$4 sm:$0xff]  }
 0x206   :  { %9722 = vst [vmem:[#allocation50_spill] sm:$0xff] %v8344_v0  ;;  %v2863_v32 = vpop.f32.mrf.mxu1  ;;  %4886 = vmatpush1.bf16.msra.mxu1 %v7546_v56  ;;  %v2862_v60 = vadd.f32 %v2861_v4, %v2669_v36  ;;  %v2671_v24 = vadd.f32 %v2670_v9, %v8191_v58  ;;  %4694 = vmatprep.subr.bf16.mxu0 %v7530_v30  ;;  %v3773_v58 = vmax.f32 %v2860_v25, 0.0  ;;  %v7534_v4 = vld [vmem:[#allocation8 + $0x60] ss:$16 sps:$4 sm:$0xff]   ;;  %v7542_v9 = vld [vmem:[#allocation8 + $0x44] ss:$16 sps:$4 sm:$0xff]  }
 0x207   :  { %4887 = vmatprep.subr.bf16.mxu1 %v7557_v12  ;;  %v2674_v6 = vpop.f32.mrf.mxu0  ;;  %3365 = vmatmul.mubr.bf16.gmra.mxu0 %v7814_v35  ;;  %v7573_v25 = vld [vmem:[#allocation8 + $0x260] ss:$16 sps:$4 sm:$0xff]  }
 0x208   :  { %v2867_v2 = vpop.f32.mrf.mxu1  ;;  %3558 = vmatmul.mubr.bf16.gmra.mxu1 %v7815_v40  ;;  %v3776_v28 = vmax.f32 %v2862_v60, 0.0  ;;  %v2864_v45 = vadd.f32 %v2863_v32, %v2671_v24  ;;  %v2675_v41 = vadd.f32 %v2674_v6, %v8194_v15  ;;  %3374 = vmatprep.mubr.bf16.mxu0 %v7816_v26  ;;  %v7575_v15 = vld [vmem:[#allocation8 + $0x264] ss:$16 sps:$4 sm:$0xff]   ;;  %v7817_v60 = vld [vmem:[#allocation2 + $0x80] ss:$28 sps:$4 sm:$0xff]  }
 0x209   :  { %3567 = vmatprep.mubr.bf16.mxu1 %v9718_v62  ;;  %v2676_v22 = vpop.f32.mrf.mxu0  ;;  %4695 = vmatpush1.bf16.msra.mxu0 %v7528_v33  ;;  %v7584_v32 = vld [vmem:[#allocation8 + $0x244] ss:$16 sps:$4 sm:$0xff]  }
 0x20a   :  { %v2869_v16 = vpop.f32.mrf.mxu1  ;;  %4888 = vmatpush1.bf16.msra.mxu1 %v7555_v18  ;;  %v8349_v46 = vpack.c.bf16 %v3776_v28, %v3772_v10  ;;  %v3777_v51 = vmax.f32 %v2864_v45, 0.0  ;;  %v2868_v13 = vadd.f32 %v2867_v2, %v2675_v41  ;;  %v2677_v55 = vadd.f32 %v2676_v22, %v8197_v47  ;;  %4696 = vmatprep.subr.bf16.mxu0 %v7533_v38  ;;  %v7819_v2 = vld [vmem:[#allocation2 + $0xbc] ss:$28 sps:$4 sm:$0xff]   ;;  %v7540_v10 = vld [vmem:[#allocation8 + $0x40] ss:$16 sps:$4 sm:$0xff]  }
 0x20b   :  { %4889 = vmatprep.subr.bf16.mxu1 %v7566_v57  ;;  %v2678_v56 = vpop.f32.mrf.mxu0  ;;  %v7582_v28 = vld [vmem:[#allocation8 + $0x240] ss:$16 sps:$4 sm:$0xff]   ;;  %v7545_v22 = vld [vmem:[#allocation8 + $0x24] ss:$16 sps:$4 sm:$0xff]  }
 0x20c   :  { %9723 = vst [vmem:[#allocation51_spill] sm:$0xff] %v8349_v46  ;;  %v2871_v21 = vpop.f32.mrf.mxu1  ;;  %v2870_v49 = vadd.f32 %v2869_v16, %v2677_v55  ;;  %v2679_v52 = vadd.f32 %v2678_v56, %v8200_v50  ;;  %v8353_v30 = vpack.c.bf16 %v3777_v51, %v3773_v58  ;;  %v7818_v50 = vld [vmem:[#allocation2 + $0x88] ss:$28 sps:$4 sm:$0xff]   ;;  %v3780_v24 = vmax.f32 %v2868_v13, 0.0 }
 0x20d   :  { %v2680_v12 = vpop.f32.mrf.mxu0  ;;  %4697 = vmatpush1.bf16.msra.mxu0 %v7531_v37  ;;  %v7588_v56 = vld [vmem:[#allocation8 + $0x220] ss:$16 sps:$4 sm:$0xff]  }
 0x20e   :  { %9724 = vst [vmem:[#allocation52_spill] sm:$0xff] %v8353_v30  ;;  %v2873_v29 = vpop.f32.mrf.mxu1  ;;  %4890 = vmatpush1.bf16.msra.mxu1 %v7564_v59  ;;  %v2872_v36 = vadd.f32 %v2871_v21, %v2679_v52  ;;  %v2681_v47 = vadd.f32 %v2680_v12, %v8203_v19  ;;  %4698 = vmatprep.subr.bf16.mxu0 %v7536_v23  ;;  %v3781_v19 = vmax.f32 %v2870_v49, 0.0  ;;  %v9726_v49 = vld [vmem:[#allocation17_spill] sm:$0xff]  ;;  %v7551_v52 = vld [vmem:[#allocation8 + $0x4] ss:$16 sps:$4 sm:$0xff]  }
 0x20f   :  { %4891 = vmatprep.subr.bf16.mxu1 %v7575_v15  ;;  %v2684_v33 = vpop.f32.mrf.mxu0  ;;  %3375 = vmatmul.mubr.bf16.gmra.mxu0 %v7817_v60  ;;  %v7543_v15 = vld [vmem:[#allocation8 + $0x20] ss:$16 sps:$4 sm:$0xff]   ;;  %v7593_v12 = vld [vmem:[#allocation8 + $0x204] ss:$16 sps:$4 sm:$0xff]  }
 0x210   :  { %v2877_v18 = vpop.f32.mrf.mxu1  ;;  %3568 = vmatmul.mubr.bf16.gmra.mxu1 %v7818_v50  ;;  %v3784_v38 = vmax.f32 %v2872_v36, 0.0  ;;  %v2874_v57 = vadd.f32 %v2873_v29, %v2681_v47  ;;  %v2685_v6 = vadd.f32 %v2684_v33, %v8206_v53  ;;  %3384 = vmatprep.mubr.bf16.mxu0 %v7819_v2  ;;  %v7590_v53 = vld [vmem:[#allocation8 + $0x224] ss:$16 sps:$4 sm:$0xff]  }
 0x211   :  { %3577 = vmatprep.mubr.bf16.mxu1 %v9718_v62  ;;  %v2686_v35 = vpop.f32.mrf.mxu0  ;;  %4699 = vmatpush1.bf16.msra.mxu0 %v7534_v4 }
 0x212   :  { %v2879_v40 = vpop.f32.mrf.mxu1  ;;  %4892 = vmatpush1.bf16.msra.mxu1 %v7573_v25  ;;  %v8358_v45 = vpack.c.bf16 %v3784_v38, %v3780_v24  ;;  %v3785_v41 = vmax.f32 %v2874_v57, 0.0  ;;  %v2878_v26 = vadd.f32 %v2877_v18, %v2685_v6  ;;  %v2687_v58 = vadd.f32 %v2686_v35, %v8209_v14  ;;  %4700 = vmatprep.subr.bf16.mxu0 %v7542_v9  ;;  %v7820_v25 = vld [vmem:[#allocation2 + $0xb8] ss:$28 sps:$4 sm:$0xff]  }
 0x213   :  { %4893 = vmatprep.subr.bf16.mxu1 %v7584_v32  ;;  %v2688_v16 = vpop.f32.mrf.mxu0  ;;  %v9727_v32 = vld [vmem:[#allocation18_spill] sm:$0xff] }
 0x214   :  { %v2881_v37 = vpop.f32.mrf.mxu1  ;;  %v2880_v59 = vadd.f32 %v2879_v40, %v2687_v58  ;;  %v2689_v51 = vadd.f32 %v2688_v16, %v8212_v1  ;;  %v8362_v13 = vpack.c.bf16 %v3785_v41, %v3781_v19  ;;  %v7821_v1 = vld [vmem:[#allocation2 + $0xc0] ss:$28 sps:$4 sm:$0xff]   ;;  %v3788_v36 = vmax.f32 %v2878_v26, 0.0  ;;  %v7822_v18 = vld [vmem:[#allocation2 + $0xf4] ss:$28 sps:$4 sm:$0xff]  }
 0x215   :  { %v2690_v55 = vpop.f32.mrf.mxu0  ;;  %4701 = vmatpush1.bf16.msra.mxu0 %v7540_v10  ;;  %v7549_v38 = vld [vmem:[#allocation8] ss:$16 sps:$4 sm:$0xff]   ;;  %v7554_v40 = vld [vmem:[#allocation8 + $0x1e4] ss:$16 sps:$4 sm:$0xff]   ;;  %v9728_v58 = vld [vmem:[#allocation19_spill] sm:$0xff] }
 0x216   :  { %9725 = vst [vmem:[#allocation53_spill] sm:$0xff] %v8362_v13  ;;  %v2883_v23 = vpop.f32.mrf.mxu1  ;;  %4894 = vmatpush1.bf16.msra.mxu1 %v7582_v28  ;;  %v2882_v21 = vadd.f32 %v2881_v37, %v2689_v51  ;;  %v2691_v14 = vadd.f32 %v2690_v55, %v9726_v49  ;;  %4702 = vmatprep.subr.bf16.mxu0 %v7545_v22  ;;  %v3789_v60 = vmax.f32 %v2880_v59, 0.0  ;;  %v7591_v57 = vld [vmem:[#allocation8 + $0x200] ss:$16 sps:$4 sm:$0xff]   ;;  %v7596_v10 = vld [vmem:[#allocation8 + $0x3e4] ss:$16 sps:$4 sm:$0xff]  }
 0x217   :  { %4895 = vmatprep.subr.bf16.mxu1 %v7590_v53  ;;  %v2694_v29 = vpop.f32.mrf.mxu0  ;;  %3385 = vmatmul.mubr.bf16.gmra.mxu0 %v7820_v25  ;;  %v7552_v59 = vld [vmem:[#allocation8 + $0x1e0] ss:$16 sps:$4 sm:$0xff]   ;;  %v9730_v25 = vld [vmem:[#allocation21_spill] sm:$0xff] }
 0x218   :  { %v2887_v4 = vpop.f32.mrf.mxu1  ;;  %3578 = vmatmul.mubr.bf16.gmra.mxu1 %v7821_v1  ;;  %v3792_v47 = vmax.f32 %v2882_v21, 0.0  ;;  %v2884_v9 = vadd.f32 %v2883_v23, %v2691_v14  ;;  %v2695_v33 = vadd.f32 %v2694_v29, %v9727_v32  ;;  %3394 = vmatprep.mubr.bf16.mxu0 %v7822_v18  ;;  %v7594_v51 = vld [vmem:[#allocation8 + $0x3e0] ss:$16 sps:$4 sm:$0xff]   ;;  %v7823_v14 = vld [vmem:[#allocation2 + $0xf0] ss:$28 sps:$4 sm:$0xff]  }
 0x219   :  { %3587 = vmatprep.mubr.bf16.mxu1 %v9718_v62  ;;  %v2696_v50 = vpop.f32.mrf.mxu0  ;;  %4703 = vmatpush1.bf16.msra.mxu0 %v7543_v15  ;;  %v9729_v23 = vld [vmem:[#allocation20_spill] sm:$0xff] }
 0x21a   :  { %v2889_v24 = vpop.f32.mrf.mxu1  ;;  %4896 = vmatpush1.bf16.msra.mxu1 %v7588_v56  ;;  %v8367_v6 = vpack.c.bf16 %v3792_v47, %v3788_v36  ;;  %v3793_v2 = vmax.f32 %v2884_v9, 0.0  ;;  %v2888_v19 = vadd.f32 %v2887_v4, %v2695_v33  ;;  %v2697_v35 = vadd.f32 %v2696_v50, %v8221_v31  ;;  %4704 = vmatprep.subr.bf16.mxu0 %v7551_v52  ;;  %v7560_v15 = vld [vmem:[#allocation8 + $0x1c4] ss:$16 sps:$4 sm:$0xff]   ;;  %v7558_v33 = vld [vmem:[#allocation8 + $0x1c0] ss:$16 sps:$4 sm:$0xff]  }
 0x21b   :  { %4897 = vmatprep.subr.bf16.mxu1 %v7593_v12  ;;  %v2698_v28 = vpop.f32.mrf.mxu0  ;;  %v7599_v56 = vld [vmem:[#allocation8 + $0x3c4] ss:$16 sps:$4 sm:$0xff]   ;;  %v7597_v18 = vld [vmem:[#allocation8 + $0x3c0] ss:$16 sps:$4 sm:$0xff]  }
 0x21c   :  { %v2891_v41 = vpop.f32.mrf.mxu1  ;;  %v2890_v26 = vadd.f32 %v2889_v24, %v2697_v35  ;;  %v2699_v22 = vadd.f32 %v2698_v28, %v9728_v58  ;;  %v8371_v53 = vpack.c.bf16 %v3793_v2, %v3789_v60  ;;  %v7824_v52 = vld [vmem:[#allocation2 + $0xf8] ss:$28 sps:$4 sm:$0xff]   ;;  %v3796_v12 = vmax.f32 %v2888_v19, 0.0  ;;  %v7825_v36 = vld [vmem:[#allocation2 + $0x12c] ss:$28 sps:$4 sm:$0xff]   ;;  %v9732_v28 = vld [vmem:[#allocation23_spill] sm:$0xff] }
 0x21d   :  { %v2700_v16 = vpop.f32.mrf.mxu0  ;;  %4705 = vmatpush1.bf16.msra.mxu0 %v7549_v38  ;;  %v9731_v38 = vld [vmem:[#allocation22_spill] sm:$0xff] }
 0x21e   :  { %v2893_v37 = vpop.f32.mrf.mxu1  ;;  %4898 = vmatpush1.bf16.msra.mxu1 %v7591_v57  ;;  %v2892_v55 = vadd.f32 %v2891_v41, %v2699_v22  ;;  %v2701_v31 = vadd.f32 %v2700_v16, %v9729_v23  ;;  %4706 = vmatprep.subr.bf16.mxu0 %v7554_v40  ;;  %v3797_v47 = vmax.f32 %v2890_v26, 0.0  ;;  %v7563_v2 = vld [vmem:[#allocation8 + $0x1a4] ss:$16 sps:$4 sm:$0xff]   ;;  %v7561_v16 = vld [vmem:[#allocation8 + $0x1a0] ss:$16 sps:$4 sm:$0xff]  }
 0x21f   :  { %4899 = vmatprep.subr.bf16.mxu1 %v7596_v10  ;;  %v2704_v21 = vpop.f32.mrf.mxu0  ;;  %3395 = vmatmul.mubr.bf16.gmra.mxu0 %v7823_v14  ;;  %v7602_v19 = vld [vmem:[#allocation8 + $0x3a4] ss:$16 sps:$4 sm:$0xff]  }
 0x220   :  { %v2897_v49 = vpop.f32.mrf.mxu1  ;;  %3588 = vmatmul.mubr.bf16.gmra.mxu1 %v7824_v52  ;;  %v3800_v29 = vmax.f32 %v2892_v55, 0.0  ;;  %v2894_v4 = vadd.f32 %v2893_v37, %v2701_v31  ;;  %v2705_v1 = vadd.f32 %v2704_v21, %v9730_v25  ;;  %3404 = vmatprep.mubr.bf16.mxu0 %v7825_v36  ;;  %v7600_v37 = vld [vmem:[#allocation8 + $0x3a0] ss:$16 sps:$4 sm:$0xff]   ;;  %v7569_v23 = vld [vmem:[#allocation8 + $0x184] ss:$16 sps:$4 sm:$0xff]  }
 0x221   :  { %3597 = vmatprep.mubr.bf16.mxu1 %v9718_v62  ;;  %v2706_v9 = vpop.f32.mrf.mxu0  ;;  %4707 = vmatpush2.bf16.msra.mxu0 %v7552_v59  ;;  %v7827_v21 = vld [vmem:[#allocation2 + $0x130] ss:$28 sps:$4 sm:$0xff]  }
 0x222   :  { %v2899_v32 = vpop.f32.mrf.mxu1  ;;  %4900 = vmatpush2.bf16.msra.mxu1 %v7594_v51  ;;  %v8376_v60 = vpack.c.bf16 %v3800_v29, %v3796_v12  ;;  %v3801_v50 = vmax.f32 %v2894_v4, 0.0  ;;  %v2898_v24 = vadd.f32 %v2897_v49, %v2705_v1  ;;  %v2707_v57 = vadd.f32 %v2706_v9, %v9731_v38  ;;  %4708 = vmatprep.subr.bf16.mxu0 %v7560_v15  ;;  %v9733_v51 = vld [vmem:[#allocation24_spill] sm:$0xff]  ;;  %v9734_v12 = vld [vmem:[#allocation25_spill] sm:$0xff] }
 0x223   :  { %4901 = vmatprep.subr.bf16.mxu1 %v7599_v56  ;;  %v2708_v35 = vpop.f32.mrf.mxu0  ;;  %v7826_v56 = vld [vmem:[#allocation2 + $0x128] ss:$28 sps:$4 sm:$0xff]  }
 0x224   :  { %v2901_v40 = vpop.f32.mrf.mxu1  ;;  %v2900_v10 = vadd.f32 %v2899_v32, %v2707_v57  ;;  %v2709_v41 = vadd.f32 %v2708_v35, %v9732_v28  ;;  %v8380_v26 = vpack.c.bf16 %v3801_v50, %v3797_v47  ;;  %v3804_v49 = vmax.f32 %v2898_v24, 0.0  ;;  %v7828_v4 = vld [vmem:[#allocation2 + $0x164] ss:$28 sps:$4 sm:$0xff]   ;;  %v7572_v9 = vld [vmem:[#allocation8 + $0x164] ss:$16 sps:$4 sm:$0xff]  }
 0x225   :  { %v2710_v58 = vpop.f32.mrf.mxu0  ;;  %4709 = vmatpush2.bf16.msra.mxu0 %v7558_v33  ;;  %v7567_v47 = vld [vmem:[#allocation8 + $0x180] ss:$16 sps:$4 sm:$0xff]   ;;  %v7605_v57 = vld [vmem:[#allocation8 + $0x384] ss:$16 sps:$4 sm:$0xff]  }
 0x226   :  { %v2903_v22 = vpop.f32.mrf.mxu1  ;;  %4902 = vmatpush2.bf16.msra.mxu1 %v7597_v18  ;;  %v2902_v59 = vadd.f32 %v2901_v40, %v2709_v41  ;;  %v2711_v55 = vadd.f32 %v2710_v58, %v9733_v51  ;;  %4710 = vmatprep.subr.bf16.mxu0 %v7563_v2  ;;  %v3805_v25 = vmax.f32 %v2900_v10, 0.0  ;;  %v9735_v50 = vld [vmem:[#allocation26_spill] sm:$0xff]  ;;  %v9736_v40 = vld [vmem:[#allocation27_spill] sm:$0xff] }
 0x227   :  { %4903 = vmatprep.subr.bf16.mxu1 %v7602_v19  ;;  %v2714_v31 = vpop.f32.mrf.mxu0  ;;  %3405 = vmatmul.mubr.bf16.gmra.mxu0 %v7826_v56  ;;  %v7603_v38 = vld [vmem:[#allocation8 + $0x380] ss:$16 sps:$4 sm:$0xff]   ;;  %v7578_v51 = vld [vmem:[#allocation8 + $0x144] ss:$16 sps:$4 sm:$0xff]  }
 0x228   :  { %v2907_v15 = vpop.f32.mrf.mxu1  ;;  %3598 = vmatmul.mubr.bf16.gmra.mxu1 %v7827_v21  ;;  %v3808_v14 = vmax.f32 %v2902_v59, 0.0  ;;  %v2904_v52 = vadd.f32 %v2903_v22, %v2711_v55  ;;  %v2715_v29 = vadd.f32 %v2714_v31, %v9734_v12  ;;  %3414 = vmatprep.mubr.bf16.mxu0 %v7828_v4  ;;  %v7570_v22 = vld [vmem:[#allocation8 + $0x160] ss:$16 sps:$4 sm:$0xff]   ;;  %v7829_v31 = vld [vmem:[#allocation2 + $0x160] ss:$28 sps:$4 sm:$0xff]  }
 0x229   :  { %3607 = vmatprep.mubr.bf16.mxu1 %v9718_v62  ;;  %v2716_v1 = vpop.f32.mrf.mxu0  ;;  %4711 = vmatpush2.bf16.msra.mxu0 %v7561_v16  ;;  %v7831_v12 = vld [vmem:[#allocation2 + $0x19c] ss:$28 sps:$4 sm:$0xff]  }
 0x22a   :  { %v2909_v36 = vpop.f32.mrf.mxu1  ;;  %4904 = vmatpush2.bf16.msra.mxu1 %v7600_v37  ;;  %v8385_v32 = vpack.c.bf16 %v3808_v14, %v3804_v49  ;;  %v3809_v33 = vmax.f32 %v2904_v52, 0.0  ;;  %v2908_v18 = vadd.f32 %v2907_v15, %v2715_v29  ;;  %v2717_v24 = vadd.f32 %v2716_v1, %v9735_v50  ;;  %4712 = vmatprep.subr.bf16.mxu0 %v7569_v23  ;;  %v9737_v37 = vld [vmem:[#allocation28_spill] sm:$0xff]  ;;  %v9738_v14 = vld [vmem:[#allocation29_spill] sm:$0xff]  ;;  %v9740_v50 = vld [vmem:[#allocation30_spill] sm:$0xff] }
 0x22b   :  { %v2718_v2 = vpop.f32.mrf.mxu0  ;;  %4905 = vmatprep.subr.bf16.mxu1 %v7605_v57  ;;  %v7830_v15 = vld [vmem:[#allocation2 + $0x168] ss:$28 sps:$4 sm:$0xff]  }
 0x22c   :  { %v2911_v19 = vpop.f32.mrf.mxu1  ;;  %v2910_v35 = vadd.f32 %v2909_v36, %v2717_v24  ;;  %v2719_v10 = vadd.f32 %v2718_v2, %v9736_v40  ;;  %v8389_v28 = vpack.c.bf16 %v3809_v33, %v3805_v25  ;;  %v3812_v56 = vmax.f32 %v2908_v18, 0.0  ;;  %v7576_v1 = vld [vmem:[#allocation8 + $0x140] ss:$16 sps:$4 sm:$0xff]   ;;  %v7581_v36 = vld [vmem:[#allocation8 + $0x124] ss:$16 sps:$4 sm:$0xff]   ;;  %v9741_v40 = vld [vmem:[#allocation31_spill] sm:$0xff] }
 0x22d   :  { %v2720_v41 = vpop.f32.mrf.mxu0  ;;  %4713 = vmatpush2.bf16.msra.mxu0 %v7567_v47  ;;  %v7606_v24 = vld [vmem:[#allocation8 + $0x360] ss:$16 sps:$4 sm:$0xff]  }
 0x22e   :  { %v2913_v58 = vpop.f32.mrf.mxu1  ;;  %4906 = vmatpush2.bf16.msra.mxu1 %v7603_v38  ;;  %v2912_v16 = vadd.f32 %v2911_v19, %v2719_v10  ;;  %v2721_v59 = vadd.f32 %v2720_v41, %v9737_v37  ;;  %4714 = vmatprep.subr.bf16.mxu0 %v7572_v9  ;;  %v3813_v29 = vmax.f32 %v2910_v35, 0.0  ;;  %v7608_v38 = vld [vmem:[#allocation8 + $0x364] ss:$16 sps:$4 sm:$0xff]  }
 0x22f   :  { %v2724_v55 = vpop.f32.mrf.mxu0  ;;  %3415 = vmatmul.mubr.bf16.gmra.mxu0 %v7829_v31  ;;  %4907 = vmatprep.subr.bf16.mxu1 %v7608_v38  ;;  %v9742_v37 = vld [vmem:[#allocation32_spill] sm:$0xff]  ;;  %v7832_v31 = vld [vmem:[#allocation2 + $0x198] ss:$28 sps:$4 sm:$0xff]  }
 0x230   :  { %v2917_v23 = vpop.f32.mrf.mxu1  ;;  %3608 = vmatmul.mubr.bf16.gmra.mxu1 %v7830_v15  ;;  %v3816_v21 = vmax.f32 %v2912_v16, 0.0  ;;  %v2914_v49 = vadd.f32 %v2913_v58, %v2721_v59  ;;  %v2725_v52 = vadd.f32 %v2724_v55, %v9738_v14  ;;  %3424 = vmatprep.mubr.bf16.mxu0 %v7831_v12  ;;  %v7833_v15 = vld [vmem:[#allocation2 + $0x1a0] ss:$28 sps:$4 sm:$0xff]   ;;  %v7609_v38 = vld [vmem:[#allocation8 + $0x340] ss:$16 sps:$4 sm:$0xff]  }
 0x231   :  { %3617 = vmatprep.mubr.bf16.mxu1 %v9718_v62  ;;  %v2726_v4 = vpop.f32.mrf.mxu0  ;;  %4715 = vmatpush2.bf16.msra.mxu0 %v7570_v22  ;;  %v7579_v22 = vld [vmem:[#allocation8 + $0x120] ss:$16 sps:$4 sm:$0xff]  }
 0x232   :  { %v2919_v25 = vpop.f32.mrf.mxu1  ;;  %v8394_v47 = vpack.c.bf16 %v3816_v21, %v3812_v56  ;;  %v3817_v9 = vmax.f32 %v2914_v49, 0.0  ;;  %v2918_v33 = vadd.f32 %v2917_v23, %v2725_v52  ;;  %v2727_v18 = vadd.f32 %v2726_v4, %v9740_v50  ;;  %4716 = vmatprep.subr.bf16.mxu0 %v7578_v51  ;;  %4908 = vmatpush2.bf16.msra.mxu1 %v7606_v24  ;;  %v7587_v51 = vld [vmem:[#allocation8 + $0x104] ss:$16 sps:$4 sm:$0xff]  }
 0x233   :  { %v2728_v57 = vpop.f32.mrf.mxu0  ;;  %v9743_v56 = vld [vmem:[#allocation16_spill] sm:$0xff] }
 0x234   :  { %9739 = vst [vmem:[#allocation17_spill] sm:$0xff] %v8394_v47  ;;  %v2921_v2 = vpop.f32.mrf.mxu1  ;;  %v2920_v19 = vadd.f32 %v2919_v25, %v2727_v18  ;;  %v2729_v10 = vadd.f32 %v2728_v57, %v9741_v40  ;;  %v8398_v35 = vpack.c.bf16 %v3817_v9, %v3813_v29  ;;  %v9653_v21 = vsub.s32 2, %v9743_v56  ;;  %v7834_v29 = vld [vmem:[#allocation2 + $0x1d4] ss:$28 sps:$4 sm:$0xff]  }
 0x235   :  { %v2730_v41 = vpop.f32.mrf.mxu0  ;;  %4717 = vmatpush2.bf16.msra.mxu0 %v7576_v1  ;;  %v3820_v49 = vmax.f32 %v2918_v33, 0.0  ;;  %v7585_v9 = vld [vmem:[#allocation8 + $0x100] ss:$16 sps:$4 sm:$0xff]  }
 0x236   :  { %v2923_v58 = vpop.f32.mrf.mxu1  ;;  %v2922_v16 = vadd.f32 %v2921_v2, %v2729_v10  ;;  %v2731_v59 = vadd.f32 %v2730_v41, %v9742_v37  ;;  %4718 = vmatprep.subr.bf16.mxu0 %v7581_v36  ;;  %v3821_v4 = vmax.f32 %v2920_v19, 0.0  ;;  %v9654_v36 = vsub.s32 3, %v9743_v56  ;;  %v9745_v10 = vld [vmem:[#allocation33_spill] sm:$0xff]  ;;  %v7835_v41 = vld [vmem:[#allocation7] sm:$0xf] }
 0x237   :  { %v2734_v55 = vpop.f32.mrf.mxu0  ;;  %3425 = vmatmul.mubr.bf16.gmra.mxu0 %v7832_v31  ;;  %v7848_v56 = vld [vmem:[#allocation2 + $0x2b0] ss:$28 sps:$4 sm:$0xff]  }
 0x238   :  { %v2927_v23 = vpop.f32.mrf.mxu1  ;;  %3618 = vmatmul.mubr.bf16.gmra.mxu1 %v7833_v15  ;;  %v3824_v14 = vmax.f32 %v2922_v16, 0.0  ;;  %v2924_v52 = vadd.f32 %v2923_v58, %v2731_v59  ;;  %v2735_v12 = vadd.f32 %v2734_v55, %v8266_v11  ;;  %3434 = vmatprep.mubr.bf16.mxu0 %v7834_v29  ;;  %v7611_v11 = vld [vmem:[#allocation8 + $0x344] ss:$16 sps:$4 sm:$0xff]   ;;  %v8411_v58 = vrot.slane %v7835_v41, %v9653_v21 }
 0x239   :  { %3627 = vmatprep.mubr.bf16.mxu1 %v9718_v62  ;;  %v2736_v25 = vpop.f32.mrf.mxu0  ;;  %4719 = vmatpush2.bf16.msra.mxu0 %v7579_v22 }
 0x23a   :  { %v2929_v1 = vpop.f32.mrf.mxu1  ;;  %v8405_v50 = vpack.c.bf16 %v3824_v14, %v3820_v49  ;;  %v3825_v18 = vmax.f32 %v2924_v52, 0.0  ;;  %v2928_v24 = vadd.f32 %v2927_v23, %v2735_v12  ;;  %v2737_v33 = vadd.f32 %v2736_v25, %v8269_v20  ;;  %4720 = vmatprep.subr.bf16.mxu0 %v7587_v51  ;;  %4909 = vmatprep.subr.bf16.mxu1 %v7611_v11  ;;  %v7617_v20 = vld [vmem:[#allocation8 + $0xec] ss:$16 sps:$4 sm:$0xff]   ;;  %v9747_v51 = vld [vmem:[#allocation34_spill] sm:$0xff]  ;;  %v7838_v25 = vld [vmem:[#allocation2 + $0x20c] ss:$28 sps:$4 sm:$0xff]  }
 0x23b   :  { %v2738_v57 = vpop.f32.mrf.mxu0  ;;  %4910 = vmatpush2.bf16.msra.mxu1 %v7609_v38  ;;  %v8418_v23 = vrot.slane %v7835_v41, %v9654_v36  ;;  %v7836_v49 = vld [vmem:[#allocation2 + $0x1d0] ss:$28 sps:$4 sm:$0xff]   ;;  %v7837_v14 = vld [vmem:[#allocation2 + $0x1d8] ss:$28 sps:$4 sm:$0xff]  }
 0x23c   :  { %9744 = vst [vmem:[#allocation18_spill] sm:$0xff] %v8405_v50  ;;  %v2931_v2 = vpop.f32.mrf.mxu1  ;;  %v2930_v40 = vadd.f32 %v2929_v1, %v2737_v33  ;;  %v2739_v19 = vadd.f32 %v2738_v57, %v9745_v10  ;;  %v8413_v22 = vpack.c.bf16 %v3825_v18, %v3821_v4  ;;  %v3828_v52 = vmax.f32 %v2928_v24, 0.0  ;;  %v7614_v41 = vld [vmem:[#allocation8 + $0x324] ss:$16 sps:$4 sm:$0xff]  }
 0x23d   :  { %v2740_v16 = vpop.f32.mrf.mxu0  ;;  %4721 = vmatpush2.bf16.msra.mxu0 %v7585_v9  ;;  %4911 = vmatprep.subr.bf16.mxu1 %v7614_v41  ;;  %v7851_v50 = vld [vmem:[#allocation2 + $0x2e8] ss:$28 sps:$4 sm:$0xff]  }
 0x23e   :  { %9746 = vst [vmem:[#allocation19_spill] sm:$0xff] %v8413_v22  ;;  %v2933_v37 = vpop.f32.mrf.mxu1  ;;  %v2932_v59 = vadd.f32 %v2931_v2, %v2739_v19  ;;  %v2741_v55 = vadd.f32 %v2740_v16, %v9747_v51  ;;  %v3829_v1 = vmax.f32 %v2930_v40, 0.0  ;;  %5076 = vmatprep.subr.bf16.mxu0 %v7617_v20 }
 0x23f   :  { %v2970_v31 = vpop.f32.mrf.mxu0  ;;  %3435 = vmatmul.mubr.bf16.gmra.mxu0 %v7836_v49  ;;  %v7840_v49 = vld [vmem:[#allocation2 + $0x210] ss:$28 sps:$4 sm:$0xff]  }
 0x240   :  { %v3163_v15 = vpop.f32.mrf.mxu1  ;;  %3628 = vmatmul.mubr.bf16.gmra.mxu1 %v7837_v14  ;;  %v3832_v12 = vmax.f32 %v2932_v59, 0.0  ;;  %v2934_v29 = vadd.f32 %v2933_v37, %v2741_v55  ;;  %v2971_v4 = vadd.f32 %v2970_v31, %v8411_v58  ;;  %3444 = vmatprep.mubr.bf16.mxu0 %v7838_v25  ;;  %v7612_v59 = vld [vmem:[#allocation8 + $0x320] ss:$16 sps:$4 sm:$0xff]   ;;  %v7623_v25 = vld [vmem:[#allocation8 + $0x304] ss:$16 sps:$4 sm:$0xff]  }
 0x241   :  { %3637 = vmatprep.mubr.bf16.mxu1 %v9718_v62  ;;  %v2972_v9 = vpop.f32.mrf.mxu0  ;;  %4912 = vmatpush2.bf16.msra.mxu1 %v7612_v59 }
 0x242   :  { %v3165_v18 = vpop.f32.mrf.mxu1  ;;  %v8422_v33 = vpack.c.bf16 %v3832_v12, %v3828_v52  ;;  %v3833_v38 = vmax.f32 %v2934_v29, 0.0  ;;  %v8424_v11 = vadd.f32 %v3163_v15, %v2971_v4  ;;  %v2973_v57 = vadd.f32 %v2972_v9, %v8418_v23  ;;  %v7839_v15 = vld [vmem:[#allocation2 + $0x208] ss:$28 sps:$4 sm:$0xff]   ;;  %4913 = vmatprep.subr.bf16.mxu1 %v7623_v25 }
 0x243   :  { %v2974_v24 = vpop.f32.mrf.mxu0  ;;  %v7841_v12 = vld [vmem:[#allocation2 + $0x244] ss:$28 sps:$4 sm:$0xff]  }
 0x244   :  { %9748 = vst [vmem:[#allocation20_spill] sm:$0xff] %v8422_v33  ;;  %v3167_v2 = vpop.f32.mrf.mxu1  ;;  %v8427_v10 = vadd.f32 %v3165_v18, %v2973_v57  ;;  %v2975_v19 = vadd.f32 %v2974_v24, %v8411_v58  ;;  %v8430_v16 = vpack.c.bf16 %v3833_v38, %v3829_v1  ;;  %v7621_v18 = vld [vmem:[#allocation8 + $0x300] ss:$16 sps:$4 sm:$0xff]  }
 0x245   :  { %v2976_v40 = vpop.f32.mrf.mxu0  ;;  %4914 = vmatpush2.bf16.msra.mxu1 %v7621_v18 }
 0x246   :  { %9749 = vst [vmem:[#allocation21_spill] sm:$0xff] %v8430_v16  ;;  %v3169_v37 = vpop.f32.mrf.mxu1  ;;  %v8432_v20 = vadd.f32 %v3167_v2, %v2975_v19  ;;  %v2977_v51 = vadd.f32 %v2976_v40, %v8418_v23 }
 0x247   :  { %v2980_v55 = vpop.f32.mrf.mxu0  ;;  %3445 = vmatmul.mubr.bf16.gmra.mxu0 %v7839_v15 }
 0x248   :  { %v3173_v31 = vpop.f32.mrf.mxu1  ;;  %3638 = vmatmul.mubr.bf16.gmra.mxu1 %v7840_v49  ;;  %v8435_v14 = vadd.f32 %v3169_v37, %v2977_v51  ;;  %v2981_v52 = vadd.f32 %v2980_v55, %v8411_v58  ;;  %3454 = vmatprep.mubr.bf16.mxu0 %v7841_v12  ;;  %v7842_v55 = vld [vmem:[#allocation2 + $0x240] ss:$28 sps:$4 sm:$0xff]  }
 0x249   :  { %3647 = vmatprep.mubr.bf16.mxu1 %v9718_v62  ;;  %v2982_v29 = vpop.f32.mrf.mxu0 }
 0x24a   :  { %v3175_v4 = vpop.f32.mrf.mxu1  ;;  %v8439_v1 = vadd.f32 %v3173_v31, %v2981_v52  ;;  %v2983_v9 = vadd.f32 %v2982_v29, %v8418_v23  ;;  %v7843_v31 = vld [vmem:[#allocation2 + $0x248] ss:$28 sps:$4 sm:$0xff]   ;;  %v7844_v52 = vld [vmem:[#allocation2 + $0x27c] ss:$28 sps:$4 sm:$0xff]  }
 0x24b   :  { %v2984_v38 = vpop.f32.mrf.mxu0 }
 0x24c   :  { %v3177_v57 = vpop.f32.mrf.mxu1  ;;  %v8442_v24 = vadd.f32 %v3175_v4, %v2983_v9  ;;  %v2985_v2 = vadd.f32 %v2984_v38, %v8411_v58 }
 0x24d   :  { %v2986_v19 = vpop.f32.mrf.mxu0 }
 0x24e   :  { %v3179_v41 = vpop.f32.mrf.mxu1  ;;  %v8445_v40 = vadd.f32 %v3177_v57, %v2985_v2  ;;  %v2987_v37 = vadd.f32 %v2986_v19, %v8418_v23  ;;  %v7635_v2 = vld [vmem:[#allocation8 + $0x2ec] ss:$16 sps:$4 sm:$0xff]  }
 0x24f   :  { %v2990_v59 = vpop.f32.mrf.mxu0  ;;  %3455 = vmatmul.mubr.bf16.gmra.mxu0 %v7842_v55  ;;  %5269 = vmatprep.subr.bf16.mxu1 %v7635_v2 }
 0x250   :  { %v3183_v51 = vpop.f32.mrf.mxu1  ;;  %3648 = vmatmul.mubr.bf16.gmra.mxu1 %v7843_v31  ;;  %v8448_v15 = vadd.f32 %v3179_v41, %v2987_v37  ;;  %v2991_v49 = vadd.f32 %v2990_v59, %v8411_v58  ;;  %3464 = vmatprep.mubr.bf16.mxu0 %v7844_v52 }
 0x251   :  { %3657 = vmatprep.mubr.bf16.mxu1 %v9718_v62  ;;  %v2992_v12 = vpop.f32.mrf.mxu0 }
 0x252   :  { %v3185_v29 = vpop.f32.mrf.mxu1  ;;  %v8452_v4 = vadd.f32 %v3183_v51, %v2991_v49  ;;  %v2993_v25 = vadd.f32 %v2992_v12, %v8418_v23  ;;  %v7845_v51 = vld [vmem:[#allocation2 + $0x278] ss:$28 sps:$4 sm:$0xff]   ;;  %v7846_v49 = vld [vmem:[#allocation2 + $0x280] ss:$28 sps:$4 sm:$0xff]  }
 0x253   :  { %v2994_v9 = vpop.f32.mrf.mxu0 }
 0x254   :  { %v3187_v18 = vpop.f32.mrf.mxu1  ;;  %v8455_v38 = vadd.f32 %v3185_v29, %v2993_v25  ;;  %v2995_v57 = vadd.f32 %v2994_v9, %v8411_v58  ;;  %v7847_v29 = vld [vmem:[#allocation2 + $0x2b4] ss:$28 sps:$4 sm:$0xff]  }
 0x255   :  { %v2996_v19 = vpop.f32.mrf.mxu0 }
 0x256   :  { %v3189_v41 = vpop.f32.mrf.mxu1  ;;  %v8458_v37 = vadd.f32 %v3187_v18, %v2995_v57  ;;  %v2997_v59 = vadd.f32 %v2996_v19, %v8418_v23 }
 0x257   :  { %v3000_v55 = vpop.f32.mrf.mxu0  ;;  %3465 = vmatmul.mubr.bf16.gmra.mxu0 %v7845_v51 }
 0x258   :  { %v3193_v31 = vpop.f32.mrf.mxu1  ;;  %3658 = vmatmul.mubr.bf16.gmra.mxu1 %v7846_v49  ;;  %v8461_v52 = vadd.f32 %v3189_v41, %v2997_v59  ;;  %v3001_v12 = vadd.f32 %v3000_v55, %v8411_v58  ;;  %3474 = vmatprep.mubr.bf16.mxu0 %v7847_v29 }
 0x259   :  { %3667 = vmatprep.mubr.bf16.mxu1 %v9718_v62  ;;  %v3002_v25 = vpop.f32.mrf.mxu0 }
 0x25a   :  { %v3195_v9 = vpop.f32.mrf.mxu1  ;;  %v8465_v18 = vadd.f32 %v3193_v31, %v3001_v12  ;;  %v3003_v57 = vadd.f32 %v3002_v25, %v8418_v23  ;;  %v7849_v31 = vld [vmem:[#allocation2 + $0x2b8] ss:$28 sps:$4 sm:$0xff]  }
 0x25b   :  { %v3004_v2 = vpop.f32.mrf.mxu0 }
 0x25c   :  { %v3197_v19 = vpop.f32.mrf.mxu1  ;;  %v8468_v21 = vadd.f32 %v3195_v9, %v3003_v57  ;;  %v3005_v51 = vadd.f32 %v3004_v2, %v8411_v58  ;;  %v7850_v9 = vld [vmem:[#allocation2 + $0x2ec] ss:$28 sps:$4 sm:$0xff]  }
 0x25d   :  { %v3006_v41 = vpop.f32.mrf.mxu0 }
 0x25e   :  { %v3199_v59 = vpop.f32.mrf.mxu1  ;;  %v8471_v49 = vadd.f32 %v3197_v19, %v3005_v51  ;;  %v3007_v55 = vadd.f32 %v3006_v41, %v8418_v23 }
 0x25f   :  { %v3010_v29 = vpop.f32.mrf.mxu0  ;;  %3475 = vmatmul.mubr.bf16.gmra.mxu0 %v7848_v56 }
 0x260   :  { %v3203_v36 = vpop.f32.mrf.mxu1  ;;  %3668 = vmatmul.mubr.bf16.gmra.mxu1 %v7849_v31  ;;  %v8474_v12 = vadd.f32 %v3199_v59, %v3007_v55  ;;  %v3011_v25 = vadd.f32 %v3010_v29, %v8411_v58  ;;  %3484 = vmatprep.mubr.bf16.mxu0 %v7850_v9 }
 0x261   :  { %3677 = vmatprep.mubr.bf16.mxu1 %v9718_v62  ;;  %v3012_v57 = vpop.f32.mrf.mxu0 }
 0x262   :  { %v3205_v2 = vpop.f32.mrf.mxu1  ;;  %v8478_v19 = vadd.f32 %v3203_v36, %v3011_v25  ;;  %v3013_v51 = vadd.f32 %v3012_v57, %v8418_v23  ;;  %v7852_v36 = vld [vmem:[#allocation2 + $0x2f0] ss:$28 sps:$4 sm:$0xff]   ;;  %v7853_v57 = vld [vmem:[#allocation2 + $0x324] ss:$28 sps:$4 sm:$0xff]  }
 0x263   :  { %v3014_v41 = vpop.f32.mrf.mxu0 }
 0x264   :  { %v3207_v33 = vpop.f32.mrf.mxu1  ;;  %v8481_v16 = vadd.f32 %v3205_v2, %v3013_v51  ;;  %v3015_v56 = vadd.f32 %v3014_v41, %v8411_v58 }
 0x265   :  { %v8484_v59 = vpop.f32.mrf.mxu0 }
 0x266   :  { %9750 = vst [vmem:[#allocation22_spill] sm:$0xff] %v8481_v16  ;;  %v8486_v55 = vpop.f32.mrf.mxu1  ;;  %v8488_v29 = vadd.f32 %v3207_v33, %v3015_v56  ;;  %v7854_v16 = vld [vmem:[#allocation2 + $0x320] ss:$28 sps:$4 sm:$0xff]  }
 0x267   :  { %9751 = vst [vmem:[#allocation23_spill] sm:$0xff] %v8486_v55  ;;  %v3020_v31 = vpop.f32.mrf.mxu0  ;;  %3485 = vmatmul.mubr.bf16.gmra.mxu0 %v7851_v50 }
 0x268   :  { %9752 = vst [vmem:[#allocation24_spill] sm:$0xff] %v8488_v29  ;;  %v3213_v9 = vpop.f32.mrf.mxu1  ;;  %3678 = vmatmul.mubr.bf16.gmra.mxu1 %v7852_v36  ;;  %v3021_v25 = vadd.f32 %v3020_v31, %v8411_v58  ;;  %3494 = vmatprep.mubr.bf16.mxu0 %v7853_v57 }
 0x269   :  { %3687 = vmatprep.mubr.bf16.mxu1 %v9718_v62  ;;  %v3022_v2 = vpop.f32.mrf.mxu0 }
 0x26a   :  { %v3215_v51 = vpop.f32.mrf.mxu1  ;;  %v8492_v41 = vadd.f32 %v3213_v9, %v3021_v25  ;;  %v3023_v22 = vadd.f32 %v3022_v2, %v8418_v23  ;;  %v7855_v9 = vld [vmem:[#allocation2 + $0x328] ss:$28 sps:$4 sm:$0xff]   ;;  %v7856_v2 = vld [vmem:[#allocation2 + $0x35c] ss:$28 sps:$4 sm:$0xff]  }
 0x26b   :  { %v3024_v33 = vpop.f32.mrf.mxu0 }
 0x26c   :  { %9753 = vst [vmem:[#allocation25_spill] sm:$0xff] %v8492_v41  ;;  %v3217_v56 = vpop.f32.mrf.mxu1  ;;  %v8495_v47 = vadd.f32 %v3215_v51, %v3023_v22  ;;  %v3025_v50 = vadd.f32 %v3024_v33, %v8411_v58  ;;  %v7857_v41 = vld [vmem:[#allocation2 + $0x358] ss:$28 sps:$4 sm:$0xff]  }
 0x26d   :  { %v8498_v29 = vpop.f32.mrf.mxu0 }
 0x26e   :  { %9754 = vst [vmem:[#allocation26_spill] sm:$0xff] %v8495_v47  ;;  %v8500_v36 = vpop.f32.mrf.mxu1  ;;  %v8502_v31 = vadd.f32 %v3217_v56, %v3025_v50 }
 0x26f   :  { %9755 = vst [vmem:[#allocation27_spill] sm:$0xff] %v8500_v36  ;;  %v3030_v57 = vpop.f32.mrf.mxu0  ;;  %3495 = vmatmul.mubr.bf16.gmra.mxu0 %v7854_v16 }
 0x270   :  { %9756 = vst [vmem:[#allocation28_spill] sm:$0xff] %v8502_v31  ;;  %v3223_v55 = vpop.f32.mrf.mxu1  ;;  %3688 = vmatmul.mubr.bf16.gmra.mxu1 %v7855_v9  ;;  %v3031_v25 = vadd.f32 %v3030_v57, %v8411_v58  ;;  %3504 = vmatprep.mubr.bf16.mxu0 %v7856_v2 }
 0x271   :  { %3697 = vmatprep.mubr.bf16.mxu1 %v9718_v62  ;;  %v3032_v22 = vpop.f32.mrf.mxu0 }
 0x272   :  { %v3225_v51 = vpop.f32.mrf.mxu1  ;;  %v8506_v33 = vadd.f32 %v3223_v55, %v3031_v25  ;;  %v3033_v36 = vadd.f32 %v3032_v22, %v8418_v23  ;;  %v7858_v55 = vld [vmem:[#allocation2 + $0x360] ss:$28 sps:$4 sm:$0xff]  }
 0x273   :  { %v3034_v56 = vpop.f32.mrf.mxu0 }
 0x274   :  { %9757 = vst [vmem:[#allocation29_spill] sm:$0xff] %v8506_v33  ;;  %v3227_v50 = vpop.f32.mrf.mxu1  ;;  %v8509_v31 = vadd.f32 %v3225_v51, %v3033_v36  ;;  %v3035_v16 = vadd.f32 %v3034_v56, %v8411_v58 }
 0x275   :  { %v8512_v47 = vpop.f32.mrf.mxu0 }
 0x276   :  { %9758 = vst [vmem:[#allocation30_spill] sm:$0xff] %v8509_v31  ;;  %9759 = vst [vmem:[#allocation31_spill] sm:$0xff] %v8512_v47  ;;  %v8514_v9 = vpop.f32.mrf.mxu1  ;;  %v8516_v57 = vadd.f32 %v3227_v50, %v3035_v16 }
 0x277   :  { %9760 = vst [vmem:[#allocation32_spill] sm:$0xff] %v8514_v9  ;;  %v3040_v2 = vpop.f32.mrf.mxu0  ;;  %3505 = vmatmul.mubr.bf16.gmra.mxu0 %v7857_v41 }
 0x278   :  { %9761 = vst [vmem:[#allocation33_spill] sm:$0xff] %v8516_v57  ;;  %v3233_v62 = vpop.f32.mrf.mxu1  ;;  %3698 = vmatmul.mubr.bf16.gmra.mxu1 %v7858_v55  ;;  %v3041_v25 = vadd.f32 %v3040_v2, %v8411_v58  ;;  %4722 = vmatprep.mubr.bf16.mxu0 %v8286_v42  ;;  %v7615_v57 = vld [vmem:[#allocation8 + $0xe8] ss:$16 sps:$4 sm:$0xff]   ;;  %v7620_v2 = vld [vmem:[#allocation8 + $0xcc] ss:$16 sps:$4 sm:$0xff]  }
 0x279   :  { %v3042_v36 = vpop.f32.mrf.mxu0 }
 0x27a   :  { %v3235_v22 = vpop.f32.mrf.mxu1  ;;  %v8520_v51 = vadd.f32 %v3233_v62, %v3041_v25  ;;  %v3043_v56 = vadd.f32 %v3042_v36, %v8418_v23  ;;  %v7618_v25 = vld [vmem:[#allocation8 + $0xc8] ss:$16 sps:$4 sm:$0xff]  }
 0x27b   :  { %v3044_v31 = vpop.f32.mrf.mxu0 }
 0x27c   :  { %v3237_v9 = vpop.f32.mrf.mxu1  ;;  %v8523_v50 = vadd.f32 %v3235_v22, %v3043_v56  ;;  %v3045_v16 = vadd.f32 %v3044_v31, %v8411_v58  ;;  %v7626_v22 = vld [vmem:[#allocation8 + $0xac] ss:$16 sps:$4 sm:$0xff]  }
 0x27d   :  { %v8526_v41 = vpop.f32.mrf.mxu0 }
 0x27e   :  { %9762 = vst [vmem:[#allocation34_spill] sm:$0xff] %v8523_v50  ;;  %v8528_v55 = vpop.f32.mrf.mxu1  ;;  %v8530_v33 = vadd.f32 %v3237_v9, %v3045_v16 }
 0x27f   :  { %9763 = vst [vmem:[#allocation54_spill] sm:$0xff] %v8528_v55  ;;  %v3050_v42 = vpop.f32.mrf.mxu0  ;;  %4723 = vmatmul.mubr.bf16.vlgmr.msra.gmra.mxu0 %v8282_v27 }
 0x280   :  { %9764 = vst [vmem:[#allocation55_spill] sm:$0xff] %v8530_v33  ;;  %v3243_v47 = vpop.f32.mrf.mxu1  ;;  %v3051_v62 = vadd.f32 %v3050_v42, %v8411_v58  ;;  %4732 = vmatprep.mubr.bf16.mxu0 %v8294_v5  ;;  %5077 = vmatpush1.bf16.msra.mxu0 %v7615_v57  ;;  %v7624_v42 = vld [vmem:[#allocation8 + $0xa8] ss:$16 sps:$4 sm:$0xff]   ;;  %v7629_v5 = vld [vmem:[#allocation8 + $0x8c] ss:$16 sps:$4 sm:$0xff]  }
 0x281   :  { %v3052_v36 = vpop.f32.mrf.mxu0  ;;  %5078 = vmatprep.subr.bf16.mxu0 %v7620_v2 }
 0x282   :  { %v3245_v31 = vpop.f32.mrf.mxu1  ;;  %v8535_v56 = vadd.f32 %v3243_v47, %v3051_v62  ;;  %v3053_v55 = vadd.f32 %v3052_v36, %v8418_v23 }
 0x283   :  { %v3054_v9 = vpop.f32.mrf.mxu0 }
 0x284   :  { %v3247_v16 = vpop.f32.mrf.mxu1  ;;  %v8538_v33 = vadd.f32 %v3245_v31, %v3053_v55  ;;  %v3055_v27 = vadd.f32 %v3054_v9, %v8411_v58  ;;  %5079 = vmatpush1.bf16.msra.mxu0 %v7618_v25  ;;  %v7627_v55 = vld [vmem:[#allocation8 + $0x88] ss:$16 sps:$4 sm:$0xff]   ;;  %v7632_v9 = vld [vmem:[#allocation8 + $0x6c] ss:$16 sps:$4 sm:$0xff]  }
 0x285   :  { %v8541_v50 = vpop.f32.mrf.mxu0  ;;  %5080 = vmatprep.subr.bf16.mxu0 %v7626_v22 }
 0x286   :  { %9765 = vst [vmem:[#allocation56_spill] sm:$0xff] %v8538_v33  ;;  %v8543_v57 = vpop.f32.mrf.mxu1  ;;  %v8545_v2 = vadd.f32 %v3247_v16, %v3055_v27 }
 0x287   :  { %9766 = vst [vmem:[#allocation57_spill] sm:$0xff] %v8543_v57  ;;  %v3060_v47 = vpop.f32.mrf.mxu0  ;;  %4733 = vmatmul.mubr.bf16.gmra.mxu0 %v8290_v8 }
 0x288   :  { %9767 = vst [vmem:[#allocation58_spill] sm:$0xff] %v8545_v2  ;;  %v3253_v62 = vpop.f32.mrf.mxu1  ;;  %v3061_v36 = vadd.f32 %v3060_v47, %v8411_v58  ;;  %4742 = vmatprep.mubr.bf16.mxu0 %v8302_v48  ;;  %5081 = vmatpush1.bf16.msra.mxu0 %v7624_v42  ;;  %v7630_v47 = vld [vmem:[#allocation8 + $0x68] ss:$16 sps:$4 sm:$0xff]   ;;  %v7638_v48 = vld [vmem:[#allocation8 + $0x4c] ss:$16 sps:$4 sm:$0xff]  }
 0x289   :  { %v3062_v25 = vpop.f32.mrf.mxu0  ;;  %5082 = vmatprep.subr.bf16.mxu0 %v7629_v5 }
 0x28a   :  { %v3255_v31 = vpop.f32.mrf.mxu1  ;;  %v8550_v33 = vadd.f32 %v3253_v62, %v3061_v36  ;;  %v3063_v22 = vadd.f32 %v3062_v25, %v8418_v23 }
 0x28b   :  { %v3064_v27 = vpop.f32.mrf.mxu0 }
 0x28c   :  { %v3257_v16 = vpop.f32.mrf.mxu1  ;;  %v8553_v2 = vadd.f32 %v3255_v31, %v3063_v22  ;;  %v3065_v8 = vadd.f32 %v3064_v27, %v8411_v58  ;;  %5083 = vmatpush1.bf16.msra.mxu0 %v7627_v55  ;;  %v7636_v31 = vld [vmem:[#allocation8 + $0x48] ss:$16 sps:$4 sm:$0xff]   ;;  %v7641_v27 = vld [vmem:[#allocation8 + $0x2c] ss:$16 sps:$4 sm:$0xff]  }
 0x28d   :  { %v8556_v57 = vpop.f32.mrf.mxu0  ;;  %5084 = vmatprep.subr.bf16.mxu0 %v7632_v9 }
 0x28e   :  { %9768 = vst [vmem:[#allocation59_spill] sm:$0xff] %v8553_v2  ;;  %v8558_v42 = vpop.f32.mrf.mxu1  ;;  %v8560_v5 = vadd.f32 %v3257_v16, %v3065_v8 }
 0x28f   :  { %9769 = vst [vmem:[#allocation60_spill] sm:$0xff] %v8558_v42  ;;  %v3070_v62 = vpop.f32.mrf.mxu0  ;;  %4743 = vmatmul.mubr.bf16.gmra.mxu0 %v8298_v63 }
 0x290   :  { %9770 = vst [vmem:[#allocation61_spill] sm:$0xff] %v8560_v5  ;;  %v3263_v36 = vpop.f32.mrf.mxu1  ;;  %v3071_v25 = vadd.f32 %v3070_v62, %v8411_v58  ;;  %4752 = vmatprep.mubr.bf16.mxu0 %v8310_v17  ;;  %5085 = vmatpush1.bf16.msra.mxu0 %v7630_v47  ;;  %v7639_v62 = vld [vmem:[#allocation8 + $0x28] ss:$16 sps:$4 sm:$0xff]   ;;  %v7647_v17 = vld [vmem:[#allocation8 + $0xc] ss:$16 sps:$4 sm:$0xff]  }
 0x291   :  { %v3072_v55 = vpop.f32.mrf.mxu0  ;;  %5086 = vmatprep.subr.bf16.mxu0 %v7638_v48 }
 0x292   :  { %v3265_v22 = vpop.f32.mrf.mxu1  ;;  %v8565_v2 = vadd.f32 %v3263_v36, %v3071_v25  ;;  %v3073_v9 = vadd.f32 %v3072_v55, %v8418_v23 }
 0x293   :  { %v3074_v8 = vpop.f32.mrf.mxu0 }
 0x294   :  { %v3267_v16 = vpop.f32.mrf.mxu1  ;;  %v8568_v5 = vadd.f32 %v3265_v22, %v3073_v9  ;;  %v3075_v63 = vadd.f32 %v3074_v8, %v8411_v58  ;;  %5087 = vmatpush1.bf16.msra.mxu0 %v7636_v31  ;;  %v7645_v22 = vld [vmem:[#allocation8 + $0x8] ss:$16 sps:$4 sm:$0xff]   ;;  %v7650_v8 = vld [vmem:[#allocation8 + $0x1ec] ss:$16 sps:$4 sm:$0xff]  }
 0x295   :  { %v8571_v42 = vpop.f32.mrf.mxu0  ;;  %5088 = vmatprep.subr.bf16.mxu0 %v7641_v27 }
 0x296   :  { %9771 = vst [vmem:[#allocation62_spill] sm:$0xff] %v8568_v5  ;;  %v8573_v47 = vpop.f32.mrf.mxu1  ;;  %v8575_v48 = vadd.f32 %v3267_v16, %v3075_v63 }
 0x297   :  { %9772 = vst [vmem:[#allocation63_spill] sm:$0xff] %v8573_v47  ;;  %v3080_v36 = vpop.f32.mrf.mxu0  ;;  %4753 = vmatmul.mubr.bf16.gmra.mxu0 %v8306_v39 }
 0x298   :  { %9773 = vst [vmem:[#allocation64_spill] sm:$0xff] %v8575_v48  ;;  %v3273_v25 = vpop.f32.mrf.mxu1  ;;  %v3081_v55 = vadd.f32 %v3080_v36, %v8411_v58  ;;  %4762 = vmatprep.mubr.bf16.mxu0 %v8318_v43  ;;  %5089 = vmatpush1.bf16.msra.mxu0 %v7639_v62  ;;  %v7648_v36 = vld [vmem:[#allocation8 + $0x1e8] ss:$16 sps:$4 sm:$0xff]   ;;  %v7656_v43 = vld [vmem:[#allocation8 + $0x1cc] ss:$16 sps:$4 sm:$0xff]  }
 0x299   :  { %v3082_v31 = vpop.f32.mrf.mxu0  ;;  %5090 = vmatprep.subr.bf16.mxu0 %v7647_v17 }
 0x29a   :  { %v3275_v9 = vpop.f32.mrf.mxu1  ;;  %v8580_v5 = vadd.f32 %v3273_v25, %v3081_v55  ;;  %v3083_v27 = vadd.f32 %v3082_v31, %v8418_v23 }
 0x29b   :  { %v3084_v63 = vpop.f32.mrf.mxu0 }
 0x29c   :  { %v3277_v16 = vpop.f32.mrf.mxu1  ;;  %v8583_v48 = vadd.f32 %v3275_v9, %v3083_v27  ;;  %v3085_v39 = vadd.f32 %v3084_v63, %v8411_v58  ;;  %5091 = vmatpush1.bf16.msra.mxu0 %v7645_v22  ;;  %v7654_v9 = vld [vmem:[#allocation8 + $0x1c8] ss:$16 sps:$4 sm:$0xff]   ;;  %v7659_v63 = vld [vmem:[#allocation8 + $0x1ac] ss:$16 sps:$4 sm:$0xff]  }
 0x29d   :  { %v8586_v47 = vpop.f32.mrf.mxu0  ;;  %5092 = vmatprep.subr.bf16.mxu0 %v7650_v8 }
 0x29e   :  { %9774 = vst [vmem:[#allocation65_spill] sm:$0xff] %v8583_v48  ;;  %v8588_v62 = vpop.f32.mrf.mxu1  ;;  %v8590_v17 = vadd.f32 %v3277_v16, %v3085_v39 }
 0x29f   :  { %9775 = vst [vmem:[#allocation66_spill] sm:$0xff] %v8588_v62  ;;  %v3090_v25 = vpop.f32.mrf.mxu0  ;;  %4763 = vmatmul.mubr.bf16.gmra.mxu0 %v8314_v34 }
 0x2a0   :  { %9776 = vst [vmem:[#allocation67_spill] sm:$0xff] %v8590_v17  ;;  %v3283_v55 = vpop.f32.mrf.mxu1  ;;  %v3091_v31 = vadd.f32 %v3090_v25, %v8411_v58  ;;  %4772 = vmatprep.mubr.bf16.mxu0 %v8326_v7  ;;  %5093 = vmatpush2.bf16.msra.mxu0 %v7648_v36  ;;  %v7657_v25 = vld [vmem:[#allocation8 + $0x1a8] ss:$16 sps:$4 sm:$0xff]   ;;  %v7665_v7 = vld [vmem:[#allocation8 + $0x18c] ss:$16 sps:$4 sm:$0xff]  }
 0x2a1   :  { %v3092_v22 = vpop.f32.mrf.mxu0  ;;  %5094 = vmatprep.subr.bf16.mxu0 %v7656_v43 }
 0x2a2   :  { %v3285_v27 = vpop.f32.mrf.mxu1  ;;  %v8595_v48 = vadd.f32 %v3283_v55, %v3091_v31  ;;  %v3093_v8 = vadd.f32 %v3092_v22, %v8418_v23 }
 0x2a3   :  { %v3094_v39 = vpop.f32.mrf.mxu0 }
 0x2a4   :  { %v3287_v16 = vpop.f32.mrf.mxu1  ;;  %v8598_v17 = vadd.f32 %v3285_v27, %v3093_v8  ;;  %v3095_v34 = vadd.f32 %v3094_v39, %v8411_v58  ;;  %5095 = vmatpush2.bf16.msra.mxu0 %v7654_v9  ;;  %v7663_v27 = vld [vmem:[#allocation8 + $0x188] ss:$16 sps:$4 sm:$0xff]   ;;  %v7668_v39 = vld [vmem:[#allocation8 + $0x16c] ss:$16 sps:$4 sm:$0xff]  }
 0x2a5   :  { %v8601_v62 = vpop.f32.mrf.mxu0  ;;  %5096 = vmatprep.subr.bf16.mxu0 %v7659_v63 }
 0x2a6   :  { %9777 = vst [vmem:[#allocation68_spill] sm:$0xff] %v8598_v17  ;;  %v8603_v36 = vpop.f32.mrf.mxu1  ;;  %v8605_v43 = vadd.f32 %v3287_v16, %v3095_v34 }
 0x2a7   :  { %9778 = vst [vmem:[#allocation69_spill] sm:$0xff] %v8603_v36  ;;  %v3100_v55 = vpop.f32.mrf.mxu0  ;;  %4773 = vmatmul.mubr.bf16.gmra.mxu0 %v8322_v54 }
 0x2a8   :  { %9779 = vst [vmem:[#allocation70_spill] sm:$0xff] %v8605_v43  ;;  %v3293_v31 = vpop.f32.mrf.mxu1  ;;  %v3101_v22 = vadd.f32 %v3100_v55, %v8411_v58  ;;  %4782 = vmatprep.mubr.bf16.mxu0 %v8335_v3  ;;  %5097 = vmatpush2.bf16.msra.mxu0 %v7657_v25  ;;  %v7666_v55 = vld [vmem:[#allocation8 + $0x168] ss:$16 sps:$4 sm:$0xff]   ;;  %v7674_v3 = vld [vmem:[#allocation8 + $0x14c] ss:$16 sps:$4 sm:$0xff]  }
 0x2a9   :  { %v3102_v9 = vpop.f32.mrf.mxu0  ;;  %5098 = vmatprep.subr.bf16.mxu0 %v7665_v7 }
 0x2aa   :  { %v3295_v8 = vpop.f32.mrf.mxu1  ;;  %v8610_v17 = vadd.f32 %v3293_v31, %v3101_v22  ;;  %v3103_v63 = vadd.f32 %v3102_v9, %v8418_v23 }
 0x2ab   :  { %v3104_v34 = vpop.f32.mrf.mxu0 }
 0x2ac   :  { %v3297_v16 = vpop.f32.mrf.mxu1  ;;  %v8613_v43 = vadd.f32 %v3295_v8, %v3103_v63  ;;  %v3105_v54 = vadd.f32 %v3104_v34, %v8411_v58  ;;  %5099 = vmatpush2.bf16.msra.mxu0 %v7663_v27  ;;  %v7672_v8 = vld [vmem:[#allocation8 + $0x148] ss:$16 sps:$4 sm:$0xff]   ;;  %v7677_v34 = vld [vmem:[#allocation8 + $0x12c] ss:$16 sps:$4 sm:$0xff]  }
 0x2ad   :  { %v8616_v36 = vpop.f32.mrf.mxu0  ;;  %5100 = vmatprep.subr.bf16.mxu0 %v7668_v39 }
 0x2ae   :  { %9780 = vst [vmem:[#allocation71_spill] sm:$0xff] %v8613_v43  ;;  %v8618_v25 = vpop.f32.mrf.mxu1  ;;  %v8620_v7 = vadd.f32 %v3297_v16, %v3105_v54 }
 0x2af   :  { %9781 = vst [vmem:[#allocation72_spill] sm:$0xff] %v8618_v25  ;;  %v3110_v31 = vpop.f32.mrf.mxu0  ;;  %4783 = vmatmul.mubr.bf16.gmra.mxu0 %v8331_v44 }
 0x2b0   :  { %9782 = vst [vmem:[#allocation73_spill] sm:$0xff] %v8620_v7  ;;  %v3303_v22 = vpop.f32.mrf.mxu1  ;;  %v3111_v9 = vadd.f32 %v3110_v31, %v8411_v58  ;;  %4792 = vmatprep.mubr.bf16.mxu0 %v8344_v0  ;;  %5101 = vmatpush2.bf16.msra.mxu0 %v7666_v55  ;;  %v7675_v31 = vld [vmem:[#allocation8 + $0x128] ss:$16 sps:$4 sm:$0xff]   ;;  %v7683_v0 = vld [vmem:[#allocation8 + $0x10c] ss:$16 sps:$4 sm:$0xff]  }
 0x2b1   :  { %v3112_v27 = vpop.f32.mrf.mxu0  ;;  %5102 = vmatprep.subr.bf16.mxu0 %v7674_v3 }
 0x2b2   :  { %v3305_v63 = vpop.f32.mrf.mxu1  ;;  %v8625_v43 = vadd.f32 %v3303_v22, %v3111_v9  ;;  %v3113_v39 = vadd.f32 %v3112_v27, %v8418_v23 }
 0x2b3   :  { %v3114_v54 = vpop.f32.mrf.mxu0 }
 0x2b4   :  { %v3307_v16 = vpop.f32.mrf.mxu1  ;;  %v8628_v7 = vadd.f32 %v3305_v63, %v3113_v39  ;;  %v3115_v44 = vadd.f32 %v3114_v54, %v8411_v58  ;;  %5103 = vmatpush2.bf16.msra.mxu0 %v7672_v8  ;;  %v7681_v63 = vld [vmem:[#allocation8 + $0x108] ss:$16 sps:$4 sm:$0xff]  }
 0x2b5   :  { %v8631_v25 = vpop.f32.mrf.mxu0  ;;  %5104 = vmatprep.subr.bf16.mxu0 %v7677_v34 }
 0x2b6   :  { %9783 = vst [vmem:[#allocation74_spill] sm:$0xff] %v8628_v7  ;;  %v8633_v55 = vpop.f32.mrf.mxu1  ;;  %v8635_v3 = vadd.f32 %v3307_v16, %v3115_v44 }
 0x2b7   :  { %9784 = vst [vmem:[#allocation75_spill] sm:$0xff] %v8633_v55  ;;  %v3120_v22 = vpop.f32.mrf.mxu0  ;;  %4793 = vmatmul.mubr.bf16.gmra.mxu0 %v8340_v61 }
 0x2b8   :  { %9785 = vst [vmem:[#allocation76_spill] sm:$0xff] %v8635_v3  ;;  %v3313_v9 = vpop.f32.mrf.mxu1  ;;  %v3121_v27 = vadd.f32 %v3120_v22, %v8411_v58  ;;  %4802 = vmatprep.mubr.bf16.mxu0 %v8353_v30  ;;  %5105 = vmatpush2.bf16.msra.mxu0 %v7675_v31 }
 0x2b9   :  { %v3122_v8 = vpop.f32.mrf.mxu0  ;;  %5106 = vmatprep.subr.bf16.mxu0 %v7683_v0 }
 0x2ba   :  { %v3315_v39 = vpop.f32.mrf.mxu1  ;;  %v8640_v54 = vadd.f32 %v3313_v9, %v3121_v27  ;;  %v3123_v34 = vadd.f32 %v3122_v8, %v8418_v23 }
 0x2bb   :  { %v3124_v55 = vpop.f32.mrf.mxu0 }
 0x2bc   :  { %v3317_v44 = vpop.f32.mrf.mxu1  ;;  %v8643_v16 = vadd.f32 %v3315_v39, %v3123_v34  ;;  %v3125_v3 = vadd.f32 %v3124_v55, %v8411_v58  ;;  %5107 = vmatpush2.bf16.msra.mxu0 %v7681_v63 }
 0x2bd   :  { %v8646_v61 = vpop.f32.mrf.mxu0 }
 0x2be   :  { %9786 = vst [vmem:[#allocation77_spill] sm:$0xff] %v8643_v16  ;;  %v8648_v22 = vpop.f32.mrf.mxu1  ;;  %v8650_v31 = vadd.f32 %v3317_v44, %v3125_v3 }
 0x2bf   :  { %9787 = vst [vmem:[#allocation78_spill] sm:$0xff] %v8648_v22  ;;  %v3356_v30 = vpop.f32.mrf.mxu0  ;;  %4803 = vmatmul.mubr.bf16.gmra.mxu0 %v8349_v46 }
 0x2c0   :  { %9788 = vst [vmem:[#allocation79_spill] sm:$0xff] %v8650_v31  ;;  %v3549_v7 = vpop.f32.mrf.mxu1  ;;  %v3357_v0 = vadd.f32 %v3356_v30, %v8424_v11  ;;  %4812 = vmatprep.mubr.bf16.mxu0 %v8362_v13 }
 0x2c1   :  { %v3358_v9 = vpop.f32.mrf.mxu0 }
 0x2c2   :  { %v3551_v27 = vpop.f32.mrf.mxu1  ;;  %v3359_v8 = vadd.f32 %v3358_v9, %v8427_v10  ;;  %v3550_v63 = vadd.f32 %v3549_v7, %v3357_v0 }
 0x2c3   :  { %v3360_v58 = vpop.f32.mrf.mxu0 }
 0x2c4   :  { %v3553_v55 = vpop.f32.mrf.mxu1  ;;  %v3361_v39 = vadd.f32 %v3360_v58, %v8432_v20  ;;  %v3552_v44 = vadd.f32 %v3551_v27, %v3359_v8  ;;  %v3710_v30 = vmax.f32 %v3550_v63, 0.0 }
 0x2c5   :  { %v3362_v34 = vpop.f32.mrf.mxu0 }
 0x2c6   :  { %v3555_v3 = vpop.f32.mrf.mxu1  ;;  %v3554_v31 = vadd.f32 %v3553_v55, %v3361_v39  ;;  %v3363_v22 = vadd.f32 %v3362_v34, %v8435_v14  ;;  %v3711_v20 = vmax.f32 %v3552_v44, 0.0 }
 0x2c7   :  { %v3366_v46 = vpop.f32.mrf.mxu0  ;;  %4813 = vmatmul.mubr.bf16.gmra.mxu0 %v8358_v45 }
 0x2c8   :  { %v3559_v16 = vpop.f32.mrf.mxu1  ;;  %v3714_v11 = vmax.f32 %v3554_v31, 0.0  ;;  %v3556_v13 = vadd.f32 %v3555_v3, %v3363_v22  ;;  %v3367_v10 = vadd.f32 %v3366_v46, %v8439_v1  ;;  %4822 = vmatprep.mubr.bf16.mxu0 %v8371_v53  ;;  %v7633_v22 = vld [vmem:[#allocation8 + $0x2e8] ss:$16 sps:$4 sm:$0xff]   ;;  %v7644_v1 = vld [vmem:[#allocation8 + $0x2cc] ss:$16 sps:$4 sm:$0xff]  }
 0x2c9   :  { %v3368_v7 = vpop.f32.mrf.mxu0 }
 0x2ca   :  { %v3561_v0 = vpop.f32.mrf.mxu1  ;;  %v8661_v9 = vpack.c.bf16 %v3714_v11, %v3710_v30  ;;  %v3715_v27 = vmax.f32 %v3556_v13, 0.0  ;;  %v3369_v8 = vadd.f32 %v3368_v7, %v8442_v24  ;;  %v3560_v55 = vadd.f32 %v3559_v16, %v3367_v10  ;;  %v7642_v10 = vld [vmem:[#allocation8 + $0x2c8] ss:$16 sps:$4 sm:$0xff]  }
 0x2cb   :  { %v3370_v14 = vpop.f32.mrf.mxu0 }
 0x2cc   :  { %v3563_v58 = vpop.f32.mrf.mxu1  ;;  %v3371_v39 = vadd.f32 %v3370_v14, %v8445_v40  ;;  %v8665_v63 = vpack.c.bf16 %v3715_v27, %v3711_v20  ;;  %v3562_v34 = vadd.f32 %v3561_v0, %v3369_v8  ;;  %v3718_v24 = vmax.f32 %v3560_v55, 0.0 }
 0x2cd   :  { %v3372_v31 = vpop.f32.mrf.mxu0 }
 0x2ce   :  { %v3565_v46 = vpop.f32.mrf.mxu1  ;;  %v3564_v3 = vadd.f32 %v3563_v58, %v3371_v39  ;;  %v3373_v44 = vadd.f32 %v3372_v31, %v8448_v15  ;;  %4915 = vmatprep.mubr.bf16.mxu1 %v8665_v63  ;;  %v7653_v15 = vld [vmem:[#allocation8 + $0x2ac] ss:$16 sps:$4 sm:$0xff]   ;;  %v3719_v20 = vmax.f32 %v3562_v34, 0.0 }
 0x2cf   :  { %v3376_v13 = vpop.f32.mrf.mxu0  ;;  %4823 = vmatmul.mubr.bf16.gmra.mxu0 %v8367_v6  ;;  %4916 = vmatmul.mubr.bf16.vlgmr.msra.gmra.mxu1 %v8661_v9 }
 0x2d0   :  { %v3569_v30 = vpop.f32.mrf.mxu1  ;;  %v3722_v40 = vmax.f32 %v3564_v3, 0.0  ;;  %v3566_v16 = vadd.f32 %v3565_v46, %v3373_v44  ;;  %v3377_v11 = vadd.f32 %v3376_v13, %v8452_v4  ;;  %4832 = vmatprep.mubr.bf16.mxu0 %v8380_v26  ;;  %5270 = vmatpush1.bf16.msra.mxu1 %v7633_v22  ;;  %v7651_v22 = vld [vmem:[#allocation8 + $0x2a8] ss:$16 sps:$4 sm:$0xff]  }
 0x2d1   :  { %v3378_v7 = vpop.f32.mrf.mxu0  ;;  %5271 = vmatprep.subr.bf16.mxu1 %v7644_v1  ;;  %v7662_v1 = vld [vmem:[#allocation8 + $0x28c] ss:$16 sps:$4 sm:$0xff]  }
 0x2d2   :  { %v3571_v0 = vpop.f32.mrf.mxu1  ;;  %v8673_v27 = vpack.c.bf16 %v3722_v40, %v3718_v24  ;;  %v3723_v8 = vmax.f32 %v3566_v16, 0.0  ;;  %v3379_v14 = vadd.f32 %v3378_v7, %v8455_v38  ;;  %v3570_v39 = vadd.f32 %v3569_v30, %v3377_v11  ;;  %v7660_v11 = vld [vmem:[#allocation8 + $0x288] ss:$16 sps:$4 sm:$0xff]  }
 0x2d3   :  { %v3380_v58 = vpop.f32.mrf.mxu0 }
 0x2d4   :  { %v3573_v55 = vpop.f32.mrf.mxu1  ;;  %v3381_v31 = vadd.f32 %v3380_v58, %v8458_v37  ;;  %v8677_v4 = vpack.c.bf16 %v3723_v8, %v3719_v20  ;;  %5272 = vmatpush1.bf16.msra.mxu1 %v7642_v10  ;;  %v3572_v44 = vadd.f32 %v3571_v0, %v3379_v14  ;;  %v3726_v37 = vmax.f32 %v3570_v39, 0.0 }
 0x2d5   :  { %v3382_v46 = vpop.f32.mrf.mxu0  ;;  %5273 = vmatprep.subr.bf16.mxu1 %v7653_v15 }
 0x2d6   :  { %v3575_v3 = vpop.f32.mrf.mxu1  ;;  %v3574_v34 = vadd.f32 %v3573_v55, %v3381_v31  ;;  %v3383_v13 = vadd.f32 %v3382_v46, %v8461_v52  ;;  %4925 = vmatprep.mubr.bf16.mxu1 %v8677_v4  ;;  %v7671_v52 = vld [vmem:[#allocation8 + $0x26c] ss:$16 sps:$4 sm:$0xff]   ;;  %v3727_v0 = vmax.f32 %v3572_v44, 0.0  ;;  %v7669_v31 = vld [vmem:[#allocation8 + $0x268] ss:$16 sps:$4 sm:$0xff]  }
 0x2d7   :  { %v3386_v38 = vpop.f32.mrf.mxu0  ;;  %4833 = vmatmul.mubr.bf16.gmra.mxu0 %v8376_v60  ;;  %4926 = vmatmul.mubr.bf16.gmra.mxu1 %v8673_v27 }
 0x2d8   :  { %v3579_v24 = vpop.f32.mrf.mxu1  ;;  %v3730_v30 = vmax.f32 %v3574_v34, 0.0  ;;  %v3576_v40 = vadd.f32 %v3575_v3, %v3383_v13  ;;  %v3387_v16 = vadd.f32 %v3386_v38, %v8465_v18  ;;  %4842 = vmatprep.mubr.bf16.mxu0 %v8389_v28  ;;  %5274 = vmatpush1.bf16.msra.mxu1 %v7651_v22  ;;  %v7680_v3 = vld [vmem:[#allocation8 + $0x24c] ss:$16 sps:$4 sm:$0xff]  }
 0x2d9   :  { %v3388_v10 = vpop.f32.mrf.mxu0  ;;  %5275 = vmatprep.subr.bf16.mxu1 %v7662_v1 }
 0x2da   :  { %v3581_v7 = vpop.f32.mrf.mxu1  ;;  %v8685_v15 = vpack.c.bf16 %v3730_v30, %v3726_v37  ;;  %v3731_v20 = vmax.f32 %v3576_v40, 0.0  ;;  %v3389_v8 = vadd.f32 %v3388_v10, %v8468_v21  ;;  %v3580_v55 = vadd.f32 %v3579_v24, %v3387_v16 }
 0x2db   :  { %v3390_v14 = vpop.f32.mrf.mxu0  ;;  %v3017_v21 = vadd.f32 %v8484_v59, %v8418_v23 }
 0x2dc   :  { %v3583_v58 = vpop.f32.mrf.mxu1  ;;  %v3391_v39 = vadd.f32 %v3390_v14, %v8471_v49  ;;  %v8689_v18 = vpack.c.bf16 %v3731_v20, %v3727_v0  ;;  %5276 = vmatpush1.bf16.msra.mxu1 %v7660_v11  ;;  %v3582_v1 = vadd.f32 %v3581_v7, %v3389_v8  ;;  %v3734_v49 = vmax.f32 %v3580_v55, 0.0  ;;  %v7686_v11 = vld [vmem:[#allocation8 + $0x22c] ss:$16 sps:$4 sm:$0xff]  }
 0x2dd   :  { %v3392_v22 = vpop.f32.mrf.mxu0  ;;  %5277 = vmatprep.subr.bf16.mxu1 %v7671_v52  ;;  %v9789_v52 = vld [vmem:[#allocation22_spill] sm:$0xff]  ;;  %v9790_v14 = vld [vmem:[#allocation23_spill] sm:$0xff] }
 0x2de   :  { %v3585_v46 = vpop.f32.mrf.mxu1  ;;  %v3584_v44 = vadd.f32 %v3583_v58, %v3391_v39  ;;  %v3393_v34 = vadd.f32 %v3392_v22, %v8474_v12  ;;  %4935 = vmatprep.mubr.bf16.mxu1 %v8689_v18  ;;  %v7678_v12 = vld [vmem:[#allocation8 + $0x248] ss:$16 sps:$4 sm:$0xff]   ;;  %v3735_v59 = vmax.f32 %v3582_v1, 0.0  ;;  %v3210_v58 = vadd.f32 %v9790_v14, %v3017_v21  ;;  %v7689_v1 = vld [vmem:[#allocation8 + $0x20c] ss:$16 sps:$4 sm:$0xff]   ;;  %v9796_v14 = vld [vmem:[#allocation26_spill] sm:$0xff] }
 0x2df   :  { %v3396_v13 = vpop.f32.mrf.mxu0  ;;  %4843 = vmatmul.mubr.bf16.gmra.mxu0 %v8385_v32  ;;  %4936 = vmatmul.mubr.bf16.gmra.mxu1 %v8685_v15 }
 0x2e0   :  { %v3589_v38 = vpop.f32.mrf.mxu1  ;;  %v3738_v24 = vmax.f32 %v3584_v44, 0.0  ;;  %v3586_v37 = vadd.f32 %v3585_v46, %v3393_v34  ;;  %v3397_v30 = vadd.f32 %v3396_v13, %v8478_v19  ;;  %4852 = vmatprep.mubr.bf16.mxu0 %v8398_v35  ;;  %5278 = vmatpush1.bf16.msra.mxu1 %v7669_v31  ;;  %v9791_v19 = vld [vmem:[#allocation24_spill] sm:$0xff]  ;;  %v7684_v31 = vld [vmem:[#allocation8 + $0x228] ss:$16 sps:$4 sm:$0xff]  }
 0x2e1   :  { %v3398_v40 = vpop.f32.mrf.mxu0  ;;  %5279 = vmatprep.subr.bf16.mxu1 %v7680_v3 }
 0x2e2   :  { %v3591_v16 = vpop.f32.mrf.mxu1  ;;  %v8699_v10 = vpack.c.bf16 %v3738_v24, %v3734_v49  ;;  %v3739_v7 = vmax.f32 %v3586_v37, 0.0  ;;  %v3399_v0 = vadd.f32 %v3398_v40, %v9789_v52  ;;  %v3590_v55 = vadd.f32 %v3589_v38, %v3397_v30  ;;  %v9792_v24 = vld [vmem:[#allocation17_spill] sm:$0xff] }
 0x2e3   :  { %v3400_v20 = vpop.f32.mrf.mxu0  ;;  %v3027_v49 = vadd.f32 %v8498_v29, %v8418_v23  ;;  %v9793_v40 = vld [vmem:[#allocation25_spill] sm:$0xff] }
 0x2e4   :  { %v3593_v8 = vpop.f32.mrf.mxu1  ;;  %v3401_v39 = vadd.f32 %v3400_v20, %v9791_v19  ;;  %v8704_v22 = vpack.c.bf16 %v3739_v7, %v3735_v59  ;;  %5280 = vmatpush1.bf16.msra.mxu1 %v7678_v12  ;;  %v3592_v44 = vadd.f32 %v3591_v16, %v3399_v0  ;;  %v3742_v37 = vmax.f32 %v3590_v55, 0.0  ;;  %v9794_v59 = vld [vmem:[#allocation19_spill] sm:$0xff] }
 0x2e5   :  { %v3402_v46 = vpop.f32.mrf.mxu0  ;;  %5281 = vmatprep.subr.bf16.mxu1 %v7686_v11  ;;  %v7687_v16 = vld [vmem:[#allocation8 + $0x208] ss:$16 sps:$4 sm:$0xff]   ;;  %v7692_v0 = vld [vmem:[#allocation8 + $0x3ec] ss:$16 sps:$4 sm:$0xff]  }
 0x2e6   :  { %v3595_v3 = vpop.f32.mrf.mxu1  ;;  %v3594_v34 = vadd.f32 %v3593_v8, %v3401_v39  ;;  %v3403_v13 = vadd.f32 %v3402_v46, %v3210_v58  ;;  %4945 = vmatprep.mubr.bf16.mxu1 %v8704_v22  ;;  %v3743_v29 = vmax.f32 %v3592_v44, 0.0  ;;  %v9797_v39 = vld [vmem:[#allocation27_spill] sm:$0xff] }
 0x2e7   :  { %v3406_v21 = vpop.f32.mrf.mxu0  ;;  %4853 = vmatmul.mubr.bf16.gmra.mxu0 %v9792_v24  ;;  %4946 = vmatmul.mubr.bf16.gmra.mxu1 %v8699_v10  ;;  %v3220_v46 = vadd.f32 %v9797_v39, %v3027_v49  ;;  %v7695_v44 = vld [vmem:[#allocation8 + $0x3cc] ss:$16 sps:$4 sm:$0xff]  }
 0x2e8   :  { %v3599_v38 = vpop.f32.mrf.mxu1  ;;  %v3746_v30 = vmax.f32 %v3594_v34, 0.0  ;;  %v3596_v12 = vadd.f32 %v3595_v3, %v3403_v13  ;;  %v3407_v11 = vadd.f32 %v3406_v21, %v9793_v40  ;;  %4862 = vmatprep.mubr.bf16.mxu0 %v9794_v59  ;;  %5282 = vmatpush1.bf16.msra.mxu1 %v7684_v31  ;;  %v9798_v34 = vld [vmem:[#allocation28_spill] sm:$0xff]  ;;  %v7690_v31 = vld [vmem:[#allocation8 + $0x3e8] ss:$16 sps:$4 sm:$0xff]  }
 0x2e9   :  { %v3408_v7 = vpop.f32.mrf.mxu0  ;;  %5283 = vmatprep.subr.bf16.mxu1 %v7689_v1  ;;  %v9803_v39 = vld [vmem:[#allocation21_spill] sm:$0xff] }
 0x2ea   :  { %v3601_v52 = vpop.f32.mrf.mxu1  ;;  %v8713_v20 = vpack.c.bf16 %v3746_v30, %v3742_v37  ;;  %v3747_v8 = vmax.f32 %v3596_v12, 0.0  ;;  %v3409_v58 = vadd.f32 %v3408_v7, %v9796_v14  ;;  %v3600_v3 = vadd.f32 %v3599_v38, %v3407_v11  ;;  %v9800_v7 = vld [vmem:[#allocation31_spill] sm:$0xff]  ;;  %v9801_v11 = vld [vmem:[#allocation18_spill] sm:$0xff] }
 0x2eb   :  { %v3410_v19 = vpop.f32.mrf.mxu0  ;;  %v3037_v14 = vadd.f32 %v9800_v7, %v8418_v23  ;;  %v9805_v7 = vld [vmem:[#allocation30_spill] sm:$0xff] }
 0x2ec   :  { %9795 = vst [vmem:[#allocation22_spill] sm:$0xff] %v8713_v20  ;;  %v3603_v55 = vpop.f32.mrf.mxu1  ;;  %v3411_v13 = vadd.f32 %v3410_v19, %v9798_v34  ;;  %v8718_v21 = vpack.c.bf16 %v3747_v8, %v3743_v29  ;;  %5284 = vmatpush1.bf16.msra.mxu1 %v7687_v16  ;;  %v3602_v37 = vadd.f32 %v3601_v52, %v3409_v58  ;;  %v3750_v16 = vmax.f32 %v3600_v3, 0.0  ;;  %v9802_v19 = vld [vmem:[#allocation29_spill] sm:$0xff] }
 0x2ed   :  { %v3412_v40 = vpop.f32.mrf.mxu0  ;;  %5285 = vmatprep.subr.bf16.mxu1 %v7692_v0  ;;  %v7693_v52 = vld [vmem:[#allocation8 + $0x3c8] ss:$16 sps:$4 sm:$0xff]  }
 0x2ee   :  { %9799 = vst [vmem:[#allocation23_spill] sm:$0xff] %v8718_v21  ;;  %v3605_v1 = vpop.f32.mrf.mxu1  ;;  %v3604_v30 = vadd.f32 %v3603_v55, %v3411_v13  ;;  %v3413_v12 = vadd.f32 %v3412_v40, %v3220_v46  ;;  %4955 = vmatprep.mubr.bf16.mxu1 %v8718_v21  ;;  %v7698_v46 = vld [vmem:[#allocation8 + $0x3ac] ss:$16 sps:$4 sm:$0xff]   ;;  %v3751_v34 = vmax.f32 %v3602_v37, 0.0 }
 0x2ef   :  { %v3416_v49 = vpop.f32.mrf.mxu0  ;;  %4863 = vmatmul.mubr.bf16.gmra.mxu0 %v9801_v11  ;;  %4956 = vmatmul.mubr.bf16.gmra.mxu1 %v8713_v20  ;;  %v7701_v37 = vld [vmem:[#allocation8 + $0x38c] ss:$16 sps:$4 sm:$0xff]  }
 0x2f0   :  { %v3609_v38 = vpop.f32.mrf.mxu1  ;;  %v3754_v29 = vmax.f32 %v3604_v30, 0.0  ;;  %v3606_v8 = vadd.f32 %v3605_v1, %v3413_v12  ;;  %v3417_v0 = vadd.f32 %v3416_v49, %v9802_v19  ;;  %4872 = vmatprep.mubr.bf16.mxu0 %v9803_v39  ;;  %5286 = vmatpush2.bf16.msra.mxu1 %v7690_v31  ;;  %v9806_v30 = vld [vmem:[#allocation32_spill] sm:$0xff]  ;;  %v9807_v49 = vld [vmem:[#allocation33_spill] sm:$0xff] }
 0x2f1   :  { %v3418_v58 = vpop.f32.mrf.mxu0  ;;  %5287 = vmatprep.subr.bf16.mxu1 %v7695_v44  ;;  %v3230_v1 = vadd.f32 %v9806_v30, %v3037_v14  ;;  %v7696_v31 = vld [vmem:[#allocation8 + $0x3a8] ss:$16 sps:$4 sm:$0xff]  }
 0x2f2   :  { %v3611_v55 = vpop.f32.mrf.mxu1  ;;  %v8727_v13 = vpack.c.bf16 %v3754_v29, %v3750_v16  ;;  %v3755_v40 = vmax.f32 %v3606_v8, 0.0  ;;  %v3419_v11 = vadd.f32 %v3418_v58, %v9805_v7  ;;  %v3610_v12 = vadd.f32 %v3609_v38, %v3417_v0  ;;  %v9808_v0 = vld [vmem:[#allocation20_spill] sm:$0xff]  ;;  %v7704_v7 = vld [vmem:[#allocation8 + $0x36c] ss:$16 sps:$4 sm:$0xff]  }
 0x2f3   :  { %v3420_v20 = vpop.f32.mrf.mxu0  ;;  %v3047_v58 = vadd.f32 %v8526_v41, %v8418_v23 }
 0x2f4   :  { %9804 = vst [vmem:[#allocation24_spill] sm:$0xff] %v8727_v13  ;;  %v3613_v3 = vpop.f32.mrf.mxu1  ;;  %v3421_v19 = vadd.f32 %v3420_v20, %v9807_v49  ;;  %v8732_v39 = vpack.c.bf16 %v3755_v40, %v3751_v34  ;;  %5288 = vmatpush2.bf16.msra.mxu1 %v7693_v52  ;;  %v3612_v16 = vadd.f32 %v3611_v55, %v3419_v11  ;;  %v3758_v20 = vmax.f32 %v3610_v12, 0.0  ;;  %v9809_v40 = vld [vmem:[#allocation36_spill] sm:$0xff] }
 0x2f5   :  { %v3422_v21 = vpop.f32.mrf.mxu0  ;;  %5289 = vmatprep.subr.bf16.mxu1 %v7698_v46 }
 0x2f6   :  { %v3615_v44 = vpop.f32.mrf.mxu1  ;;  %v3614_v29 = vadd.f32 %v3613_v3, %v3421_v19  ;;  %v3423_v8 = vadd.f32 %v3422_v21, %v3230_v1  ;;  %4965 = vmatprep.mubr.bf16.mxu1 %v8732_v39  ;;  %v7699_v21 = vld [vmem:[#allocation8 + $0x388] ss:$16 sps:$4 sm:$0xff]   ;;  %v3759_v41 = vmax.f32 %v3612_v16, 0.0  ;;  %v9811_v1 = vld [vmem:[#allocation34_spill] sm:$0xff]  ;;  %v7707_v16 = vld [vmem:[#allocation8 + $0x34c] ss:$16 sps:$4 sm:$0xff]  }
 0x2f7   :  { %v3426_v14 = vpop.f32.mrf.mxu0  ;;  %4873 = vmatmul.mubr.bf16.gmra.mxu0 %v9808_v0  ;;  %4966 = vmatmul.mubr.bf16.gmra.mxu1 %v8727_v13  ;;  %v7702_v13 = vld [vmem:[#allocation8 + $0x368] ss:$16 sps:$4 sm:$0xff]  }
 0x2f8   :  { %v3619_v38 = vpop.f32.mrf.mxu1  ;;  %v3762_v52 = vmax.f32 %v3614_v29, 0.0  ;;  %v3616_v34 = vadd.f32 %v3615_v44, %v3423_v8  ;;  %v3427_v46 = vadd.f32 %v3426_v14, %v8520_v51  ;;  %5108 = vmatprep.mubr.bf16.mxu0 %v9809_v40  ;;  %5290 = vmatpush2.bf16.msra.mxu1 %v7696_v31  ;;  %v7714_v29 = vld [vmem:[#allocation10 + $0x78] sm:$0xff]   ;;  %v9812_v44 = vld [vmem:[#allocation54_spill] sm:$0xff] }
 0x2f9   :  { %v3428_v11 = vpop.f32.mrf.mxu0  ;;  %5291 = vmatprep.subr.bf16.mxu1 %v7701_v37  ;;  %v3240_v8 = vadd.f32 %v9812_v44, %v3047_v58  ;;  %v9813_v14 = vld [vmem:[#allocation55_spill] sm:$0xff]  ;;  %6787 = vmatprep.subr.bf16.mxu0 %v7714_v29  ;;  %v3057_v58 = vadd.f32 %v8541_v50, %v8418_v23  ;;  %v7717_v44 = vld [vmem:[#allocation10 + $0x30] sm:$0xff]  }
 0x2fa   :  { %v3621_v55 = vpop.f32.mrf.mxu1  ;;  %v8741_v3 = vpack.c.bf16 %v3762_v52, %v3758_v20  ;;  %v3763_v30 = vmax.f32 %v3616_v34, 0.0  ;;  %v3429_v49 = vadd.f32 %v3428_v11, %v9811_v1  ;;  %v3620_v51 = vadd.f32 %v3619_v38, %v3427_v46  ;;  %v7715_v20 = vld [vmem:[#allocation10 + $0x38] sm:$0xff]  }
 0x2fb   :  { %v3430_v19 = vpop.f32.mrf.mxu0  ;;  %v7710_v50 = vld [vmem:[#allocation8 + $0x32c] ss:$16 sps:$4 sm:$0xff]  }
 0x2fc   :  { %9810 = vst [vmem:[#allocation17_spill] sm:$0xff] %v8741_v3  ;;  %v3623_v12 = vpop.f32.mrf.mxu1  ;;  %v3431_v40 = vadd.f32 %v3430_v19, %v9813_v14  ;;  %v8746_v31 = vpack.c.bf16 %v3763_v30, %v3759_v41  ;;  %5292 = vmatpush2.bf16.msra.mxu1 %v7699_v21  ;;  %v3622_v52 = vadd.f32 %v3621_v55, %v3429_v49  ;;  %v9814_v21 = vld [vmem:[#allocation35_spill] sm:$0xff]  ;;  %v7716_v41 = vld [vmem:[#allocation10 + $0x70] sm:$0xff]   ;;  %v3766_v30 = vmax.f32 %v3620_v51, 0.0 }
 0x2fd   :  { %v3432_v37 = vpop.f32.mrf.mxu0  ;;  %5293 = vmatprep.subr.bf16.mxu1 %v7704_v7  ;;  %v9815_v55 = vld [vmem:[#allocation38_spill] sm:$0xff]  ;;  %v7705_v49 = vld [vmem:[#allocation8 + $0x348] ss:$16 sps:$4 sm:$0xff]  }
 0x2fe   :  { %v3625_v0 = vpop.f32.mrf.mxu1  ;;  %v3624_v34 = vadd.f32 %v3623_v12, %v3431_v40  ;;  %v3433_v11 = vadd.f32 %v3432_v37, %v3240_v8  ;;  %4975 = vmatprep.mubr.bf16.mxu1 %v8746_v31  ;;  %v3767_v8 = vmax.f32 %v3622_v52, 0.0  ;;  %v9816_v37 = vld [vmem:[#allocation56_spill] sm:$0xff] }
 0x2ff   :  { %v3436_v38 = vpop.f32.mrf.mxu0  ;;  %4976 = vmatmul.mubr.bf16.gmra.mxu1 %v8741_v3  ;;  %5109 = vmatmul.mubr.bf16.vlgmr.msra.gmra.mxu0 %v9814_v21  ;;  %v9818_v21 = vld [vmem:[#allocation58_spill] sm:$0xff] }
 0x300   :  { %v3629_v46 = vpop.f32.mrf.mxu1  ;;  %v3770_v7 = vmax.f32 %v3624_v34, 0.0  ;;  %v3626_v1 = vadd.f32 %v3625_v0, %v3433_v11  ;;  %v3437_v19 = vadd.f32 %v3436_v38, %v8535_v56  ;;  %5118 = vmatprep.mubr.bf16.mxu0 %v9815_v55  ;;  %5294 = vmatpush2.bf16.msra.mxu1 %v7702_v13  ;;  %v7718_v56 = vld [vmem:[#allocation10 + $0x68] sm:$0xff]  }
 0x301   :  { %v3438_v12 = vpop.f32.mrf.mxu0  ;;  %5295 = vmatprep.subr.bf16.mxu1 %v7707_v16  ;;  %6788 = vmatpush3.bf16.msra.mxu0 %v7715_v20  ;;  %v9817_v11 = vld [vmem:[#allocation57_spill] sm:$0xff] }
 0x302   :  { %v3631_v29 = vpop.f32.mrf.mxu1  ;;  %v8755_v14 = vpack.c.bf16 %v3770_v7, %v3766_v30  ;;  %v3771_v40 = vmax.f32 %v3626_v1, 0.0  ;;  %v3439_v51 = vadd.f32 %v3438_v12, %v9816_v37  ;;  %6789 = vmatprep.subr.bf16.mxu0 %v7716_v41  ;;  %v3250_v38 = vadd.f32 %v9817_v11, %v3057_v58  ;;  %v7708_v16 = vld [vmem:[#allocation8 + $0x328] ss:$16 sps:$4 sm:$0xff]   ;;  %v7713_v30 = vld [vmem:[#allocation8 + $0x30c] ss:$16 sps:$4 sm:$0xff]   ;;  %v9820_v37 = vld [vmem:[#allocation40_spill] sm:$0xff] }
 0x303   :  { %v3440_v0 = vpop.f32.mrf.mxu0  ;;  %v3630_v13 = vadd.f32 %v3629_v46, %v3437_v19  ;;  %v7719_v7 = vld [vmem:[#allocation10 + $0x28] sm:$0xff]   ;;  %v3067_v58 = vadd.f32 %v8556_v57, %v8418_v23  ;;  %v7721_v57 = vld [vmem:[#allocation10 + $0x20] sm:$0xff]  }
 0x304   :  { %v3633_v34 = vpop.f32.mrf.mxu1  ;;  %v3441_v55 = vadd.f32 %v3440_v0, %v9818_v21  ;;  %v8760_v3 = vpack.c.bf16 %v3771_v40, %v3767_v8  ;;  %5296 = vmatpush2.bf16.msra.mxu1 %v7705_v49  ;;  %v3632_v1 = vadd.f32 %v3631_v29, %v3439_v51  ;;  %v9819_v49 = vld [vmem:[#allocation37_spill] sm:$0xff]  ;;  %v7720_v8 = vld [vmem:[#allocation10 + $0x60] sm:$0xff]   ;;  %v9821_v21 = vld [vmem:[#allocation59_spill] sm:$0xff] }
 0x305   :  { %v3442_v20 = vpop.f32.mrf.mxu0  ;;  %5297 = vmatprep.subr.bf16.mxu1 %v7710_v50  ;;  %6790 = vmatpush3.bf16.msra.mxu0 %v7717_v44  ;;  %v3774_v50 = vmax.f32 %v3630_v13, 0.0  ;;  %v7711_v51 = vld [vmem:[#allocation8 + $0x308] ss:$16 sps:$4 sm:$0xff]  }
 0x306   :  { %v3635_v52 = vpop.f32.mrf.mxu1  ;;  %v3634_v41 = vadd.f32 %v3633_v34, %v3441_v55  ;;  %v3443_v12 = vadd.f32 %v3442_v20, %v3250_v38  ;;  %4985 = vmatprep.mubr.bf16.mxu1 %v8760_v3  ;;  %6791 = vmatprep.subr.bf16.mxu0 %v7718_v56  ;;  %v3775_v56 = vmax.f32 %v3632_v1, 0.0  ;;  %v7723_v1 = vld [vmem:[#allocation10 + $0x18] sm:$0xff]  }
 0x307   :  { %v3446_v46 = vpop.f32.mrf.mxu0  ;;  %4986 = vmatmul.mubr.bf16.gmra.mxu1 %v8755_v14  ;;  %5119 = vmatmul.mubr.bf16.gmra.mxu0 %v9819_v49 }
 0x308   :  { %v3639_v19 = vpop.f32.mrf.mxu1  ;;  %v3778_v40 = vmax.f32 %v3634_v41, 0.0  ;;  %v3636_v44 = vadd.f32 %v3635_v52, %v3443_v12  ;;  %v3447_v29 = vadd.f32 %v3446_v46, %v8550_v33  ;;  %5128 = vmatprep.mubr.bf16.mxu0 %v9820_v37  ;;  %5298 = vmatpush2.bf16.msra.mxu1 %v7708_v16  ;;  %v7722_v52 = vld [vmem:[#allocation10 + $0x58] sm:$0xff]   ;;  %v9822_v33 = vld [vmem:[#allocation60_spill] sm:$0xff]  ;;  %v9823_v16 = vld [vmem:[#allocation61_spill] sm:$0xff] }
 0x309   :  { %v3448_v0 = vpop.f32.mrf.mxu0  ;;  %5299 = vmatprep.subr.bf16.mxu1 %v7713_v30  ;;  %6792 = vmatpush3.bf16.msra.mxu0 %v7719_v7  ;;  %v3260_v41 = vadd.f32 %v9822_v33, %v3067_v58  ;;  %v7724_v37 = vld [vmem:[#allocation10 + $0x50] sm:$0xff]  }
 0x30a   :  { %v3641_v34 = vpop.f32.mrf.mxu1  ;;  %v8769_v11 = vpack.c.bf16 %v3778_v40, %v3774_v50  ;;  %v3779_v38 = vmax.f32 %v3636_v44, 0.0  ;;  %v3449_v55 = vadd.f32 %v3448_v0, %v9821_v21  ;;  %6793 = vmatprep.subr.bf16.mxu0 %v7720_v8  ;;  %v3640_v12 = vadd.f32 %v3639_v19, %v3447_v29  ;;  %v9824_v29 = vld [vmem:[#allocation39_spill] sm:$0xff] }
 0x30b   :  { %v3450_v13 = vpop.f32.mrf.mxu0  ;;  %v3077_v8 = vadd.f32 %v8571_v42, %v8418_v23 }
 0x30c   :  { %v3643_v20 = vpop.f32.mrf.mxu1  ;;  %v3451_v46 = vadd.f32 %v3450_v13, %v9823_v16  ;;  %v8774_v49 = vpack.c.bf16 %v3779_v38, %v3775_v56  ;;  %5300 = vmatpush2.bf16.msra.mxu1 %v7711_v51  ;;  %v3642_v50 = vadd.f32 %v3641_v34, %v3449_v55  ;;  %v3782_v51 = vmax.f32 %v3640_v12, 0.0  ;;  %v9825_v56 = vld [vmem:[#allocation42_spill] sm:$0xff]  ;;  %v7726_v12 = vld [vmem:[#allocation10 + $0x48] sm:$0xff]  }
 0x30d   :  { %v3452_v30 = vpop.f32.mrf.mxu0  ;;  %6794 = vmatpush3.bf16.msra.mxu0 %v7721_v57  ;;  %v7725_v55 = vld [vmem:[#allocation10 + $0x10] sm:$0xff]  }
 0x30e   :  { %v3645_v7 = vpop.f32.mrf.mxu1  ;;  %v3644_v40 = vadd.f32 %v3643_v20, %v3451_v46  ;;  %v3453_v44 = vadd.f32 %v3452_v30, %v3260_v41  ;;  %4995 = vmatprep.mubr.bf16.mxu1 %v8774_v49  ;;  %6795 = vmatprep.subr.bf16.mxu0 %v7722_v52  ;;  %v3783_v13 = vmax.f32 %v3642_v50, 0.0  ;;  %v9826_v52 = vld [vmem:[#allocation62_spill] sm:$0xff]  ;;  %v9827_v46 = vld [vmem:[#allocation63_spill] sm:$0xff]  ;;  %v7727_v50 = vld [vmem:[#allocation10 + $0x8] sm:$0xff]  }
 0x30f   :  { %v3456_v58 = vpop.f32.mrf.mxu0  ;;  %4996 = vmatmul.mubr.bf16.gmra.mxu1 %v8769_v11  ;;  %5129 = vmatmul.mubr.bf16.gmra.mxu0 %v9824_v29  ;;  %v3270_v30 = vadd.f32 %v9827_v46, %v3077_v8 }
 0x310   :  { %v3649_v19 = vpop.f32.mrf.mxu1  ;;  %v3786_v0 = vmax.f32 %v3644_v40, 0.0  ;;  %v3646_v57 = vadd.f32 %v3645_v7, %v3453_v44  ;;  %v3457_v34 = vadd.f32 %v3456_v58, %v8565_v2  ;;  %5138 = vmatprep.mubr.bf16.mxu0 %v9825_v56  ;;  %v9828_v2 = vld [vmem:[#allocation64_spill] sm:$0xff] }
 0x311   :  { %v3458_v38 = vpop.f32.mrf.mxu0  ;;  %6796 = vmatpush3.bf16.msra.mxu0 %v7723_v1 }
 0x312   :  { %v3651_v21 = vpop.f32.mrf.mxu1  ;;  %v8783_v42 = vpack.c.bf16 %v3786_v0, %v3782_v51  ;;  %v3787_v20 = vmax.f32 %v3646_v57, 0.0  ;;  %v3459_v33 = vadd.f32 %v3458_v38, %v9826_v52  ;;  %6797 = vmatprep.subr.bf16.mxu0 %v7724_v37  ;;  %v3650_v7 = vadd.f32 %v3649_v19, %v3457_v34  ;;  %v9829_v19 = vld [vmem:[#allocation41_spill] sm:$0xff]  ;;  %v7728_v34 = vld [vmem:[#allocation10 + $0x40] sm:$0xff]  }
 0x313   :  { %v3460_v41 = vpop.f32.mrf.mxu0  ;;  %v3087_v37 = vadd.f32 %v8586_v47, %v8418_v23 }
 0x314   :  { %v3653_v16 = vpop.f32.mrf.mxu1  ;;  %v3461_v40 = vadd.f32 %v3460_v41, %v9828_v2  ;;  %v8788_v44 = vpack.c.bf16 %v3787_v20, %v3783_v13  ;;  %v3652_v29 = vadd.f32 %v3651_v21, %v3459_v33  ;;  %v3790_v56 = vmax.f32 %v3650_v7, 0.0  ;;  %v9830_v13 = vld [vmem:[#allocation44_spill] sm:$0xff]  ;;  %v9832_v7 = vld [vmem:[#allocation66_spill] sm:$0xff] }
 0x315   :  { %v3462_v58 = vpop.f32.mrf.mxu0  ;;  %6798 = vmatpush3.bf16.msra.mxu0 %v7725_v55  ;;  %v7729_v33 = vld [vmem:[#allocation10] sm:$0xff]  }
 0x316   :  { %v3655_v1 = vpop.f32.mrf.mxu1  ;;  %v3654_v51 = vadd.f32 %v3653_v16, %v3461_v40  ;;  %v3463_v0 = vadd.f32 %v3462_v58, %v3270_v30  ;;  %5005 = vmatprep.mubr.bf16.mxu1 %v8788_v44  ;;  %6799 = vmatprep.subr.bf16.mxu0 %v7726_v12  ;;  %v3791_v41 = vmax.f32 %v3652_v29, 0.0  ;;  %v9831_v12 = vld [vmem:[#allocation65_spill] sm:$0xff]  ;;  %v3280_v40 = vadd.f32 %v9832_v7, %v3087_v37  ;;  %v9834_v37 = vld [vmem:[#allocation43_spill] sm:$0xff] }
 0x317   :  { %v3466_v57 = vpop.f32.mrf.mxu0  ;;  %5006 = vmatmul.mubr.bf16.gmra.mxu1 %v8783_v42  ;;  %5139 = vmatmul.mubr.bf16.gmra.mxu0 %v9829_v19 }
 0x318   :  { %v3659_v8 = vpop.f32.mrf.mxu1  ;;  %v3794_v38 = vmax.f32 %v3654_v51, 0.0  ;;  %v3656_v55 = vadd.f32 %v3655_v1, %v3463_v0  ;;  %v3467_v21 = vadd.f32 %v3466_v57, %v8580_v5  ;;  %5148 = vmatprep.mubr.bf16.mxu0 %v9830_v13  ;;  %v9833_v1 = vld [vmem:[#allocation67_spill] sm:$0xff] }
 0x319   :  { %v3468_v20 = vpop.f32.mrf.mxu0  ;;  %6800 = vmatpush3.bf16.msra.mxu0 %v7727_v50 }
 0x31a   :  { %v3661_v52 = vpop.f32.mrf.mxu1  ;;  %v8797_v47 = vpack.c.bf16 %v3794_v38, %v3790_v56  ;;  %v3795_v16 = vmax.f32 %v3656_v55, 0.0  ;;  %v3469_v46 = vadd.f32 %v3468_v20, %v9831_v12  ;;  %6801 = vmatprep.subr.bf16.mxu0 %v7728_v34  ;;  %v3660_v58 = vadd.f32 %v3659_v8, %v3467_v21  ;;  %v9835_v20 = vld [vmem:[#allocation46_spill] sm:$0xff] }
 0x31b   :  { %v3470_v30 = vpop.f32.mrf.mxu0  ;;  %v3097_v34 = vadd.f32 %v8601_v62, %v8418_v23 }
 0x31c   :  { %v3663_v2 = vpop.f32.mrf.mxu1  ;;  %v3471_v5 = vadd.f32 %v3470_v30, %v9833_v1  ;;  %v8802_v51 = vpack.c.bf16 %v3795_v16, %v3791_v41  ;;  %v3662_v50 = vadd.f32 %v3661_v52, %v3469_v46  ;;  %v3798_v8 = vmax.f32 %v3660_v58, 0.0  ;;  %v7730_v52 = vld [vmem:[#allocation10 + $0xf8] sm:$0xff]   ;;  %v9836_v46 = vld [vmem:[#allocation68_spill] sm:$0xff] }
 0x31d   :  { %v3472_v0 = vpop.f32.mrf.mxu0  ;;  %6802 = vmatpush3.bf16.msra.mxu0 %v7729_v33  ;;  %6899 = vmatprep.subr.bf16.mxu1 %v7730_v52  ;;  %v9840_v52 = vld [vmem:[#allocation48_spill] sm:$0xff] }
 0x31e   :  { %v3665_v57 = vpop.f32.mrf.mxu1  ;;  %v3664_v29 = vadd.f32 %v3663_v2, %v3471_v5  ;;  %v3473_v19 = vadd.f32 %v3472_v0, %v3280_v40  ;;  %5015 = vmatprep.mubr.bf16.mxu1 %v8802_v51  ;;  %v3799_v16 = vmax.f32 %v3662_v50, 0.0  ;;  %v9837_v40 = vld [vmem:[#allocation69_spill] sm:$0xff]  ;;  %v9838_v5 = vld [vmem:[#allocation70_spill] sm:$0xff] }
 0x31f   :  { %v3476_v56 = vpop.f32.mrf.mxu0  ;;  %5016 = vmatmul.mubr.bf16.gmra.mxu1 %v8797_v47  ;;  %5149 = vmatmul.mubr.bf16.gmra.mxu0 %v9834_v37  ;;  %v3290_v58 = vadd.f32 %v9837_v40, %v3097_v34  ;;  %v3107_v37 = vadd.f32 %v8616_v36, %v8418_v23  ;;  %v9839_v34 = vld [vmem:[#allocation45_spill] sm:$0xff]  ;;  %v9841_v36 = vld [vmem:[#allocation71_spill] sm:$0xff]  ;;  %v9842_v40 = vld [vmem:[#allocation72_spill] sm:$0xff] }
 0x320   :  { %v3669_v38 = vpop.f32.mrf.mxu1  ;;  %v3802_v55 = vmax.f32 %v3664_v29, 0.0  ;;  %v3666_v21 = vadd.f32 %v3665_v57, %v3473_v19  ;;  %v3477_v13 = vadd.f32 %v3476_v56, %v8595_v48  ;;  %5158 = vmatprep.mubr.bf16.mxu0 %v9835_v20 }
 0x321   :  { %v3478_v33 = vpop.f32.mrf.mxu0 }
 0x322   :  { %v3671_v41 = vpop.f32.mrf.mxu1  ;;  %v8811_v12 = vpack.c.bf16 %v3802_v55, %v3798_v8  ;;  %v3803_v62 = vmax.f32 %v3666_v21, 0.0  ;;  %v3479_v30 = vadd.f32 %v3478_v33, %v9836_v46  ;;  %v3670_v1 = vadd.f32 %v3669_v38, %v3477_v13 }
 0x323   :  { %v3480_v2 = vpop.f32.mrf.mxu0 }
 0x324   :  { %v3673_v7 = vpop.f32.mrf.mxu1  ;;  %v3481_v0 = vadd.f32 %v3480_v2, %v9838_v5  ;;  %v8816_v48 = vpack.c.bf16 %v3803_v62, %v3799_v16  ;;  %v3672_v19 = vadd.f32 %v3671_v41, %v3479_v30  ;;  %v3806_v38 = vmax.f32 %v3670_v1, 0.0  ;;  %v9843_v1 = vld [vmem:[#allocation73_spill] sm:$0xff] }
 0x325   :  { %v3482_v57 = vpop.f32.mrf.mxu0 }
 0x326   :  { %v3675_v29 = vpop.f32.mrf.mxu1  ;;  %v3674_v56 = vadd.f32 %v3673_v7, %v3481_v0  ;;  %v3483_v50 = vadd.f32 %v3482_v57, %v3290_v58  ;;  %5025 = vmatprep.mubr.bf16.mxu1 %v8816_v48  ;;  %v3807_v16 = vmax.f32 %v3672_v19, 0.0  ;;  %v3300_v58 = vadd.f32 %v9842_v40, %v3107_v37  ;;  %v9844_v37 = vld [vmem:[#allocation47_spill] sm:$0xff] }
 0x327   :  { %v3486_v8 = vpop.f32.mrf.mxu0  ;;  %5026 = vmatmul.mubr.bf16.gmra.mxu1 %v8811_v12  ;;  %5159 = vmatmul.mubr.bf16.gmra.mxu0 %v9839_v34  ;;  %v3117_v19 = vadd.f32 %v8631_v25, %v8418_v23  ;;  %v9846_v25 = vld [vmem:[#allocation74_spill] sm:$0xff]  ;;  %v9847_v40 = vld [vmem:[#allocation75_spill] sm:$0xff] }
 0x328   :  { %v3679_v55 = vpop.f32.mrf.mxu1  ;;  %v3810_v21 = vmax.f32 %v3674_v56, 0.0  ;;  %v3676_v13 = vadd.f32 %v3675_v29, %v3483_v50  ;;  %v3487_v20 = vadd.f32 %v3486_v8, %v8610_v17  ;;  %5168 = vmatprep.mubr.bf16.mxu0 %v9840_v52  ;;  %v9845_v52 = vld [vmem:[#allocation50_spill] sm:$0xff] }
 0x329   :  { %v3488_v33 = vpop.f32.mrf.mxu0 }
 0x32a   :  { %v3681_v41 = vpop.f32.mrf.mxu1  ;;  %v8825_v62 = vpack.c.bf16 %v3810_v21, %v3806_v38  ;;  %v3811_v46 = vmax.f32 %v3676_v13, 0.0  ;;  %v3489_v30 = vadd.f32 %v3488_v33, %v9841_v36  ;;  %v3680_v5 = vadd.f32 %v3679_v55, %v3487_v20 }
 0x32b   :  { %v3490_v2 = vpop.f32.mrf.mxu0 }
 0x32c   :  { %v3683_v7 = vpop.f32.mrf.mxu1  ;;  %v3491_v0 = vadd.f32 %v3490_v2, %v9843_v1  ;;  %v8830_v57 = vpack.c.bf16 %v3811_v46, %v3807_v16  ;;  %v3682_v56 = vadd.f32 %v3681_v41, %v3489_v30  ;;  %v3814_v55 = vmax.f32 %v3680_v5, 0.0  ;;  %v9848_v5 = vld [vmem:[#allocation76_spill] sm:$0xff] }
 0x32d   :  { %v3492_v17 = vpop.f32.mrf.mxu0 }
 0x32e   :  { %v3685_v29 = vpop.f32.mrf.mxu1  ;;  %v3684_v50 = vadd.f32 %v3683_v7, %v3491_v0  ;;  %v3493_v8 = vadd.f32 %v3492_v17, %v3300_v58  ;;  %5035 = vmatprep.mubr.bf16.mxu1 %v8830_v57  ;;  %v3815_v16 = vmax.f32 %v3682_v56, 0.0  ;;  %v3310_v58 = vadd.f32 %v9847_v40, %v3117_v19  ;;  %v9849_v19 = vld [vmem:[#allocation49_spill] sm:$0xff] }
 0x32f   :  { %v3496_v34 = vpop.f32.mrf.mxu0  ;;  %5036 = vmatmul.mubr.bf16.gmra.mxu1 %v8825_v62  ;;  %5169 = vmatmul.mubr.bf16.gmra.mxu0 %v9844_v37  ;;  %v3127_v56 = vadd.f32 %v8646_v61, %v8418_v23  ;;  %v9851_v61 = vld [vmem:[#allocation77_spill] sm:$0xff] }
 0x330   :  { %v3689_v38 = vpop.f32.mrf.mxu1  ;;  %v3818_v21 = vmax.f32 %v3684_v50, 0.0  ;;  %v3686_v13 = vadd.f32 %v3685_v29, %v3493_v8  ;;  %v3497_v20 = vadd.f32 %v3496_v34, %v8625_v43  ;;  %5178 = vmatprep.mubr.bf16.mxu0 %v9845_v52  ;;  %v9850_v52 = vld [vmem:[#allocation52_spill] sm:$0xff] }
 0x331   :  { %v3498_v33 = vpop.f32.mrf.mxu0 }
 0x332   :  { %v3691_v41 = vpop.f32.mrf.mxu1  ;;  %v8839_v46 = vpack.c.bf16 %v3818_v21, %v3814_v55  ;;  %v3819_v36 = vmax.f32 %v3686_v13, 0.0  ;;  %v3499_v30 = vadd.f32 %v3498_v33, %v9846_v25  ;;  %v3690_v1 = vadd.f32 %v3689_v38, %v3497_v20 }
 0x333   :  { %v3500_v2 = vpop.f32.mrf.mxu0 }
 0x334   :  { %v3693_v7 = vpop.f32.mrf.mxu1  ;;  %v3501_v0 = vadd.f32 %v3500_v2, %v9848_v5  ;;  %v8844_v17 = vpack.c.bf16 %v3819_v36, %v3815_v16  ;;  %v3692_v50 = vadd.f32 %v3691_v41, %v3499_v30  ;;  %v3822_v38 = vmax.f32 %v3690_v1, 0.0  ;;  %v9853_v1 = vld [vmem:[#allocation79_spill] sm:$0xff] }
 0x335   :  { %v3502_v43 = vpop.f32.mrf.mxu0 }
 0x336   :  { %v3695_v29 = vpop.f32.mrf.mxu1  ;;  %v3694_v8 = vadd.f32 %v3693_v7, %v3501_v0  ;;  %v3503_v34 = vadd.f32 %v3502_v43, %v3310_v58  ;;  %5045 = vmatprep.mubr.bf16.mxu1 %v8844_v17  ;;  %v3823_v16 = vmax.f32 %v3692_v50, 0.0  ;;  %v9852_v7 = vld [vmem:[#allocation78_spill] sm:$0xff] }
 0x337   :  { %v3506_v37 = vpop.f32.mrf.mxu0  ;;  %5046 = vmatmul.mubr.bf16.gmra.mxu1 %v8839_v46  ;;  %5179 = vmatmul.mubr.bf16.gmra.mxu0 %v9849_v19  ;;  %v3320_v40 = vadd.f32 %v9852_v7, %v3127_v56  ;;  %v7732_v7 = vld [vmem:[#allocation10 + $0xf0] sm:$0xff]  }
 0x338   :  { %v3699_v55 = vpop.f32.mrf.mxu1  ;;  %v3826_v21 = vmax.f32 %v3694_v8, 0.0  ;;  %v3696_v13 = vadd.f32 %v3695_v29, %v3503_v34  ;;  %v3507_v20 = vadd.f32 %v3506_v37, %v8640_v54  ;;  %5188 = vmatprep.mubr.bf16.mxu0 %v9850_v52  ;;  %v9854_v37 = vld [vmem:[#allocation51_spill] sm:$0xff] }
 0x339   :  { %v3508_v33 = vpop.f32.mrf.mxu0 }
 0x33a   :  { %v3701_v41 = vpop.f32.mrf.mxu1  ;;  %v8853_v36 = vpack.c.bf16 %v3826_v21, %v3822_v38  ;;  %v3827_v25 = vmax.f32 %v3696_v13, 0.0  ;;  %v3509_v23 = vadd.f32 %v3508_v33, %v9851_v61  ;;  %v3700_v58 = vadd.f32 %v3699_v55, %v3507_v20  ;;  %v9855_v38 = vld [vmem:[#allocation53_spill] sm:$0xff] }
 0x33b   :  { %v3510_v30 = vpop.f32.mrf.mxu0 }
 0x33c   :  { %v3703_v2 = vpop.f32.mrf.mxu1  ;;  %v3511_v5 = vadd.f32 %v3510_v30, %v9853_v1  ;;  %v8858_v0 = vpack.c.bf16 %v3827_v25, %v3823_v16  ;;  %v3702_v43 = vadd.f32 %v3701_v41, %v3509_v23  ;;  %v3830_v19 = vmax.f32 %v3700_v58, 0.0 }
 0x33d   :  { %v3512_v54 = vpop.f32.mrf.mxu0 }
 0x33e   :  { %v3704_v29 = vadd.f32 %v3703_v2, %v3511_v5  ;;  %v3513_v8 = vadd.f32 %v3512_v54, %v3320_v40  ;;  %5055 = vmatprep.mubr.bf16.mxu1 %v8858_v0  ;;  %v3705_v50 = vpop.f32.mrf.mxu1  ;;  %v3831_v13 = vmax.f32 %v3702_v43, 0.0  ;;  %v7731_v2 = vld [vmem:[#allocation10 + $0xb8] sm:$0xff]   ;;  %v7735_v5 = vld [vmem:[#allocation10 + $0xa8] sm:$0xff]  }
 0x33f   :  { %v8861_v34 = vpop.f32.mrf.mxu0  ;;  %5056 = vmatmul.mubr.bf16.gmra.mxu1 %v8853_v36  ;;  %5189 = vmatmul.mubr.bf16.gmra.mxu0 %v9854_v37 }
 0x340   :  { %v3834_v56 = vmax.f32 %v3704_v29, 0.0  ;;  %v3706_v55 = vadd.f32 %v3705_v50, %v3513_v8  ;;  %5198 = vmatprep.mubr.bf16.mxu0 %v9855_v38 }
 0x341   :  { %v8866_v21 = vpop.f32.mrf.mxu0 }
 0x342   :  { %v8868_v20 = vpack.c.bf16 %v3834_v56, %v3830_v19  ;;  %v3835_v52 = vmax.f32 %v3706_v55, 0.0  ;;  %v9857_v19 = vld [vmem:[#allocation18_spill] sm:$0xff]  ;;  %v9859_v55 = vld [vmem:[#allocation21_spill] sm:$0xff] }
 0x343   :  { %v8870_v33 = vpop.f32.mrf.mxu0  ;;  %v9858_v56 = vld [vmem:[#allocation22_spill] sm:$0xff] }
 0x344   :  { %v8872_v41 = vpack.c.bf16 %v3835_v52, %v3831_v13 }
 0x345   :  { %v8874_v16 = vpop.f32.mrf.mxu0 }
 0x346   :  { %5065 = vmatprep.mubr.bf16.mxu1 %v8872_v41 }
 0x347   :  { %v8877_v25 = vpop.f32.mrf.mxu0  ;;  %5066 = vmatmul.mubr.bf16.gmra.mxu1 %v8868_v20  ;;  %5199 = vmatmul.mubr.bf16.gmra.mxu0 %v8358_v45 }
 0x348   :  { %5208 = vmatprep.mubr.bf16.mxu0 %v8371_v53  ;;  %5301 = vmatprep.mubr.bf16.mxu1 %v8665_v63  ;;  %v7733_v53 = vld [vmem:[#allocation10 + $0xb0] sm:$0xff]   ;;  %v7734_v63 = vld [vmem:[#allocation10 + $0xe8] sm:$0xff]  }
 0x349   :  { %v8883_v61 = vpop.f32.mrf.mxu0 }
 0x34b   :  { %v8885_v23 = vpop.f32.mrf.mxu0 }
 0x34d   :  { %v8887_v30 = vpop.f32.mrf.mxu0 }
 0x34f   :  { %v8889_v40 = vpop.f32.mrf.mxu0  ;;  %5209 = vmatmul.mubr.bf16.gmra.mxu0 %v8367_v6  ;;  %5302 = vmatmul.mubr.bf16.vlgmr.msra.gmra.mxu1 %v8661_v9  ;;  %v7736_v6 = vld [vmem:[#allocation10 + $0xe0] sm:$0xff]  }
 0x350   :  { %5218 = vmatprep.mubr.bf16.mxu0 %v8380_v26  ;;  %5311 = vmatprep.mubr.bf16.mxu1 %v8677_v4  ;;  %v7737_v9 = vld [vmem:[#allocation10 + $0xa0] sm:$0xff]  }
 0x351   :  { %v8895_v45 = vpop.f32.mrf.mxu0  ;;  %6900 = vmatpush3.bf16.msra.mxu1 %v7731_v2  ;;  %v9860_v2 = vld [vmem:[#allocation20_spill] sm:$0xff] }
 0x352   :  { %6901 = vmatprep.subr.bf16.mxu1 %v7732_v7  ;;  %v9861_v7 = vld [vmem:[#allocation24_spill] sm:$0xff] }
 0x353   :  { %v8897_v58 = vpop.f32.mrf.mxu0 }
 0x355   :  { %v8899_v1 = vpop.f32.mrf.mxu0  ;;  %6902 = vmatpush3.bf16.msra.mxu1 %v7733_v53 }
 0x356   :  { %6903 = vmatprep.subr.bf16.mxu1 %v7734_v63 }
 0x357   :  { %v8901_v54 = vpop.f32.mrf.mxu0  ;;  %5219 = vmatmul.mubr.bf16.gmra.mxu0 %v8376_v60  ;;  %5312 = vmatmul.mubr.bf16.gmra.mxu1 %v8673_v27  ;;  %v7738_v60 = vld [vmem:[#allocation10 + $0xd8] sm:$0xff]  }
 0x358   :  { %5228 = vmatprep.mubr.bf16.mxu0 %v8389_v28  ;;  %5321 = vmatprep.mubr.bf16.mxu1 %v8689_v18  ;;  %v7739_v28 = vld [vmem:[#allocation10 + $0x98] sm:$0xff]  }
 0x359   :  { %v8907_v26 = vpop.f32.mrf.mxu0  ;;  %6904 = vmatpush3.bf16.msra.mxu1 %v7735_v5 }
 0x35a   :  { %6905 = vmatprep.subr.bf16.mxu1 %v7736_v6  ;;  %v9863_v6 = vld [vmem:[#allocation17_spill] sm:$0xff] }
 0x35b   :  { %v8909_v4 = vpop.f32.mrf.mxu0 }
 0x35d   :  { %v8911_v43 = vpop.f32.mrf.mxu0  ;;  %6906 = vmatpush3.bf16.msra.mxu1 %v7737_v9  ;;  %v7742_v9 = vld [vmem:[#allocation10 + $0xc8] sm:$0xff]  }
 0x35e   :  { %6907 = vmatprep.subr.bf16.mxu1 %v7738_v60  ;;  %v7743_v60 = vld [vmem:[#allocation10 + $0x88] sm:$0xff]  }
 0x35f   :  { %v8913_v29 = vpop.f32.mrf.mxu0  ;;  %5229 = vmatmul.mubr.bf16.gmra.mxu0 %v8385_v32  ;;  %5322 = vmatmul.mubr.bf16.gmra.mxu1 %v8685_v15  ;;  %v9856_v32 = vld [vmem:[#allocation23_spill] sm:$0xff] }
 0x360   :  { %5238 = vmatprep.mubr.bf16.mxu0 %v8398_v35  ;;  %5331 = vmatprep.mubr.bf16.mxu1 %v8704_v22 }
 0x361   :  { %v8919_v27 = vpop.f32.mrf.mxu0  ;;  %6908 = vmatpush3.bf16.msra.mxu1 %v7739_v28 }
 0x363   :  { %v8921_v18 = vpop.f32.mrf.mxu0 }
 0x365   :  { %v8923_v8 = vpop.f32.mrf.mxu0 }
 0x367   :  { %v8925_v50 = vpop.f32.mrf.mxu0  ;;  %5239 = vmatmul.mubr.bf16.gmra.mxu0 %v9792_v24  ;;  %5332 = vmatmul.mubr.bf16.gmra.mxu1 %v8699_v10  ;;  %v7740_v10 = vld [vmem:[#allocation10 + $0xd0] sm:$0xff]  }
 0x368   :  { %5248 = vmatprep.mubr.bf16.mxu0 %v9794_v59  ;;  %5341 = vmatprep.mubr.bf16.mxu1 %v9856_v32  ;;  %v7741_v24 = vld [vmem:[#allocation10 + $0x90] sm:$0xff]  }
 0x369   :  { %v8931_v35 = vpop.f32.mrf.mxu0  ;;  %6909 = vmatprep.subr.bf16.mxu1 %v7740_v10 }
 0x36a   :  { %6910 = vmatpush3.bf16.msra.mxu1 %v7741_v24  ;;  %v9872_v24 = vld [vmem:[#allocation16_spill] sm:$0xff] }
 0x36b   :  { %v8933_v15 = vpop.f32.mrf.mxu0  ;;  %6911 = vmatprep.subr.bf16.mxu1 %v7742_v9 }
 0x36d   :  { %v8935_v22 = vpop.f32.mrf.mxu0 }
 0x36e   :  { %6912 = vmatpush3.bf16.msra.mxu1 %v7743_v60  ;;  %v7744_v60 = vld [vmem:[#allocation10 + $0xc0] sm:$0xff]  }
 0x36f   :  { %v8937_v37 = vpop.f32.mrf.mxu0  ;;  %5249 = vmatmul.mubr.bf16.gmra.mxu0 %v9857_v19  ;;  %5342 = vmatmul.mubr.bf16.gmra.mxu1 %v9858_v56 }
 0x370   :  { %5258 = vmatprep.mubr.bf16.mxu0 %v9859_v55  ;;  %5351 = vmatprep.mubr.bf16.mxu1 %v8732_v39 }
 0x371   :  { %v8943_v59 = vpop.f32.mrf.mxu0  ;;  %6913 = vmatprep.subr.bf16.mxu1 %v7744_v60 }
 0x373   :  { %v8945_v38 = vpop.f32.mrf.mxu0 }
 0x375   :  { %v8947_v13 = vpop.f32.mrf.mxu0 }
 0x377   :  { %v8949_v52 = vpop.f32.mrf.mxu0  ;;  %5259 = vmatmul.mubr.bf16.gmra.mxu0 %v9860_v2  ;;  %5352 = vmatmul.mubr.bf16.gmra.mxu1 %v9861_v7  ;;  %v9873_v2 = vsub.s32 1, %v9872_v24 }
 0x378   :  { %5361 = vmatprep.mubr.bf16.mxu1 %v8746_v31 }
 0x379   :  { %v8954_v53 = vpop.f32.mrf.mxu0 }
 0x37b   :  { %v8956_v39 = vpop.f32.mrf.mxu0 }
 0x37d   :  { %v8958_v63 = vpop.f32.mrf.mxu0 }
 0x37f   :  { %v8960_v5 = vpop.f32.mrf.mxu0  ;;  %5362 = vmatmul.mubr.bf16.gmra.mxu1 %v9863_v6 }
 0x380   :  { %9862 = vst [vmem:[#allocation25_spill] sm:$0xff] %v8960_v5  ;;  %5371 = vmatprep.mubr.bf16.mxu1 %v8760_v3  ;;  %v8981_v3 = vld [vmem:[%s9643_s4] sm:$0xf] }
 0x381   :  { %v8964_v28 = vpop.f32.mrf.mxu0  ;;  %9870 = vst [vmem:[#allocation30_spill] sm:$0xff] %v8981_v3  ;;  %v8988_v7 = vrot.slane %v8981_v3, %v9873_v2 }
 0x382   :  { %9864 = vst [vmem:[#allocation19_spill] sm:$0xff] %v8964_v28 }
 0x383   :  { %v8966_v32 = vpop.f32.mrf.mxu0  ;;  %v4727_v2 = vadd.f32 %v8866_v21, %v8988_v7 }
 0x384   :  { %9865 = vst [vmem:[#allocation26_spill] sm:$0xff] %v8966_v32 }
 0x385   :  { %v8968_v31 = vpop.f32.mrf.mxu0 }
 0x386   :  { %9866 = vst [vmem:[#allocation27_spill] sm:$0xff] %v8968_v31 }
 0x387   :  { %v8970_v19 = vpop.f32.mrf.mxu0  ;;  %5372 = vmatmul.mubr.bf16.gmra.mxu1 %v8755_v14  ;;  %v9874_v14 = vsub.s32 0, %v9872_v24 }
 0x388   :  { %9867 = vst [vmem:[#allocation28_spill] sm:$0xff] %v8970_v19  ;;  %5381 = vmatprep.mubr.bf16.mxu1 %v8774_v49  ;;  %v7745_v19 = vld [vmem:[#allocation10 + $0x80] sm:$0xff]  }
 0x389   :  { %v8974_v56 = vpop.f32.mrf.mxu0  ;;  %v8993_v49 = vrot.slane %v8981_v3, %v9874_v14  ;;  %6914 = vmatpush3.bf16.msra.mxu1 %v7745_v19 }
 0x38a   :  { %9868 = vst [vmem:[#allocation31_spill] sm:$0xff] %v8974_v56 }
 0x38b   :  { %v8976_v55 = vpop.f32.mrf.mxu0  ;;  %v4729_v24 = vadd.f32 %v8870_v33, %v8993_v49  ;;  %v4725_v14 = vadd.f32 %v8861_v34, %v8993_v49 }
 0x38c   :  { %9869 = vst [vmem:[#allocation29_spill] sm:$0xff] %v8976_v55 }
 0x38d   :  { %v8983_v10 = vpop.f32.mrf.mxu0 }
 0x38e   :  { %9871 = vst [vmem:[#allocation32_spill] sm:$0xff] %v8983_v10 }
 0x38f   :  { %v8995_v6 = vpop.f32.mrf.mxu0  ;;  %v4917_v9 = vpop.f32.mrf.mxu1  ;;  %5382 = vmatmul.mubr.bf16.gmra.mxu1 %v8769_v11 }
 0x390   :  { %9875 = vst [vmem:[#allocation33_spill] sm:$0xff] %v8995_v6  ;;  %5391 = vmatprep.mubr.bf16.mxu1 %v8788_v44  ;;  %v4731_v44 = vadd.f32 %v8874_v16, %v8988_v7  ;;  %v4918_v56 = vadd.f32 %v4917_v9, %v4725_v14  ;;  %v4735_v9 = vadd.f32 %v8877_v25, %v8993_v49 }
 0x391   :  { %v8999_v10 = vpop.f32.mrf.mxu0  ;;  %v4919_v55 = vpop.f32.mrf.mxu1 }
 0x392   :  { %9876 = vst [vmem:[#allocation36_spill] sm:$0xff] %v8999_v10  ;;  %v4920_v6 = vadd.f32 %v4919_v55, %v4727_v2  ;;  %v5462_v19 = vmax.f32 %v4918_v56, 0.0  ;;  %v4737_v55 = vadd.f32 %v8883_v61, %v8988_v7 }
 0x393   :  { %v9007_v3 = vpop.f32.mrf.mxu0  ;;  %v4921_v11 = vpop.f32.mrf.mxu1 }
 0x394   :  { %9877 = vst [vmem:[#allocation34_spill] sm:$0xff] %v9007_v3  ;;  %v4922_v10 = vadd.f32 %v4921_v11, %v4729_v24  ;;  %v5463_v34 = vmax.f32 %v4920_v6, 0.0  ;;  %v4739_v24 = vadd.f32 %v8885_v23, %v8993_v49 }
 0x395   :  { %v9011_v31 = vpop.f32.mrf.mxu0  ;;  %v4923_v21 = vpop.f32.mrf.mxu1 }
 0x396   :  { %v4924_v5 = vadd.f32 %v4923_v21, %v4731_v44  ;;  %v5466_v32 = vmax.f32 %v4922_v10, 0.0 }
 0x397   :  { %v9013_v33 = vpop.f32.mrf.mxu0  ;;  %v4927_v60 = vpop.f32.mrf.mxu1  ;;  %5392 = vmatmul.mubr.bf16.gmra.mxu1 %v8783_v42 }
 0x398   :  { %v5467_v3 = vmax.f32 %v4924_v5, 0.0  ;;  %5401 = vmatprep.mubr.bf16.mxu1 %v8802_v51  ;;  %v5590_v2 = vpack.c.bf16 %v5466_v32, %v5462_v19  ;;  %v4741_v51 = vadd.f32 %v8887_v30, %v8988_v7  ;;  %v4928_v14 = vadd.f32 %v4927_v60, %v4735_v9 }
 0x399   :  { %v9017_v28 = vpop.f32.mrf.mxu0  ;;  %v4929_v16 = vpop.f32.mrf.mxu1  ;;  %v4747_v60 = vadd.f32 %v8895_v45, %v8988_v7 }
 0x39a   :  { %v5591_v10 = vpack.c.bf16 %v5467_v3, %v5463_v34  ;;  %v4930_v56 = vadd.f32 %v4929_v16, %v4737_v55  ;;  %v5470_v30 = vmax.f32 %v4928_v14, 0.0  ;;  %v4749_v16 = vadd.f32 %v8897_v58, %v8993_v49 }
 0x39b   :  { %v9025_v42 = vpop.f32.mrf.mxu0  ;;  %v4931_v5 = vpop.f32.mrf.mxu1 }
 0x39c   :  { %v4932_v6 = vadd.f32 %v4931_v5, %v4739_v24  ;;  %5949 = vmatprep.mubr.bf16.mxu0 %v5591_v10  ;;  %v5471_v32 = vmax.f32 %v4930_v56, 0.0  ;;  %v4745_v24 = vadd.f32 %v8889_v40, %v8993_v49 }
 0x39d   :  { %v9029_v11 = vpop.f32.mrf.mxu0  ;;  %v4933_v61 = vpop.f32.mrf.mxu1  ;;  %5950 = vmatmul.mubr.bf16.vlgmr.msra.gmra.mxu0 %v5590_v2 }
 0x39e   :  { %v4934_v23 = vadd.f32 %v4933_v61, %v4741_v51  ;;  %v5474_v3 = vmax.f32 %v4932_v6, 0.0 }
 0x39f   :  { %v9031_v44 = vpop.f32.mrf.mxu0  ;;  %v4937_v25 = vpop.f32.mrf.mxu1  ;;  %5402 = vmatmul.mubr.bf16.gmra.mxu1 %v8797_v47 }
 0x3a0   :  { %v5475_v21 = vmax.f32 %v4934_v23, 0.0  ;;  %5411 = vmatprep.mubr.bf16.mxu1 %v8816_v48  ;;  %v5594_v10 = vpack.c.bf16 %v5474_v3, %v5470_v30  ;;  %v4751_v48 = vadd.f32 %v8899_v1, %v8988_v7  ;;  %v4938_v51 = vadd.f32 %v4937_v25, %v4745_v24 }
 0x3a1   :  { %v9035_v34 = vpop.f32.mrf.mxu0  ;;  %v4939_v19 = vpop.f32.mrf.mxu1  ;;  %v4757_v25 = vadd.f32 %v8907_v26, %v8988_v7 }
 0x3a2   :  { %v5595_v55 = vpack.c.bf16 %v5475_v21, %v5471_v32  ;;  %v4940_v2 = vadd.f32 %v4939_v19, %v4747_v60  ;;  %v5478_v1 = vmax.f32 %v4938_v51, 0.0  ;;  %v4759_v21 = vadd.f32 %v8909_v4, %v8993_v49 }
 0x3a3   :  { %v9043_v47 = vpop.f32.mrf.mxu0  ;;  %v4941_v9 = vpop.f32.mrf.mxu1  ;;  %v4755_v19 = vadd.f32 %v8901_v54, %v8993_v49 }
 0x3a4   :  { %v4942_v5 = vadd.f32 %v4941_v9, %v4749_v16  ;;  %5957 = vmatprep.mubr.bf16.mxu0 %v5595_v55  ;;  %v5479_v61 = vmax.f32 %v4940_v2, 0.0 }
 0x3a5   :  { %v9047_v56 = vpop.f32.mrf.mxu0  ;;  %v4943_v45 = vpop.f32.mrf.mxu1  ;;  %5958 = vmatmul.mubr.bf16.gmra.mxu0 %v5594_v10 }
 0x3a6   :  { %v4944_v58 = vadd.f32 %v4943_v45, %v4751_v48  ;;  %v5482_v6 = vmax.f32 %v4942_v5, 0.0 }
 0x3a7   :  { %v9049_v14 = vpop.f32.mrf.mxu0  ;;  %v4947_v40 = vpop.f32.mrf.mxu1  ;;  %5412 = vmatmul.mubr.bf16.gmra.mxu1 %v8811_v12 }
 0x3a8   :  { %v5483_v23 = vmax.f32 %v4944_v58, 0.0  ;;  %5421 = vmatprep.mubr.bf16.mxu1 %v8830_v57  ;;  %v5598_v60 = vpack.c.bf16 %v5482_v6, %v5478_v1  ;;  %v4761_v57 = vadd.f32 %v8911_v43, %v8988_v7  ;;  %v4948_v10 = vadd.f32 %v4947_v40, %v4755_v19 }
 0x3a9   :  { %v9053_v3 = vpop.f32.mrf.mxu0  ;;  %v4949_v32 = vpop.f32.mrf.mxu1  ;;  %v4767_v6 = vadd.f32 %v8919_v27, %v8988_v7  ;;  %v4769_v40 = vadd.f32 %v8921_v18, %v8993_v49 }
 0x3aa   :  { %v5599_v30 = vpack.c.bf16 %v5483_v23, %v5479_v61  ;;  %v4950_v55 = vadd.f32 %v4949_v32, %v4757_v25  ;;  %v5486_v43 = vmax.f32 %v4948_v10, 0.0  ;;  %v4765_v23 = vadd.f32 %v8913_v29, %v8993_v49 }
 0x3ab   :  { %v9061_v12 = vpop.f32.mrf.mxu0  ;;  %v4951_v16 = vpop.f32.mrf.mxu1 }
 0x3ac   :  { %v4952_v24 = vadd.f32 %v4951_v16, %v4759_v21  ;;  %5965 = vmatprep.mubr.bf16.mxu0 %v5599_v30  ;;  %v5487_v5 = vmax.f32 %v4950_v55, 0.0 }
 0x3ad   :  { %v9065_v9 = vpop.f32.mrf.mxu0  ;;  %v4953_v26 = vpop.f32.mrf.mxu1  ;;  %5966 = vmatmul.mubr.bf16.gmra.mxu0 %v5598_v60 }
 0x3ae   :  { %v4954_v4 = vadd.f32 %v4953_v26, %v4761_v57  ;;  %v5490_v48 = vmax.f32 %v4952_v24, 0.0  ;;  %v4777_v26 = vadd.f32 %v8931_v35, %v8988_v7 }
 0x3af   :  { %v9067_v2 = vpop.f32.mrf.mxu0  ;;  %v4957_v54 = vpop.f32.mrf.mxu1  ;;  %5422 = vmatmul.mubr.bf16.gmra.mxu1 %v8825_v62 }
 0x3b0   :  { %v5491_v51 = vmax.f32 %v4954_v4, 0.0  ;;  %5431 = vmatprep.mubr.bf16.mxu1 %v8844_v17  ;;  %v5602_v1 = vpack.c.bf16 %v5490_v48, %v5486_v43  ;;  %v4771_v17 = vadd.f32 %v8923_v8, %v8988_v7  ;;  %v4958_v30 = vadd.f32 %v4957_v54, %v4765_v23 }
 0x3b1   :  { %v9071_v45 = vpop.f32.mrf.mxu0  ;;  %v4959_v58 = vpop.f32.mrf.mxu1  ;;  %v4779_v4 = vadd.f32 %v8933_v15, %v8993_v49  ;;  %v4775_v54 = vadd.f32 %v8925_v50, %v8993_v49 }
 0x3b2   :  { %v5603_v61 = vpack.c.bf16 %v5491_v51, %v5487_v5  ;;  %v4960_v25 = vadd.f32 %v4959_v58, %v4767_v6  ;;  %v5494_v8 = vmax.f32 %v4958_v30, 0.0  ;;  %v4789_v30 = vadd.f32 %v8945_v38, %v8993_v49 }
 0x3b3   :  { %v9079_v62 = vpop.f32.mrf.mxu0  ;;  %v4961_v32 = vpop.f32.mrf.mxu1 }
 0x3b4   :  { %v4962_v21 = vadd.f32 %v4961_v32, %v4769_v40  ;;  %5973 = vmatprep.mubr.bf16.mxu0 %v5603_v61  ;;  %v5495_v57 = vmax.f32 %v4960_v25, 0.0 }
 0x3b5   :  { %v9083_v19 = vpop.f32.mrf.mxu0  ;;  %v4963_v27 = vpop.f32.mrf.mxu1  ;;  %5974 = vmatmul.mubr.bf16.gmra.mxu0 %v5602_v1 }
 0x3b6   :  { %v4964_v18 = vadd.f32 %v4963_v27, %v4771_v17  ;;  %v5498_v60 = vmax.f32 %v4962_v21, 0.0  ;;  %v4787_v21 = vadd.f32 %v8943_v59, %v8988_v7 }
 0x3b7   :  { %v9085_v16 = vpop.f32.mrf.mxu0  ;;  %v4967_v29 = vpop.f32.mrf.mxu1  ;;  %5432 = vmatmul.mubr.bf16.gmra.mxu1 %v8839_v46 }
 0x3b8   :  { %v5499_v55 = vmax.f32 %v4964_v18, 0.0  ;;  %5441 = vmatprep.mubr.bf16.mxu1 %v8858_v0  ;;  %v5606_v5 = vpack.c.bf16 %v5498_v60, %v5494_v8  ;;  %v4781_v0 = vadd.f32 %v8935_v22, %v8988_v7  ;;  %v4968_v6 = vadd.f32 %v4967_v29, %v4775_v54 }
 0x3b9   :  { %v9089_v24 = vpop.f32.mrf.mxu0  ;;  %v4969_v10 = vpop.f32.mrf.mxu1  ;;  %v4785_v18 = vadd.f32 %v8937_v37, %v8993_v49 }
 0x3ba   :  { %v5607_v48 = vpack.c.bf16 %v5499_v55, %v5495_v57  ;;  %v4970_v43 = vadd.f32 %v4969_v10, %v4777_v26  ;;  %v5502_v22 = vmax.f32 %v4968_v6, 0.0  ;;  %v4795_v6 = vadd.f32 %v8949_v52, %v8993_v49 }
 0x3bb   :  { %v9097_v46 = vpop.f32.mrf.mxu0  ;;  %v4971_v51 = vpop.f32.mrf.mxu1 }
 0x3bc   :  { %v4972_v58 = vadd.f32 %v4971_v51, %v4779_v4  ;;  %5981 = vmatprep.mubr.bf16.mxu0 %v5607_v48  ;;  %v5503_v50 = vmax.f32 %v4970_v43, 0.0  ;;  %v4799_v43 = vadd.f32 %v8956_v39, %v8993_v49 }
 0x3bd   :  { %v9101_v40 = vpop.f32.mrf.mxu0  ;;  %v4973_v35 = vpop.f32.mrf.mxu1  ;;  %5982 = vmatmul.mubr.bf16.gmra.mxu0 %v5606_v5 }
 0x3be   :  { %v4974_v15 = vadd.f32 %v4973_v35, %v4781_v0  ;;  %v5506_v61 = vmax.f32 %v4972_v58, 0.0  ;;  %v4797_v0 = vadd.f32 %v8954_v53, %v8988_v7 }
 0x3bf   :  { %v4977_v23 = vpop.f32.mrf.mxu1  ;;  %v9103_v1 = vpop.f32.mrf.mxu0  ;;  %5442 = vmatmul.mubr.bf16.gmra.mxu1 %v8853_v36 }
 0x3c0   :  { %v5507_v32 = vmax.f32 %v4974_v15, 0.0  ;;  %5451 = vmatprep.mubr.bf16.mxu1 %v8872_v41  ;;  %v5610_v60 = vpack.c.bf16 %v5506_v61, %v5502_v22  ;;  %v4791_v41 = vadd.f32 %v8947_v13, %v8988_v7  ;;  %v4978_v8 = vadd.f32 %v4977_v23, %v4785_v18 }
 0x3c1   :  { %v4979_v17 = vpop.f32.mrf.mxu1  ;;  %v9107_v25 = vpop.f32.mrf.mxu0 }
 0x3c2   :  { %v5611_v27 = vpack.c.bf16 %v5507_v32, %v5503_v50  ;;  %v4980_v57 = vadd.f32 %v4979_v17, %v4787_v21  ;;  %v5510_v5 = vmax.f32 %v4978_v8, 0.0 }
 0x3c3   :  { %v4981_v36 = vpop.f32.mrf.mxu1  ;;  %v9115_v29 = vpop.f32.mrf.mxu0 }
 0x3c4   :  { %v4982_v55 = vadd.f32 %v4981_v36, %v4789_v30  ;;  %5989 = vmatprep.mubr.bf16.mxu0 %v5611_v27  ;;  %v5511_v37 = vmax.f32 %v4980_v57, 0.0  ;;  %v9879_v57 = vld [vmem:[#allocation26_spill] sm:$0xff] }
 0x3c5   :  { %v4983_v10 = vpop.f32.mrf.mxu1  ;;  %v9119_v59 = vpop.f32.mrf.mxu0  ;;  %5990 = vmatmul.mubr.bf16.gmra.mxu0 %v5610_v60 }
 0x3c6   :  { %v4984_v38 = vadd.f32 %v4983_v10, %v4791_v41  ;;  %v5514_v26 = vmax.f32 %v4982_v55, 0.0  ;;  %v4809_v55 = vadd.f32 %v9879_v57, %v8993_v49  ;;  %v9880_v10 = vld [vmem:[#allocation25_spill] sm:$0xff] }
 0x3c7   :  { %v4987_v4 = vpop.f32.mrf.mxu1  ;;  %v9121_v48 = vpop.f32.mrf.mxu0  ;;  %5452 = vmatmul.mubr.bf16.gmra.mxu1 %v8868_v20  ;;  %v4801_v20 = vadd.f32 %v8958_v63, %v8988_v7  ;;  %v9878_v63 = vld [vmem:[#allocation19_spill] sm:$0xff] }
 0x3c8   :  { %v5515_v54 = vmax.f32 %v4984_v38, 0.0  ;;  %v5614_v35 = vpack.c.bf16 %v5514_v26, %v5510_v5  ;;  %v4988_v32 = vadd.f32 %v4987_v4, %v4795_v6  ;;  %v4807_v41 = vadd.f32 %v9878_v63, %v8988_v7  ;;  %v9884_v63 = vld [vmem:[#allocation28_spill] sm:$0xff] }
 0x3c9   :  { %v4989_v51 = vpop.f32.mrf.mxu1  ;;  %v9124_v13 = vpop.f32.mrf.mxu0  ;;  %v4805_v38 = vadd.f32 %v9880_v10, %v8993_v49  ;;  %v9885_v10 = vld [vmem:[#allocation32_spill] sm:$0xff] }
 0x3ca   :  { %v5615_v58 = vpack.c.bf16 %v5515_v54, %v5511_v37  ;;  %v4990_v23 = vadd.f32 %v4989_v51, %v4797_v0  ;;  %v5518_v18 = vmax.f32 %v4988_v32, 0.0  ;;  %v9881_v54 = vld [vmem:[#allocation27_spill] sm:$0xff] }
 0x3cb   :  { %v4991_v15 = vpop.f32.mrf.mxu1  ;;  %v9132_v61 = vpop.f32.mrf.mxu0  ;;  %v4811_v5 = vadd.f32 %v9881_v54, %v8988_v7 }
 0x3cc   :  { %v4992_v50 = vadd.f32 %v4991_v15, %v4799_v43  ;;  %5997 = vmatprep.mubr.bf16.mxu0 %v5615_v58  ;;  %v5519_v52 = vmax.f32 %v4990_v23, 0.0 }
 0x3cd   :  { %v4993_v22 = vpop.f32.mrf.mxu1  ;;  %v9136_v53 = vpop.f32.mrf.mxu0  ;;  %5998 = vmatmul.mubr.bf16.gmra.mxu0 %v5614_v35 }
 0x3ce   :  { %v4994_v39 = vadd.f32 %v4993_v22, %v4801_v20  ;;  %v5522_v17 = vmax.f32 %v4992_v50, 0.0 }
 0x3cf   :  { %v4997_v21 = vpop.f32.mrf.mxu1  ;;  %v9138_v30 = vpop.f32.mrf.mxu0 }
 0x3d0   :  { %v5523_v27 = vmax.f32 %v4994_v39, 0.0  ;;  %v5618_v26 = vpack.c.bf16 %v5522_v17, %v5518_v18  ;;  %v4998_v43 = vadd.f32 %v4997_v21, %v4805_v38  ;;  %v9883_v21 = vld [vmem:[#allocation29_spill] sm:$0xff]  ;;  %v4821_v38 = vadd.f32 %v9885_v10, %v8988_v7 }
 0x3d1   :  { %v4999_v60 = vpop.f32.mrf.mxu1  ;;  %v9140_v36 = vpop.f32.mrf.mxu0  ;;  %v4819_v18 = vadd.f32 %v9883_v21, %v8993_v49  ;;  %v4831_v10 = vadd.f32 %v9011_v31, %v8988_v7  ;;  %v4837_v31 = vadd.f32 %v9017_v28, %v8988_v7 }
 0x3d2   :  { %v5619_v8 = vpack.c.bf16 %v5523_v27, %v5519_v52  ;;  %v5000_v51 = vadd.f32 %v4999_v60, %v4807_v41  ;;  %v5526_v22 = vmax.f32 %v4998_v43, 0.0  ;;  %v9882_v52 = vld [vmem:[#allocation31_spill] sm:$0xff]  ;;  %v4815_v41 = vadd.f32 %v9884_v63, %v8993_v49 }
 0x3d3   :  { %v5001_v4 = vpop.f32.mrf.mxu1  ;;  %v9148_v37 = vpop.f32.mrf.mxu0  ;;  %v4817_v27 = vadd.f32 %v9882_v52, %v8988_v7 }
 0x3d4   :  { %v5002_v0 = vadd.f32 %v5001_v4, %v4809_v55  ;;  %6005 = vmatprep.mubr.bf16.mxu0 %v5619_v8  ;;  %v5527_v50 = vmax.f32 %v5000_v51, 0.0 }
 0x3d5   :  { %v5003_v58 = vpop.f32.mrf.mxu1  ;;  %v9152_v6 = vpop.f32.mrf.mxu0  ;;  %6006 = vmatmul.mubr.bf16.gmra.mxu0 %v5618_v26 }
 0x3d6   :  { %v5004_v35 = vadd.f32 %v5003_v58, %v4811_v5  ;;  %v5530_v15 = vmax.f32 %v5002_v0, 0.0 }
 0x3d7   :  { %v5007_v20 = vpop.f32.mrf.mxu1  ;;  %v9154_v23 = vpop.f32.mrf.mxu0 }
 0x3d8   :  { %v5531_v32 = vmax.f32 %v5004_v35, 0.0  ;;  %v5622_v57 = vpack.c.bf16 %v5530_v15, %v5526_v22  ;;  %v5008_v54 = vadd.f32 %v5007_v20, %v4815_v41  ;;  %v9888_v20 = vld [vmem:[#allocation34_spill] sm:$0xff] }
 0x3d9   :  { %v5009_v39 = vpop.f32.mrf.mxu1  ;;  %v9156_v17 = vpop.f32.mrf.mxu0  ;;  %v4829_v21 = vadd.f32 %v9888_v20, %v8993_v49 }
 0x3da   :  { %v5623_v60 = vpack.c.bf16 %v5531_v32, %v5527_v50  ;;  %v5010_v26 = vadd.f32 %v5009_v39, %v4817_v27  ;;  %v5534_v32 = vmax.f32 %v5008_v54, 0.0  ;;  %v9887_v39 = vld [vmem:[#allocation36_spill] sm:$0xff] }
 0x3db   :  { %v5011_v55 = vpop.f32.mrf.mxu1  ;;  %v9164_v8 = vpop.f32.mrf.mxu0  ;;  %v4827_v27 = vadd.f32 %v9887_v39, %v8988_v7 }
 0x3dc   :  { %v5012_v4 = vadd.f32 %v5011_v55, %v4819_v18  ;;  %6013 = vmatprep.mubr.bf16.mxu0 %v5623_v60  ;;  %v5535_v15 = vmax.f32 %v5010_v26, 0.0  ;;  %v9889_v60 = vld [vmem:[#allocation33_spill] sm:$0xff] }
 0x3dd   :  { %v5013_v5 = vpop.f32.mrf.mxu1  ;;  %v9168_v51 = vpop.f32.mrf.mxu0  ;;  %6014 = vmatmul.mubr.bf16.gmra.mxu0 %v5622_v57  ;;  %v4825_v63 = vadd.f32 %v9889_v60, %v8993_v49 }
 0x3de   :  { %v5014_v0 = vadd.f32 %v5013_v5, %v4821_v38  ;;  %v5538_v43 = vmax.f32 %v5012_v4, 0.0 }
 0x3df   :  { %v5017_v58 = vpop.f32.mrf.mxu1  ;;  %v9170_v35 = vpop.f32.mrf.mxu0 }
 0x3e0   :  { %9886 = vst [vmem:[#allocation54_spill] sm:$0xff] %v9170_v35  ;;  %v5539_v50 = vmax.f32 %v5014_v0, 0.0  ;;  %v5626_v41 = vpack.c.bf16 %v5538_v43, %v5534_v32  ;;  %v5018_v4 = vadd.f32 %v5017_v58, %v4825_v63  ;;  %v4839_v58 = vadd.f32 %v9025_v42, %v8993_v49 }
 0x3e1   :  { %v5019_v22 = vpop.f32.mrf.mxu1  ;;  %v9172_v52 = vpop.f32.mrf.mxu0 }
 0x3e2   :  { %v5627_v18 = vpack.c.bf16 %v5539_v50, %v5535_v15  ;;  %v5020_v38 = vadd.f32 %v5019_v22, %v4827_v27  ;;  %v5542_v20 = vmax.f32 %v5018_v4, 0.0  ;;  %v4835_v27 = vadd.f32 %v9013_v33, %v8993_v49 }
 0x3e3   :  { %v5021_v57 = vpop.f32.mrf.mxu1  ;;  %v9180_v55 = vpop.f32.mrf.mxu0 }
 0x3e4   :  { %v5022_v26 = vadd.f32 %v5021_v57, %v4829_v21  ;;  %6021 = vmatprep.mubr.bf16.mxu0 %v5627_v18  ;;  %v5543_v43 = vmax.f32 %v5020_v38, 0.0 }
 0x3e5   :  { %v5023_v54 = vpop.f32.mrf.mxu1  ;;  %v9184_v5 = vpop.f32.mrf.mxu0  ;;  %6022 = vmatmul.mubr.bf16.gmra.mxu0 %v5626_v41  ;;  %v4841_v41 = vadd.f32 %v9029_v11, %v8988_v7  ;;  %v4847_v11 = vadd.f32 %v9035_v34, %v8988_v7 }
 0x3e6   :  { %v5024_v0 = vadd.f32 %v5023_v54, %v4831_v10  ;;  %v5546_v15 = vmax.f32 %v5022_v26, 0.0 }
 0x3e7   :  { %v5027_v50 = vpop.f32.mrf.mxu1  ;;  %v9186_v39 = vpop.f32.mrf.mxu0 }
 0x3e8   :  { %v5547_v32 = vmax.f32 %v5024_v0, 0.0  ;;  %v5630_v21 = vpack.c.bf16 %v5546_v15, %v5542_v20  ;;  %v5028_v38 = vadd.f32 %v5027_v50, %v4835_v27  ;;  %v4849_v50 = vadd.f32 %v9043_v47, %v8993_v49 }
 0x3e9   :  { %v5029_v60 = vpop.f32.mrf.mxu1  ;;  %v9188_v35 = vpop.f32.mrf.mxu0 }
 0x3ea   :  { %v5631_v22 = vpack.c.bf16 %v5547_v32, %v5543_v43  ;;  %v5030_v57 = vadd.f32 %v5029_v60, %v4837_v31  ;;  %v5550_v43 = vmax.f32 %v5028_v38, 0.0  ;;  %v4845_v31 = vadd.f32 %v9031_v44, %v8993_v49 }
 0x3eb   :  { %v5031_v18 = vpop.f32.mrf.mxu1  ;;  %v9196_v63 = vpop.f32.mrf.mxu0 }
 0x3ec   :  { %v5032_v10 = vadd.f32 %v5031_v18, %v4839_v58  ;;  %6029 = vmatprep.mubr.bf16.mxu0 %v5631_v22  ;;  %v5551_v33 = vmax.f32 %v5030_v57, 0.0 }
 0x3ed   :  { %v5033_v26 = vpop.f32.mrf.mxu1  ;;  %v9200_v28 = vpop.f32.mrf.mxu0  ;;  %6030 = vmatmul.mubr.bf16.gmra.mxu0 %v5630_v21  ;;  %v4851_v21 = vadd.f32 %v9047_v56, %v8988_v7  ;;  %v4857_v56 = vadd.f32 %v9053_v3, %v8988_v7 }
 0x3ee   :  { %v5034_v42 = vadd.f32 %v5033_v26, %v4841_v41  ;;  %v5554_v4 = vmax.f32 %v5032_v10, 0.0 }
 0x3ef   :  { %v5037_v54 = vpop.f32.mrf.mxu1  ;;  %v9202_v0 = vpop.f32.mrf.mxu0 }
 0x3f0   :  { %v5555_v15 = vmax.f32 %v5034_v42, 0.0  ;;  %v5634_v58 = vpack.c.bf16 %v5554_v4, %v5550_v43  ;;  %v5038_v57 = vadd.f32 %v5037_v54, %v4845_v31  ;;  %v4859_v54 = vadd.f32 %v9061_v12, %v8993_v49 }
 0x3f1   :  { %v5039_v32 = vpop.f32.mrf.mxu1  ;;  %v9204_v20 = vpop.f32.mrf.mxu0 }
 0x3f2   :  { %v5635_v60 = vpack.c.bf16 %v5555_v15, %v5551_v33  ;;  %v5040_v18 = vadd.f32 %v5039_v32, %v4847_v11  ;;  %v5558_v33 = vmax.f32 %v5038_v57, 0.0  ;;  %v4855_v11 = vadd.f32 %v9049_v14, %v8993_v49 }
 0x3f3   :  { %v5041_v22 = vpop.f32.mrf.mxu1  ;;  %v9212_v27 = vpop.f32.mrf.mxu0 }
 0x3f4   :  { %v5042_v41 = vadd.f32 %v5041_v22, %v4849_v50  ;;  %6037 = vmatprep.mubr.bf16.mxu0 %v5635_v60  ;;  %v5559_v44 = vmax.f32 %v5040_v18, 0.0 }
 0x3f5   :  { %v5043_v10 = vpop.f32.mrf.mxu1  ;;  %v9216_v34 = vpop.f32.mrf.mxu0  ;;  %6038 = vmatmul.mubr.bf16.gmra.mxu0 %v5634_v58  ;;  %v4861_v58 = vadd.f32 %v9065_v9, %v8988_v7  ;;  %v4867_v9 = vadd.f32 %v9071_v45, %v8988_v7 }
 0x3f6   :  { %v5044_v47 = vadd.f32 %v5043_v10, %v4851_v21  ;;  %v5562_v38 = vmax.f32 %v5042_v41, 0.0 }
 0x3f7   :  { %v5047_v26 = vpop.f32.mrf.mxu1  ;;  %v9218_v42 = vpop.f32.mrf.mxu0 }
 0x3f8   :  { %v5563_v4 = vmax.f32 %v5044_v47, 0.0  ;;  %v5638_v50 = vpack.c.bf16 %v5562_v38, %v5558_v33  ;;  %v5048_v18 = vadd.f32 %v5047_v26, %v4855_v11  ;;  %v4869_v26 = vadd.f32 %v9079_v62, %v8993_v49 }
 0x3f9   :  { %v5049_v15 = vpop.f32.mrf.mxu1  ;;  %v9220_v43 = vpop.f32.mrf.mxu0 }
 0x3fa   :  { %v5639_v32 = vpack.c.bf16 %v5563_v4, %v5559_v44  ;;  %v5050_v22 = vadd.f32 %v5049_v15, %v4857_v56  ;;  %v5566_v44 = vmax.f32 %v5048_v18, 0.0  ;;  %v4865_v56 = vadd.f32 %v9067_v2, %v8993_v49 }
 0x3fb   :  { %v5051_v60 = vpop.f32.mrf.mxu1  ;;  %v9228_v31 = vpop.f32.mrf.mxu0 }
 0x3fc   :  { %v5052_v21 = vadd.f32 %v5051_v60, %v4859_v54  ;;  %6045 = vmatprep.mubr.bf16.mxu0 %v5639_v32  ;;  %v5567_v14 = vmax.f32 %v5050_v22, 0.0 }
 0x3fd   :  { %v5053_v41 = vpop.f32.mrf.mxu1  ;;  %v9232_v3 = vpop.f32.mrf.mxu0  ;;  %6046 = vmatmul.mubr.bf16.gmra.mxu0 %v5638_v50  ;;  %v4871_v50 = vadd.f32 %v9083_v19, %v8988_v7  ;;  %v4877_v19 = vadd.f32 %v9089_v24, %v8988_v7 }
 0x3fe   :  { %v5054_v12 = vadd.f32 %v5053_v41, %v4861_v58  ;;  %v5570_v57 = vmax.f32 %v5052_v21, 0.0 }
 0x3ff   :  { %v5057_v10 = vpop.f32.mrf.mxu1  ;;  %v9234_v47 = vpop.f32.mrf.mxu0 }
 0x400   :  { %v5571_v38 = vmax.f32 %v5054_v12, 0.0  ;;  %v5642_v54 = vpack.c.bf16 %v5570_v57, %v5566_v44  ;;  %v5058_v22 = vadd.f32 %v5057_v10, %v4865_v56  ;;  %v4879_v10 = vadd.f32 %v9097_v46, %v8993_v49  ;;  %v9890_v46 = vld [vmem:[#allocation16_spill] sm:$0xff] }
 0x401   :  { %v5059_v4 = vpop.f32.mrf.mxu1  ;;  %v9236_v33 = vpop.f32.mrf.mxu0 }
 0x402   :  { %v5643_v15 = vpack.c.bf16 %v5571_v38, %v5567_v14  ;;  %v5060_v60 = vadd.f32 %v5059_v4, %v4867_v9  ;;  %v5574_v14 = vmax.f32 %v5058_v22, 0.0  ;;  %v4875_v9 = vadd.f32 %v9085_v16, %v8993_v49 }
 0x403   :  { %v5061_v32 = vpop.f32.mrf.mxu1  ;;  %v9244_v11 = vpop.f32.mrf.mxu0  ;;  %v9891_v22 = vsub.s32 3, %v9890_v46  ;;  %v9893_v16 = vsub.s32 2, %v9890_v46 }
 0x404   :  { %v5062_v58 = vadd.f32 %v5061_v32, %v4869_v26  ;;  %6053 = vmatprep.mubr.bf16.mxu0 %v5643_v15  ;;  %v5575_v2 = vmax.f32 %v5060_v60, 0.0 }
 0x405   :  { %v5063_v21 = vpop.f32.mrf.mxu1  ;;  %v9248_v45 = vpop.f32.mrf.mxu0  ;;  %6054 = vmatmul.mubr.bf16.gmra.mxu0 %v5642_v54  ;;  %v4881_v54 = vadd.f32 %v9101_v40, %v8988_v7 }
 0x406   :  { %v5064_v62 = vadd.f32 %v5063_v21, %v4871_v50  ;;  %v5578_v18 = vmax.f32 %v5062_v58, 0.0  ;;  %v9892_v21 = vld [vmem:[#allocation30_spill] sm:$0xff] }
 0x407   :  { %v5067_v41 = vpop.f32.mrf.mxu1  ;;  %v9250_v12 = vpop.f32.mrf.mxu0 }
 0x408   :  { %v5579_v57 = vmax.f32 %v5064_v62, 0.0  ;;  %v5646_v26 = vpack.c.bf16 %v5578_v18, %v5574_v14  ;;  %v5068_v60 = vadd.f32 %v5067_v41, %v4875_v9  ;;  %v9269_v62 = vrot.slane %v9892_v21, %v9891_v22 }
 0x409   :  { %v5069_v38 = vpop.f32.mrf.mxu1  ;;  %v9252_v44 = vpop.f32.mrf.mxu0  ;;  %v9274_v18 = vrot.slane %v9892_v21, %v9893_v16 }
 0x40a   :  { %v5647_v4 = vpack.c.bf16 %v5579_v57, %v5575_v2  ;;  %v5070_v32 = vadd.f32 %v5069_v38, %v4877_v19  ;;  %v5582_v14 = vmax.f32 %v5068_v60, 0.0 }
 0x40b   :  { %v5071_v15 = vpop.f32.mrf.mxu1  ;;  %v9260_v56 = vpop.f32.mrf.mxu0 }
 0x40c   :  { %v5072_v50 = vadd.f32 %v5071_v15, %v4879_v10  ;;  %6061 = vmatprep.mubr.bf16.mxu0 %v5647_v4  ;;  %v5583_v41 = vmax.f32 %v5070_v32, 0.0  ;;  %v5113_v10 = vadd.f32 %v9107_v25, %v9269_v62  ;;  %v5115_v4 = vadd.f32 %v9115_v29, %v9274_v18 }
 0x40d   :  { %v5073_v58 = vpop.f32.mrf.mxu1  ;;  %v9264_v24 = vpop.f32.mrf.mxu0  ;;  %6062 = vmatmul.mubr.bf16.gmra.mxu0 %v5646_v26  ;;  %v5111_v26 = vadd.f32 %v9103_v1, %v9274_v18  ;;  %v5117_v32 = vadd.f32 %v9119_v59, %v9269_v62  ;;  %v5123_v59 = vadd.f32 %v9124_v13, %v9269_v62 }
 0x40e   :  { %v5074_v49 = vadd.f32 %v5073_v58, %v4881_v54  ;;  %v5586_v7 = vmax.f32 %v5072_v50, 0.0 }
 0x40f   :  { %v9276_v40 = vpop.f32.mrf.mxu0  ;;  %v5303_v2 = vpop.f32.mrf.mxu1 }
 0x410   :  { %v5587_v57 = vmax.f32 %v5074_v49, 0.0  ;;  %v5650_v15 = vpack.c.bf16 %v5586_v7, %v5582_v14  ;;  %v5304_v46 = vadd.f32 %v5303_v2, %v5111_v26  ;;  %v5125_v2 = vadd.f32 %v9132_v61, %v9274_v18 }
 0x411   :  { %v9278_v38 = vpop.f32.mrf.mxu0  ;;  %v5305_v19 = vpop.f32.mrf.mxu1 }
 0x412   :  { %v5651_v9 = vpack.c.bf16 %v5587_v57, %v5583_v41  ;;  %v5306_v60 = vadd.f32 %v5305_v19, %v5113_v10  ;;  %v5464_v41 = vmax.f32 %v5304_v46, 0.0  ;;  %v5121_v10 = vadd.f32 %v9121_v48, %v9274_v18 }
 0x413   :  { %v9286_v54 = vpop.f32.mrf.mxu0  ;;  %v5307_v50 = vpop.f32.mrf.mxu1 }
 0x414   :  { %v5308_v58 = vadd.f32 %v5307_v50, %v5115_v4  ;;  %6069 = vmatprep.mubr.bf16.mxu0 %v5651_v9  ;;  %v5465_v16 = vmax.f32 %v5306_v60, 0.0 }
 0x415   :  { %v9290_v22 = vpop.f32.mrf.mxu0  ;;  %v5309_v25 = vpop.f32.mrf.mxu1  ;;  %6070 = vmatmul.mubr.bf16.gmra.mxu0 %v5650_v15  ;;  %v5127_v15 = vadd.f32 %v9136_v53, %v9269_v62  ;;  %v5133_v53 = vadd.f32 %v9140_v36, %v9269_v62 }
 0x416   :  { %v5310_v29 = vadd.f32 %v5309_v25, %v5117_v32  ;;  %v5468_v21 = vmax.f32 %v5308_v58, 0.0 }
 0x417   :  { %v9292_v49 = vpop.f32.mrf.mxu0  ;;  %v5313_v1 = vpop.f32.mrf.mxu1 }
 0x418   :  { %v5469_v7 = vmax.f32 %v5310_v29, 0.0  ;;  %v5592_v4 = vpack.c.bf16 %v5468_v21, %v5464_v41  ;;  %v5314_v60 = vadd.f32 %v5313_v1, %v5121_v10  ;;  %v5135_v41 = vadd.f32 %v9148_v37, %v9274_v18 }
 0x419   :  { %v9294_v57 = vpop.f32.mrf.mxu0  ;;  %v5315_v14 = vpop.f32.mrf.mxu1  ;;  %v5137_v10 = vadd.f32 %v9152_v6, %v9269_v62  ;;  %v5145_v6 = vadd.f32 %v9164_v8, %v9274_v18 }
 0x41a   :  { %v5593_v19 = vpack.c.bf16 %v5469_v7, %v5465_v16  ;;  %v5316_v50 = vadd.f32 %v5315_v14, %v5123_v59  ;;  %v5472_v16 = vmax.f32 %v5314_v60, 0.0  ;;  %v5131_v14 = vadd.f32 %v9138_v30, %v9274_v18 }
 0x41b   :  { %v9302_v9 = vpop.f32.mrf.mxu0  ;;  %v5317_v26 = vpop.f32.mrf.mxu1 }
 0x41c   :  { %v5318_v32 = vadd.f32 %v5317_v26, %v5125_v2  ;;  %6110 = vmatprep.mubr.bf16.mxu1 %v5593_v19  ;;  %v5473_v29 = vmax.f32 %v5316_v50, 0.0 }
 0x41d   :  { %v9306_v58 = vpop.f32.mrf.mxu0  ;;  %v5319_v13 = vpop.f32.mrf.mxu1  ;;  %6111 = vmatmul.mubr.bf16.vlgmr.msra.gmra.mxu1 %v5592_v4 }
 0x41e   :  { %v5320_v61 = vadd.f32 %v5319_v13, %v5127_v15  ;;  %v5476_v46 = vmax.f32 %v5318_v32, 0.0 }
 0x41f   :  { %v9308_v25 = vpop.f32.mrf.mxu0  ;;  %v5323_v48 = vpop.f32.mrf.mxu1 }
 0x420   :  { %v5477_v21 = vmax.f32 %v5320_v61, 0.0  ;;  %v5596_v59 = vpack.c.bf16 %v5476_v46, %v5472_v16  ;;  %v5324_v15 = vadd.f32 %v5323_v48, %v5131_v14  ;;  %v5141_v48 = vadd.f32 %v9154_v23, %v9274_v18 }
 0x421   :  { %v5325_v7 = vpop.f32.mrf.mxu1  ;;  %v9316_v2 = vpop.f32.mrf.mxu0 }
 0x422   :  { %v5597_v1 = vpack.c.bf16 %v5477_v21, %v5473_v29  ;;  %v5326_v4 = vadd.f32 %v5325_v7, %v5133_v53  ;;  %v5480_v61 = vmax.f32 %v5324_v15, 0.0  ;;  %v5143_v29 = vadd.f32 %v9156_v17, %v9269_v62 }
 0x423   :  { %v5327_v19 = vpop.f32.mrf.mxu1  ;;  %v9320_v32 = vpop.f32.mrf.mxu0 }
 0x424   :  { %v5328_v26 = vadd.f32 %v5327_v19, %v5135_v41  ;;  %6118 = vmatprep.mubr.bf16.mxu1 %v5597_v1  ;;  %v5481_v13 = vmax.f32 %v5326_v4, 0.0  ;;  %v5147_v41 = vadd.f32 %v9168_v51, %v9269_v62  ;;  %v5155_v51 = vadd.f32 %v9180_v55, %v9274_v18 }
 0x425   :  { %v5329_v50 = vpop.f32.mrf.mxu1  ;;  %6119 = vmatmul.mubr.bf16.gmra.mxu1 %v5596_v59  ;;  %v9328_v7 = vpop.f32.mrf.mxu0 }
 0x426   :  { %v5330_v36 = vadd.f32 %v5329_v50, %v5137_v10  ;;  %v5484_v37 = vmax.f32 %v5328_v26, 0.0 }
 0x427   :  { %v5333_v60 = vpop.f32.mrf.mxu1  ;;  %v9332_v10 = vpop.f32.mrf.mxu0 }
 0x428   :  { %v5485_v30 = vmax.f32 %v5330_v36, 0.0  ;;  %v5600_v16 = vpack.c.bf16 %v5484_v37, %v5480_v61  ;;  %v5334_v59 = vadd.f32 %v5333_v60, %v5141_v48  ;;  %v5153_v36 = vadd.f32 %v9172_v52, %v9269_v62  ;;  %v9894_v60 = vld [vmem:[#allocation54_spill] sm:$0xff] }
 0x429   :  { %v5335_v46 = vpop.f32.mrf.mxu1 }
 0x42a   :  { %v5601_v21 = vpack.c.bf16 %v5485_v30, %v5481_v13  ;;  %v5336_v1 = vadd.f32 %v5335_v46, %v5143_v29  ;;  %v5488_v15 = vmax.f32 %v5334_v59, 0.0  ;;  %v5151_v13 = vadd.f32 %v9894_v60, %v9274_v18  ;;  %v9340_v30 = vpop.f32.mrf.mxu0 }
 0x42b   :  { %v5337_v53 = vpop.f32.mrf.mxu1  ;;  %v5157_v29 = vadd.f32 %v9184_v5, %v9269_v62  ;;  %v5165_v5 = vadd.f32 %v9196_v63, %v9274_v18 }
 0x42c   :  { %v5338_v14 = vadd.f32 %v5337_v53, %v5145_v6  ;;  %6126 = vmatprep.mubr.bf16.mxu1 %v5601_v21  ;;  %v5489_v26 = vmax.f32 %v5336_v1, 0.0  ;;  %v9344_v53 = vpop.f32.mrf.mxu0 }
 0x42d   :  { %v5339_v19 = vpop.f32.mrf.mxu1  ;;  %6127 = vmatmul.mubr.bf16.gmra.mxu1 %v5600_v16 }
 0x42e   :  { %v5340_v17 = vadd.f32 %v5339_v19, %v5147_v41  ;;  %v5492_v8 = vmax.f32 %v5338_v14, 0.0 }
 0x42f   :  { %v5343_v4 = vpop.f32.mrf.mxu1 }
 0x430   :  { %v5493_v23 = vmax.f32 %v5340_v17, 0.0  ;;  %v5604_v61 = vpack.c.bf16 %v5492_v8, %v5488_v15  ;;  %v5344_v48 = vadd.f32 %v5343_v4, %v5151_v13  ;;  %v5163_v17 = vadd.f32 %v9188_v35, %v9269_v62 }
 0x431   :  { %v5345_v50 = vpop.f32.mrf.mxu1  ;;  %v5161_v4 = vadd.f32 %v9186_v39, %v9274_v18 }
 0x432   :  { %v5605_v37 = vpack.c.bf16 %v5493_v23, %v5489_v26  ;;  %v5346_v6 = vadd.f32 %v5345_v50, %v5153_v36  ;;  %v5496_v59 = vmax.f32 %v5344_v48, 0.0  ;;  %v9352_v26 = vpop.f32.mrf.mxu0  ;;  %v5167_v50 = vadd.f32 %v9200_v28, %v9269_v62 }
 0x433   :  { %v5347_v46 = vpop.f32.mrf.mxu1  ;;  %v5175_v28 = vadd.f32 %v9212_v27, %v9274_v18 }
 0x434   :  { %v5348_v21 = vadd.f32 %v5347_v46, %v5155_v51  ;;  %6134 = vmatprep.mubr.bf16.mxu1 %v5605_v37  ;;  %v5497_v1 = vmax.f32 %v5346_v6, 0.0  ;;  %v9356_v13 = vpop.f32.mrf.mxu0 }
 0x435   :  { %v5349_v16 = vpop.f32.mrf.mxu1  ;;  %6135 = vmatmul.mubr.bf16.gmra.mxu1 %v5604_v61 }
 0x436   :  { %v5350_v52 = vadd.f32 %v5349_v16, %v5157_v29  ;;  %v5500_v55 = vmax.f32 %v5348_v21, 0.0  ;;  %v5173_v21 = vadd.f32 %v9204_v20, %v9269_v62  ;;  %v5171_v16 = vadd.f32 %v9202_v0, %v9274_v18 }
 0x437   :  { %v5353_v41 = vpop.f32.mrf.mxu1 }
 0x438   :  { %v5501_v14 = vmax.f32 %v5350_v52, 0.0  ;;  %v5608_v23 = vpack.c.bf16 %v5500_v55, %v5496_v59  ;;  %v5354_v37 = vadd.f32 %v5353_v41, %v5161_v4  ;;  %v9364_v52 = vpop.f32.mrf.mxu0 }
 0x439   :  { %v5355_v19 = vpop.f32.mrf.mxu1 }
 0x43a   :  { %v5609_v8 = vpack.c.bf16 %v5501_v14, %v5497_v1  ;;  %v5356_v36 = vadd.f32 %v5355_v19, %v5163_v17  ;;  %v5504_v29 = vmax.f32 %v5354_v37, 0.0  ;;  %v5177_v1 = vadd.f32 %v9216_v34, %v9269_v62 }
 0x43b   :  { %v5357_v15 = vpop.f32.mrf.mxu1  ;;  %v5185_v34 = vadd.f32 %v9228_v31, %v9274_v18 }
 0x43c   :  { %v5358_v51 = vadd.f32 %v5357_v15, %v5165_v5  ;;  %6142 = vmatprep.mubr.bf16.mxu1 %v5609_v8  ;;  %v5505_v46 = vmax.f32 %v5356_v36, 0.0  ;;  %v9368_v5 = vpop.f32.mrf.mxu0 }
 0x43d   :  { %v5359_v60 = vpop.f32.mrf.mxu1  ;;  %6143 = vmatmul.mubr.bf16.gmra.mxu1 %v5608_v23 }
 0x43e   :  { %v5360_v35 = vadd.f32 %v5359_v60, %v5167_v50  ;;  %v5508_v63 = vmax.f32 %v5358_v51, 0.0  ;;  %v5183_v50 = vadd.f32 %v9220_v43, %v9269_v62  ;;  %v5181_v51 = vadd.f32 %v9218_v42, %v9274_v18  ;;  %v9376_v37 = vpop.f32.mrf.mxu0 }
 0x43f   :  { %v5363_v61 = vpop.f32.mrf.mxu1 }
 0x440   :  { %v5509_v39 = vmax.f32 %v5360_v35, 0.0  ;;  %v5612_v55 = vpack.c.bf16 %v5508_v63, %v5504_v29  ;;  %v5364_v19 = vadd.f32 %v5363_v61, %v5171_v16  ;;  %v5187_v63 = vadd.f32 %v9232_v3, %v9269_v62 }
 0x441   :  { %v5365_v6 = vpop.f32.mrf.mxu1  ;;  %v5195_v3 = vadd.f32 %v9244_v11, %v9274_v18 }
 0x442   :  { %v5613_v48 = vpack.c.bf16 %v5509_v39, %v5505_v46  ;;  %v5366_v14 = vadd.f32 %v5365_v6, %v5173_v21  ;;  %v5512_v23 = vmax.f32 %v5364_v19, 0.0  ;;  %v9380_v6 = vpop.f32.mrf.mxu0 }
 0x443   :  { %v5367_v41 = vpop.f32.mrf.mxu1 }
 0x444   :  { %v5368_v59 = vadd.f32 %v5367_v41, %v5175_v28  ;;  %6150 = vmatprep.mubr.bf16.mxu1 %v5613_v48  ;;  %v5513_v4 = vmax.f32 %v5366_v14, 0.0  ;;  %v9388_v14 = vpop.f32.mrf.mxu0 }
 0x445   :  { %v5369_v17 = vpop.f32.mrf.mxu1  ;;  %6151 = vmatmul.mubr.bf16.gmra.mxu1 %v5612_v55  ;;  %v5193_v55 = vadd.f32 %v9236_v33, %v9269_v62 }
 0x446   :  { %v5370_v20 = vadd.f32 %v5369_v17, %v5177_v1  ;;  %v5516_v27 = vmax.f32 %v5368_v59, 0.0  ;;  %v5191_v1 = vadd.f32 %v9234_v47, %v9274_v18  ;;  %v5197_v17 = vadd.f32 %v9248_v45, %v9269_v62 }
 0x447   :  { %v5373_v8 = vpop.f32.mrf.mxu1  ;;  %v5205_v45 = vadd.f32 %v9260_v56, %v9274_v18 }
 0x448   :  { %v5517_v0 = vmax.f32 %v5370_v20, 0.0  ;;  %v5616_v60 = vpack.c.bf16 %v5516_v27, %v5512_v23  ;;  %v5374_v39 = vadd.f32 %v5373_v8, %v5181_v51 }
 0x449   :  { %v5375_v15 = vpop.f32.mrf.mxu1 }
 0x44a   :  { %v5617_v36 = vpack.c.bf16 %v5517_v0, %v5513_v4  ;;  %v5376_v61 = vadd.f32 %v5375_v15, %v5183_v50  ;;  %v5520_v48 = vmax.f32 %v5374_v39, 0.0  ;;  %v9392_v0 = vpop.f32.mrf.mxu0 }
 0x44b   :  { %v5377_v35 = vpop.f32.mrf.mxu1 }
 0x44c   :  { %v5378_v46 = vadd.f32 %v5377_v35, %v5185_v34  ;;  %6158 = vmatprep.mubr.bf16.mxu1 %v5617_v36  ;;  %v5521_v28 = vmax.f32 %v5376_v61, 0.0  ;;  %v5203_v36 = vadd.f32 %v9252_v44, %v9269_v62  ;;  %v9400_v35 = vpop.f32.mrf.mxu0 }
 0x44d   :  { %v5379_v29 = vpop.f32.mrf.mxu1  ;;  %6159 = vmatmul.mubr.bf16.gmra.mxu1 %v5616_v60  ;;  %v5201_v60 = vadd.f32 %v9250_v12, %v9274_v18 }
 0x44e   :  { %v5380_v43 = vadd.f32 %v5379_v29, %v5187_v63  ;;  %v5524_v31 = vmax.f32 %v5378_v46, 0.0  ;;  %v5207_v46 = vadd.f32 %v9264_v24, %v9269_v62  ;;  %v5213_v24 = vadd.f32 %v9278_v38, %v9269_v62 }
 0x44f   :  { %v5383_v21 = vpop.f32.mrf.mxu1 }
 0x450   :  { %v5525_v42 = vmax.f32 %v5380_v43, 0.0  ;;  %v5620_v59 = vpack.c.bf16 %v5524_v31, %v5520_v48  ;;  %v5384_v8 = vadd.f32 %v5383_v21, %v5191_v1 }
 0x451   :  { %v5385_v16 = vpop.f32.mrf.mxu1 }
 0x452   :  { %v5621_v41 = vpack.c.bf16 %v5525_v42, %v5521_v28  ;;  %v5386_v20 = vadd.f32 %v5385_v16, %v5193_v55  ;;  %v5528_v50 = vmax.f32 %v5384_v8, 0.0 }
 0x453   :  { %v5387_v19 = vpop.f32.mrf.mxu1 }
 0x454   :  { %v5388_v27 = vadd.f32 %v5387_v19, %v5195_v3  ;;  %6166 = vmatprep.mubr.bf16.mxu1 %v5621_v41  ;;  %v5529_v15 = vmax.f32 %v5386_v20, 0.0  ;;  %v5215_v41 = vadd.f32 %v9286_v54, %v9274_v18  ;;  %v5217_v20 = vadd.f32 %v9290_v22, %v9269_v62 }
 0x455   :  { %v5389_v4 = vpop.f32.mrf.mxu1  ;;  %6167 = vmatmul.mubr.bf16.gmra.mxu1 %v5620_v59  ;;  %v5211_v59 = vadd.f32 %v9276_v40, %v9274_v18  ;;  %v5223_v22 = vadd.f32 %v9294_v57, %v9269_v62 }
 0x456   :  { %v5390_v33 = vadd.f32 %v5389_v4, %v5197_v17  ;;  %v5532_v11 = vmax.f32 %v5388_v27, 0.0 }
 0x457   :  { %v5393_v23 = vpop.f32.mrf.mxu1 }
 0x458   :  { %v5533_v47 = vmax.f32 %v5390_v33, 0.0  ;;  %v5624_v63 = vpack.c.bf16 %v5532_v11, %v5528_v50  ;;  %v5394_v43 = vadd.f32 %v5393_v23, %v5201_v60 }
 0x459   :  { %v5395_v34 = vpop.f32.mrf.mxu1 }
 0x45a   :  { %v5625_v51 = vpack.c.bf16 %v5533_v47, %v5529_v15  ;;  %v5396_v39 = vadd.f32 %v5395_v34, %v5203_v36  ;;  %v5536_v16 = vmax.f32 %v5394_v43, 0.0  ;;  %v5225_v36 = vadd.f32 %v9302_v9, %v9274_v18 }
 0x45b   :  { %v5397_v61 = vpop.f32.mrf.mxu1 }
 0x45c   :  { %v5398_v29 = vadd.f32 %v5397_v61, %v5205_v45  ;;  %6174 = vmatprep.mubr.bf16.mxu1 %v5625_v51  ;;  %v5537_v12 = vmax.f32 %v5396_v39, 0.0  ;;  %v5221_v51 = vadd.f32 %v9292_v49, %v9274_v18  ;;  %v5227_v61 = vadd.f32 %v9306_v58, %v9269_v62 }
 0x45d   :  { %v5399_v31 = vpop.f32.mrf.mxu1  ;;  %v9404_v44 = vpop.f32.mrf.mxu0  ;;  %6175 = vmatmul.mubr.bf16.gmra.mxu1 %v5624_v63  ;;  %v5233_v58 = vadd.f32 %v9316_v2, %v9269_v62 }
 0x45e   :  { %v5400_v56 = vadd.f32 %v5399_v31, %v5207_v46  ;;  %v5540_v21 = vmax.f32 %v5398_v29, 0.0 }
 0x45f   :  { %v5403_v28 = vpop.f32.mrf.mxu1  ;;  %v9406_v42 = vpop.f32.mrf.mxu0 }
 0x460   :  { %v5541_v48 = vmax.f32 %v5400_v56, 0.0  ;;  %v5628_v19 = vpack.c.bf16 %v5540_v21, %v5536_v16  ;;  %v5404_v4 = vadd.f32 %v5403_v28, %v5211_v59  ;;  %v5235_v16 = vadd.f32 %v9320_v32, %v9274_v18 }
 0x461   :  { %v5405_v55 = vpop.f32.mrf.mxu1  ;;  %v9408_v3 = vpop.f32.mrf.mxu0  ;;  %v5237_v59 = vadd.f32 %v9328_v7, %v9269_v62  ;;  %v5243_v7 = vadd.f32 %v9340_v30, %v9269_v62 }
 0x462   :  { %v5629_v1 = vpack.c.bf16 %v5541_v48, %v5537_v12  ;;  %v5406_v27 = vadd.f32 %v5405_v55, %v5213_v24  ;;  %v5544_v50 = vmax.f32 %v5404_v4, 0.0  ;;  %v5231_v24 = vadd.f32 %v9308_v25, %v9274_v18 }
 0x463   :  { %v5407_v17 = vpop.f32.mrf.mxu1  ;;  %v9418_v33 = vpop.f32.mrf.mxu0 }
 0x464   :  { %v5408_v8 = vadd.f32 %v5407_v17, %v5215_v41  ;;  %6182 = vmatprep.mubr.bf16.mxu1 %v5629_v1  ;;  %v5545_v15 = vmax.f32 %v5406_v27, 0.0 }
 0x465   :  { %v5409_v11 = vpop.f32.mrf.mxu1  ;;  %6183 = vmatmul.mubr.bf16.gmra.mxu1 %v5628_v19  ;;  %v9420_v40 = vpop.f32.mrf.mxu0 }
 0x466   :  { %v5410_v38 = vadd.f32 %v5409_v11, %v5217_v20  ;;  %v5548_v23 = vmax.f32 %v5408_v8, 0.0 }
 0x467   :  { %v5413_v54 = vpop.f32.mrf.mxu1  ;;  %v9430_v43 = vpop.f32.mrf.mxu0 }
 0x468   :  { %v5549_v47 = vmax.f32 %v5410_v38, 0.0  ;;  %v5632_v60 = vpack.c.bf16 %v5548_v23, %v5544_v50  ;;  %v5414_v29 = vadd.f32 %v5413_v54, %v5221_v51  ;;  %v5241_v50 = vadd.f32 %v9332_v10, %v9274_v18 }
 0x469   :  { %v5415_v34 = vpop.f32.mrf.mxu1  ;;  %v9432_v49 = vpop.f32.mrf.mxu0 }
 0x46a   :  { %v5633_v45 = vpack.c.bf16 %v5549_v47, %v5545_v15  ;;  %v5416_v46 = vadd.f32 %v5415_v34, %v5223_v22  ;;  %v5552_v12 = vmax.f32 %v5414_v29, 0.0  ;;  %v5245_v15 = vadd.f32 %v9344_v53, %v9274_v18 }
 0x46b   :  { %v5417_v63 = vpop.f32.mrf.mxu1  ;;  %v9442_v20 = vpop.f32.mrf.mxu0 }
 0x46c   :  { %v5418_v39 = vadd.f32 %v5417_v63, %v5225_v36  ;;  %6190 = vmatprep.mubr.bf16.mxu1 %v5633_v45  ;;  %v5553_v21 = vmax.f32 %v5416_v46, 0.0  ;;  %v5247_v36 = vadd.f32 %v9352_v26, %v9269_v62  ;;  %v5253_v26 = vadd.f32 %v9364_v52, %v9269_v62 }
 0x46d   :  { %v5419_v31 = vpop.f32.mrf.mxu1  ;;  %6191 = vmatmul.mubr.bf16.gmra.mxu1 %v5632_v60  ;;  %v9444_v23 = vpop.f32.mrf.mxu0 }
 0x46e   :  { %v5420_v57 = vadd.f32 %v5419_v31, %v5227_v61  ;;  %v5556_v56 = vmax.f32 %v5418_v39, 0.0 }
 0x46f   :  { %v5423_v9 = vpop.f32.mrf.mxu1  ;;  %v9454_v60 = vpop.f32.mrf.mxu0 }
 0x470   :  { %v5557_v28 = vmax.f32 %v5420_v57, 0.0  ;;  %v5636_v41 = vpack.c.bf16 %v5556_v56, %v5552_v12  ;;  %v5424_v27 = vadd.f32 %v5423_v9, %v5231_v24  ;;  %v5255_v56 = vadd.f32 %v9368_v5, %v9274_v18 }
 0x471   :  { %v5425_v48 = vpop.f32.mrf.mxu1  ;;  %v9456_v31 = vpop.f32.mrf.mxu0 }
 0x472   :  { %v5637_v55 = vpack.c.bf16 %v5557_v28, %v5553_v21  ;;  %v5426_v19 = vadd.f32 %v5425_v48, %v5233_v58  ;;  %v5560_v25 = vmax.f32 %v5424_v27, 0.0  ;;  %v5251_v21 = vadd.f32 %v9356_v13, %v9274_v18 }
 0x473   :  { %v5427_v1 = vpop.f32.mrf.mxu1  ;;  %v5257_v48 = vadd.f32 %v9376_v37, %v9269_v62  ;;  %v5263_v37 = vadd.f32 %v9388_v14, %v9269_v62 }
 0x474   :  { %v5428_v17 = vadd.f32 %v5427_v1, %v5235_v16  ;;  %6198 = vmatprep.mubr.bf16.mxu1 %v5637_v55  ;;  %v5561_v11 = vmax.f32 %v5426_v19, 0.0  ;;  %v9466_v55 = vpop.f32.mrf.mxu0 }
 0x475   :  { %v5429_v8 = vpop.f32.mrf.mxu1  ;;  %6199 = vmatmul.mubr.bf16.gmra.mxu1 %v5636_v41 }
 0x476   :  { %v5430_v2 = vadd.f32 %v5429_v8, %v5237_v59  ;;  %v5564_v4 = vmax.f32 %v5428_v17, 0.0  ;;  %v9468_v17 = vpop.f32.mrf.mxu0  ;;  %v5265_v8 = vadd.f32 %v9392_v0, %v9274_v18 }
 0x477   :  { %v5433_v32 = vpop.f32.mrf.mxu1 }
 0x478   :  { %v5565_v38 = vmax.f32 %v5430_v2, 0.0  ;;  %v5640_v34 = vpack.c.bf16 %v5564_v4, %v5560_v25  ;;  %v5434_v63 = vadd.f32 %v5433_v32, %v5241_v50  ;;  %v5261_v4 = vadd.f32 %v9380_v6, %v9274_v18 }
 0x479   :  { %v5435_v54 = vpop.f32.mrf.mxu1 }
 0x47a   :  { %v5641_v47 = vpack.c.bf16 %v5565_v38, %v5561_v11  ;;  %v5436_v45 = vadd.f32 %v5435_v54, %v5243_v7  ;;  %v5568_v10 = vmax.f32 %v5434_v63, 0.0  ;;  %v5267_v38 = vadd.f32 %v9400_v35, %v9269_v62  ;;  %v9478_v7 = vpop.f32.mrf.mxu0 }
 0x47b   :  { %v5437_v22 = vpop.f32.mrf.mxu1 }
 0x47c   :  { %v5438_v51 = vadd.f32 %v5437_v22, %v5245_v15  ;;  %6206 = vmatprep.mubr.bf16.mxu1 %v5641_v47  ;;  %v5569_v39 = vmax.f32 %v5436_v45, 0.0  ;;  %v9480_v22 = vpop.f32.mrf.mxu0 }
 0x47d   :  { %v5439_v61 = vpop.f32.mrf.mxu1  ;;  %6207 = vmatmul.mubr.bf16.gmra.mxu1 %v5640_v34 }
 0x47e   :  { %v5440_v30 = vadd.f32 %v5439_v61, %v5247_v36  ;;  %v5572_v46 = vmax.f32 %v5438_v51, 0.0  ;;  %v9482_v45 = vpop.f32.mrf.mxu0 }
 0x47f   :  { %v5443_v53 = vpop.f32.mrf.mxu1 }
 0x480   :  { %v5573_v29 = vmax.f32 %v5440_v30, 0.0  ;;  %v5644_v28 = vpack.c.bf16 %v5572_v46, %v5568_v10  ;;  %v5444_v24 = vadd.f32 %v5443_v53, %v5251_v21  ;;  %v9484_v62 = vpop.f32.mrf.mxu0 }
 0x481   :  { %v5445_v57 = vpop.f32.mrf.mxu1 }
 0x482   :  { %v5645_v9 = vpack.c.bf16 %v5573_v29, %v5569_v39  ;;  %v5446_v58 = vadd.f32 %v5445_v57, %v5253_v26  ;;  %v5576_v13 = vmax.f32 %v5444_v24, 0.0  ;;  %v9486_v35 = vpop.f32.mrf.mxu0 }
 0x483   :  { %v5447_v12 = vpop.f32.mrf.mxu1 }
 0x484   :  { %v5448_v16 = vadd.f32 %v5447_v12, %v5255_v56  ;;  %6214 = vmatprep.mubr.bf16.mxu1 %v5645_v9  ;;  %v5577_v59 = vmax.f32 %v5446_v58, 0.0  ;;  %v9488_v51 = vpop.f32.mrf.mxu0  ;;  %v6805_v12 = vadd.f32 %v9406_v42, %v9404_v44 }
 0x485   :  { %v5449_v41 = vpop.f32.mrf.mxu1  ;;  %6215 = vmatmul.mubr.bf16.gmra.mxu1 %v5644_v28 }
 0x486   :  { %v5450_v52 = vadd.f32 %v5449_v41, %v5257_v48  ;;  %v5580_v1 = vmax.f32 %v5448_v16, 0.0  ;;  %v9490_v63 = vpop.f32.mrf.mxu0  ;;  %v9523_v48 = vld [vmem:[%s9645_s6] ss:$0 sm:$0xff]  ;;  %s7999_s6 = smov [#allocation11]  }
 0x487   :  { %v5453_v5 = vpop.f32.mrf.mxu1  ;;  %v5952_v41 = vadd.f32 %v6805_v12, %v9523_v48  ;;  %s6276_s30 = sshll.u32 %s7999_s6, 4  ;;  %s6277_s30 = int_to_ptr.vmem [resolvable:$true] %s6276_s30 }
 0x488   :  { %v5581_v19 = vmax.f32 %v5450_v52, 0.0  ;;  %v5648_v32 = vpack.c.bf16 %v5580_v1, %v5576_v13  ;;  %v5454_v15 = vadd.f32 %v5453_v5, %v5261_v4  ;;  %v9492_v61 = vpop.f32.mrf.mxu0  ;;  %v6808_v52 = vadd.f32 %v9418_v33, %v9408_v3  ;;  %s7959_s8 = scalar_lea.vmem %s6277_s30, 4096  ;;  %p7964_p12 = scmp.lt.s32.totalorder %s6277_s30, %s6277_s30 }
 0x489   :  { %v5455_v27 = vpop.f32.mrf.mxu1  ;;  %v6811_v13 = vadd.f32 %v9430_v43, %v9420_v40  ;;  %v6814_v33 = vadd.f32 %v9442_v20, %v9432_v49  ;;  %v6817_v43 = vadd.f32 %v9454_v60, %v9444_v23  ;;  %v6820_v20 = vadd.f32 %v9466_v55, %v9456_v31  ;;  %p7960_p11 = scmp.ne.s32.totalorder %s6277_s30, %s7959_s8  ;;  %p7965_p13 = scmp.lt.s32.totalorder %s7959_s8, %s7959_s8 }
 0x48a   :  { %v5649_v2 = vpack.c.bf16 %v5581_v19, %v5577_v59  ;;  %v5456_v25 = vadd.f32 %v5455_v27, %v5263_v37  ;;  %v5584_v18 = vmax.f32 %v5454_v15, 0.0  ;;  %v9494_v30 = vpop.f32.mrf.mxu0  ;;  %v5955_v42 = vadd.f32 %v6808_v52, %v9523_v48 }
 0x48b   :  { %v5457_v11 = vpop.f32.mrf.mxu1  ;;  %v5960_v3 = vadd.f32 %v6811_v13, %v9523_v48  ;;  %v5963_v40 = vadd.f32 %v6814_v33, %v9523_v48  ;;  %v5968_v49 = vadd.f32 %v6817_v43, %v9523_v48  ;;  %v5971_v23 = vadd.f32 %v6820_v20, %v9523_v48  ;;  %p7966_p0 = por %p7965_p13, %p7964_p12 }
 0x48c   :  { %v5458_v54 = vadd.f32 %v5457_v11, %v5265_v8  ;;  %6222 = vmatprep.mubr.bf16.mxu1 %v5649_v2  ;;  %v5585_v0 = vmax.f32 %v5456_v25, 0.0  ;;  %v9496_v46 = vpop.f32.mrf.mxu0  ;;  %v6823_v60 = vadd.f32 %v9478_v7, %v9468_v17  ;;  %v6826_v55 = vadd.f32 %v9482_v45, %v9480_v22 }
 0x48d   :  { %v5459_v47 = vpop.f32.mrf.mxu1  ;;  %6223 = vmatmul.mubr.bf16.gmra.mxu1 %v5648_v32  ;;  %v6829_v7 = vadd.f32 %v9486_v35, %v9484_v62  ;;  %v6832_v45 = vadd.f32 %v9490_v63, %v9488_v51  ;;  %v6835_v35 = vadd.f32 %v9494_v30, %v9492_v61  ;;  %p7967_p1 = pnand %p7966_p0, %p7960_p11 }
 0x48e   :  { %v5460_v14 = vadd.f32 %v5459_v47, %v5267_v38  ;;  %v5588_v50 = vmax.f32 %v5458_v54, 0.0  ;;  %v9498_v53 = vpop.f32.mrf.mxu0  ;;  %v5976_v31 = vadd.f32 %v6823_v60, %v9523_v48  ;;  %v5979_v17 = vadd.f32 %v6826_v55, %v9523_v48 }
 0x48f   :  { %v5984_v22 = vadd.f32 %v6829_v7, %v9523_v48  ;;  %v5987_v62 = vadd.f32 %v6832_v45, %v9523_v48  ;;  %v5992_v51 = vadd.f32 %v6835_v35, %v9523_v48  ;;  %v6838_v63 = vadd.f32 %v9498_v53, %v9496_v46 }
 0x490   :  { %v5589_v34 = vmax.f32 %v5460_v14, 0.0  ;;  %v5652_v36 = vpack.c.bf16 %v5588_v50, %v5584_v18  ;;  %v9500_v39 = vpop.f32.mrf.mxu0 }
 0x491   :  { %v5995_v61 = vadd.f32 %v6838_v63, %v9523_v48 }
 0x492   :  { %v5653_v6 = vpack.c.bf16 %v5589_v34, %v5585_v0  ;;  %v9502_v29 = vpop.f32.mrf.mxu0 }
 0x493   :  { %v6841_v30 = vadd.f32 %v9502_v29, %v9500_v39 }
 0x494   :  { %6230 = vmatprep.mubr.bf16.mxu1 %v5653_v6  ;;  %v9504_v10 = vpop.f32.mrf.mxu0 }
 0x495   :  { %6231 = vmatmul.mubr.bf16.gmra.mxu1 %v5652_v36  ;;  %v6000_v46 = vadd.f32 %v6841_v30, %v9523_v48 }
 0x496   :  { %v9506_v57 = vpop.f32.mrf.mxu0 }
 0x497   :  { %v6844_v53 = vadd.f32 %v9506_v57, %v9504_v10 }
 0x498   :  { %v9508_v26 = vpop.f32.mrf.mxu0 }
 0x499   :  { %v6003_v39 = vadd.f32 %v6844_v53, %v9523_v48 }
 0x49a   :  { %v9510_v56 = vpop.f32.mrf.mxu0 }
 0x49b   :  { %v6847_v29 = vadd.f32 %v9510_v56, %v9508_v26 }
 0x49c   :  { %v9512_v9 = vpop.f32.mrf.mxu0 }
 0x49d   :  { %v6008_v10 = vadd.f32 %v6847_v29, %v9523_v48 }
 0x49e   :  { %v9514_v21 = vpop.f32.mrf.mxu0 }
 0x49f   :  { %v6850_v57 = vadd.f32 %v9514_v21, %v9512_v9 }
 0x4a0   :  { %v9516_v28 = vpop.f32.mrf.mxu0 }
 0x4a1   :  { %v6011_v26 = vadd.f32 %v6850_v57, %v9523_v48 }
 0x4a2   :  { %v9525_v58 = vpop.f32.mrf.mxu0 }
 0x4a3   :  { %v6853_v56 = vadd.f32 %v9525_v58, %v9516_v28 }
 0x4a4   :  { %v9530_v5 = vpop.f32.mrf.mxu0 }
 0x4a5   :  { %v6016_v9 = vadd.f32 %v6853_v56, %v9523_v48 }
 0x4a6   :  { %v9535_v37 = vpop.f32.mrf.mxu0 }
 0x4a7   :  { %v6856_v21 = vadd.f32 %v9535_v37, %v9530_v5 }
 0x4a8   :  { %v9540_v11 = vpop.f32.mrf.mxu0 }
 0x4aa   :  { %v9545_v47 = vpop.f32.mrf.mxu0 }
 0x4ab   :  { %v6859_v28 = vadd.f32 %v9545_v47, %v9540_v11 }
 0x4ac   :  { %v9550_v18 = vpop.f32.mrf.mxu0 }
 0x4dd   :  { %v6915_v16 = vpop.f32.mrf.mxu1 }
 0x4df   :  { %v6916_v24 = vpop.f32.mrf.mxu1 }
 0x4e0   :  { %v6917_v1 = vadd.f32 %v6916_v24, %v6915_v16  ;;  %v9555_v24 = vpop.f32.mrf.mxu0 }
 0x4e1   :  { %v6918_v59 = vpop.f32.mrf.mxu1  ;;  %v6862_v5 = vadd.f32 %v9555_v24, %v9550_v18 }
 0x4e2   :  { %v6113_v19 = vadd.f32 %v6917_v1, %v5952_v41 }
 0x4e3   :  { %v6919_v44 = vpop.f32.mrf.mxu1 }
 0x4e4   :  { %6239 = vst [vmem:[#allocation11] sm:$0xff] %v6113_v19  ;;  %v6920_v27 = vadd.f32 %v6919_v44, %v6918_v59  ;;  %v9560_v19 = vpop.f32.mrf.mxu0 }
 0x4e5   :  { %v6921_v8 = vpop.f32.mrf.mxu1 }
 0x4e6   :  { %v6116_v2 = vadd.f32 %v6920_v27, %v5955_v42 }
 0x4e7   :  { %v6922_v4 = vpop.f32.mrf.mxu1 }
 0x4e8   :  { %6240 = vst [vmem:[#allocation11 + $0x8] sm:$0xff] %v6116_v2  ;;  %v6923_v32 = vadd.f32 %v6922_v4, %v6921_v8  ;;  %v9565_v8 = vpop.f32.mrf.mxu0 }
 0x4e9   :  { %v6924_v38 = vpop.f32.mrf.mxu1  ;;  %v6865_v11 = vadd.f32 %v9565_v8, %v9560_v19 }
 0x4ea   :  { %v6121_v25 = vadd.f32 %v6923_v32, %v5960_v3  ;;  %v9570_v32 = vpop.f32.mrf.mxu0 }
 0x4eb   :  { %v6925_v54 = vpop.f32.mrf.mxu1  ;;  %v6032_v53 = vadd.f32 %v6865_v11, %v9523_v48 }
 0x4ec   :  { %6241 = vst [vmem:[#allocation11 + $0x10] sm:$0xff] %v6121_v25  ;;  %v6926_v15 = vadd.f32 %v6925_v54, %v6924_v38  ;;  %v9575_v43 = vpop.f32.mrf.mxu0 }
 0x4ed   :  { %v6927_v14 = vpop.f32.mrf.mxu1  ;;  %v6868_v18 = vadd.f32 %v9575_v43, %v9570_v32 }
 0x4ee   :  { %v6124_v50 = vadd.f32 %v6926_v15, %v5963_v40 }
 0x4ef   :  { %v6928_v0 = vpop.f32.mrf.mxu1 }
 0x4f0   :  { %6242 = vst [vmem:[#allocation11 + $0x18] sm:$0xff] %v6124_v50  ;;  %v6929_v34 = vadd.f32 %v6928_v0, %v6927_v14 }
 0x4f1   :  { %v6930_v6 = vpop.f32.mrf.mxu1 }
 0x4f2   :  { %v6129_v36 = vadd.f32 %v6929_v34, %v5968_v49  ;;  %v9580_v49 = vpop.f32.mrf.mxu0 }
 0x4f3   :  { %v6931_v12 = vpop.f32.mrf.mxu1 }
 0x4f4   :  { %6243 = vst [vmem:[#allocation11 + $0x20] sm:$0xff] %v6129_v36  ;;  %v6932_v16 = vadd.f32 %v6931_v12, %v6930_v6  ;;  %v9585_v12 = vpop.f32.mrf.mxu0 }
 0x4f5   :  { %v6933_v41 = vpop.f32.mrf.mxu1  ;;  %v6871_v19 = vadd.f32 %v9585_v12, %v9580_v49 }
 0x4f6   :  { %v6132_v52 = vadd.f32 %v6932_v16, %v5971_v23 }
 0x4f7   :  { %v6934_v1 = vpop.f32.mrf.mxu1 }
 0x4f8   :  { %6244 = vst [vmem:[#allocation11 + $0x28] sm:$0xff] %v6132_v52  ;;  %v6935_v59 = vadd.f32 %v6934_v1, %v6933_v41  ;;  %v9590_v52 = vpop.f32.mrf.mxu0 }
 0x4f9   :  { %v6936_v44 = vpop.f32.mrf.mxu1 }
 0x4fa   :  { %v6137_v42 = vadd.f32 %v6935_v59, %v5976_v31 }
 0x4fb   :  { %v6937_v13 = vpop.f32.mrf.mxu1 }
 0x4fc   :  { %6245 = vst [vmem:[#allocation11 + $0x30] sm:$0xff] %v6137_v42  ;;  %v6938_v27 = vadd.f32 %v6937_v13, %v6936_v44  ;;  %v9595_v44 = vpop.f32.mrf.mxu0 }
 0x4fd   :  { %v6939_v2 = vpop.f32.mrf.mxu1  ;;  %v6874_v32 = vadd.f32 %v9595_v44, %v9590_v52 }
 0x4fe   :  { %v6140_v4 = vadd.f32 %v6938_v27, %v5979_v17  ;;  %v9600_v27 = vpop.f32.mrf.mxu0 }
 0x4ff   :  { %v6940_v3 = vpop.f32.mrf.mxu1 }
 0x500   :  { %6246 = vst [vmem:[#allocation11 + $0x38] sm:$0xff] %v6140_v4  ;;  %v6941_v33 = vadd.f32 %v6940_v3, %v6939_v2  ;;  %v6876_v45 = vpop.f32.mrf.mxu0 }
 0x501   :  { %v6942_v38 = vpop.f32.mrf.mxu1  ;;  %v6877_v49 = vadd.f32 %v6876_v45, %v9600_v27 }
 0x502   :  { %v6145_v25 = vadd.f32 %v6941_v33, %v5984_v22 }
 0x503   :  { %v6943_v54 = vpop.f32.mrf.mxu1 }
 0x504   :  { %6247 = vst [vmem:[#allocation11 + $0x40] sm:$0xff] %v6145_v25  ;;  %v6944_v40 = vadd.f32 %v6943_v54, %v6942_v38 }
 0x505   :  { %v6945_v15 = vpop.f32.mrf.mxu1 }
 0x506   :  { %v6148_v14 = vadd.f32 %v6944_v40, %v5987_v62  ;;  %v6878_v62 = vpop.f32.mrf.mxu0 }
 0x507   :  { %v6946_v50 = vpop.f32.mrf.mxu1 }
 0x508   :  { %6248 = vst [vmem:[#allocation11 + $0x48] sm:$0xff] %v6148_v14  ;;  %v6947_v0 = vadd.f32 %v6946_v50, %v6945_v15  ;;  %v6019_v14 = vadd.f32 %v6856_v21, %v9523_v48  ;;  %v6879_v50 = vpop.f32.mrf.mxu0 }
 0x509   :  { %v6948_v20 = vpop.f32.mrf.mxu1 }
 0x50a   :  { %v6153_v34 = vadd.f32 %v6947_v0, %v5992_v51 }
 0x50b   :  { %v6949_v6 = vpop.f32.mrf.mxu1 }
 0x50c   :  { %6249 = vst [vmem:[#allocation11 + $0x50] sm:$0xff] %v6153_v34  ;;  %v6950_v36 = vadd.f32 %v6949_v6, %v6948_v20  ;;  %v6024_v20 = vadd.f32 %v6859_v28, %v9523_v48  ;;  %v6881_v34 = vpop.f32.mrf.mxu0 }
 0x50d   :  { %v6951_v23 = vpop.f32.mrf.mxu1 }
 0x50e   :  { %v6156_v60 = vadd.f32 %v6950_v36, %v5995_v61  ;;  %v6027_v36 = vadd.f32 %v6862_v5, %v9523_v48 }
 0x50f   :  { %v6952_v16 = vpop.f32.mrf.mxu1 }
 0x510   :  { %6250 = vst [vmem:[#allocation11 + $0x58] sm:$0xff] %v6156_v60  ;;  %v6953_v41 = vadd.f32 %v6952_v16, %v6951_v23  ;;  %v6882_v23 = vpop.f32.mrf.mxu0 }
 0x511   :  { %v6954_v1 = vpop.f32.mrf.mxu1 }
 0x512   :  { %v6161_v31 = vadd.f32 %v6953_v41, %v6000_v46  ;;  %v6884_v41 = vpop.f32.mrf.mxu0 }
 0x513   :  { %v6955_v55 = vpop.f32.mrf.mxu1 }
 0x514   :  { %6251 = vst [vmem:[#allocation11 + $0x60] sm:$0xff] %v6161_v31  ;;  %v6956_v59 = vadd.f32 %v6955_v55, %v6954_v1  ;;  %v6885_v29 = vpop.f32.mrf.mxu0 }
 0x515   :  { %v6957_v42 = vpop.f32.mrf.mxu1 }
 0x516   :  { %v6164_v13 = vadd.f32 %v6956_v59, %v6003_v39  ;;  %v6035_v39 = vadd.f32 %v6868_v18, %v9523_v48 }
 0x517   :  { %v6958_v17 = vpop.f32.mrf.mxu1 }
 0x518   :  { %6252 = vst [vmem:[#allocation11 + $0x68] sm:$0xff] %v6164_v13  ;;  %v6959_v7 = vadd.f32 %v6958_v17, %v6957_v42  ;;  %v6040_v17 = vadd.f32 %v6871_v19, %v9523_v48 }
 0x519   :  { %v6960_v2 = vpop.f32.mrf.mxu1 }
 0x51a   :  { %v6169_v4 = vadd.f32 %v6959_v7, %v6008_v10  ;;  %v6887_v10 = vpop.f32.mrf.mxu0 }
 0x51b   :  { %v6961_v3 = vpop.f32.mrf.mxu1 }
 0x51c   :  { %6253 = vst [vmem:[#allocation11 + $0x70] sm:$0xff] %v6169_v4  ;;  %v6962_v22 = vadd.f32 %v6961_v3, %v6960_v2  ;;  %v6043_v4 = vadd.f32 %v6874_v32, %v9523_v48  ;;  %v6888_v3 = vpop.f32.mrf.mxu0 }
 0x51d   :  { %v6963_v33 = vpop.f32.mrf.mxu1  ;;  %v6889_v5 = vadd.f32 %v6888_v3, %v6887_v10 }
 0x51e   :  { %v6172_v38 = vadd.f32 %v6962_v22, %v6011_v26  ;;  %v6890_v44 = vpop.f32.mrf.mxu0 }
 0x51f   :  { %v6964_v25 = vpop.f32.mrf.mxu1 }
 0x520   :  { %6254 = vst [vmem:[#allocation11 + $0x78] sm:$0xff] %v6172_v38  ;;  %v6965_v54 = vadd.f32 %v6964_v25, %v6963_v33  ;;  %v6048_v33 = vadd.f32 %v6877_v49, %v9523_v48  ;;  %v6880_v38 = vadd.f32 %v6879_v50, %v6878_v62  ;;  %v6891_v45 = vpop.f32.mrf.mxu0 }
 0x521   :  { %v6966_v35 = vpop.f32.mrf.mxu1  ;;  %v6892_v11 = vadd.f32 %v6891_v45, %v6890_v44 }
 0x522   :  { %v6177_v40 = vadd.f32 %v6965_v54, %v6016_v9  ;;  %v6051_v54 = vadd.f32 %v6880_v38, %v9523_v48  ;;  %v6893_v50 = vpop.f32.mrf.mxu0 }
 0x523   :  { %v6967_v15 = vpop.f32.mrf.mxu1 }
 0x524   :  { %6255 = vst [vmem:[#allocation11 + $0x80] sm:$0xff] %v6177_v40  ;;  %v6968_v58 = vadd.f32 %v6967_v15, %v6966_v35  ;;  %v6883_v35 = vadd.f32 %v6882_v23, %v6881_v34  ;;  %v6894_v34 = vpop.f32.mrf.mxu0 }
 0x525   :  { %v6969_v51 = vpop.f32.mrf.mxu1  ;;  %v6895_v18 = vadd.f32 %v6894_v34, %v6893_v50 }
 0x526   :  { %v6180_v63 = vadd.f32 %v6968_v58, %v6019_v14  ;;  %v6056_v28 = vadd.f32 %v6883_v35, %v9523_v48  ;;  %v6886_v58 = vadd.f32 %v6885_v29, %v6884_v41  ;;  %v6896_v23 = vpop.f32.mrf.mxu0 }
 0x527   :  { %v6970_v0 = vpop.f32.mrf.mxu1 }
 0x528   :  { %6256 = vst [vmem:[#allocation11 + $0x88] sm:$0xff] %v6180_v63  ;;  %v6971_v37 = vadd.f32 %v6970_v0, %v6969_v51  ;;  %v6897_v41 = vpop.f32.mrf.mxu0 }
 0x529   :  { %v6972_v6 = vpop.f32.mrf.mxu1  ;;  %v6898_v19 = vadd.f32 %v6897_v41, %v6896_v23 }
 0x52a   :  { %v6185_v61 = vadd.f32 %v6971_v37, %v6024_v20  ;;  %v6059_v20 = vadd.f32 %v6886_v58, %v9523_v48 }
 0x52b   :  { %v6973_v30 = vpop.f32.mrf.mxu1 }
 0x52c   :  { %6257 = vst [vmem:[#allocation11 + $0x90] sm:$0xff] %v6185_v61  ;;  %v6974_v47 = vadd.f32 %v6973_v30, %v6972_v6 }
 0x52d   :  { %v6975_v60 = vpop.f32.mrf.mxu1 }
 0x52e   :  { %v6188_v16 = vadd.f32 %v6974_v47, %v6027_v36  ;;  %v6064_v36 = vadd.f32 %v6889_v5, %v9523_v48 }
 0x52f   :  { %v6976_v46 = vpop.f32.mrf.mxu1 }
 0x530   :  { %6258 = vst [vmem:[#allocation11 + $0x98] sm:$0xff] %v6188_v16  ;;  %v6977_v24 = vadd.f32 %v6976_v46, %v6975_v60 }
 0x531   :  { %v6978_v1 = vpop.f32.mrf.mxu1 }
 0x532   :  { %v6193_v31 = vadd.f32 %v6977_v24, %v6032_v53  ;;  %v6067_v53 = vadd.f32 %v6892_v11, %v9523_v48 }
 0x533   :  { %v6979_v55 = vpop.f32.mrf.mxu1 }
 0x534   :  { %6259 = vst [vmem:[#allocation11 + $0xa0] sm:$0xff] %v6193_v31  ;;  %v6980_v8 = vadd.f32 %v6979_v55, %v6978_v1 }
 0x535   :  { %v6981_v59 = vpop.f32.mrf.mxu1 }
 0x536   :  { %v6196_v42 = vadd.f32 %v6980_v8, %v6035_v39  ;;  %v6072_v39 = vadd.f32 %v6895_v18, %v9523_v48 }
 0x537   :  { %v6982_v13 = vpop.f32.mrf.mxu1 }
 0x538   :  { %6260 = vst [vmem:[#allocation11 + $0xa8] sm:$0xff] %v6196_v42  ;;  %v6983_v43 = vadd.f32 %v6982_v13, %v6981_v59  ;;  %v6075_v13 = vadd.f32 %v6898_v19, %v9523_v48 }
 0x539   :  { %v6984_v57 = vpop.f32.mrf.mxu1 }
 0x53a   :  { %v6201_v7 = vadd.f32 %v6983_v43, %v6040_v17 }
 0x53b   :  { %v6985_v2 = vpop.f32.mrf.mxu1 }
 0x53c   :  { %6261 = vst [vmem:[#allocation11 + $0xb0] sm:$0xff] %v6201_v7  ;;  %v6986_v12 = vadd.f32 %v6985_v2, %v6984_v57 }
 0x53d   :  { %v6987_v26 = vpop.f32.mrf.mxu1 }
 0x53e   :  { %v6204_v56 = vadd.f32 %v6986_v12, %v6043_v4 }
 0x53f   :  { %v6988_v22 = vpop.f32.mrf.mxu1 }
 0x540   :  { %6262 = vst [vmem:[#allocation11 + $0xb8] sm:$0xff] %v6204_v56  ;;  %v6989_v52 = vadd.f32 %v6988_v22, %v6987_v26 }
 0x541   :  { %v6990_v25 = vpop.f32.mrf.mxu1 }
 0x542   :  { %v6209_v9 = vadd.f32 %v6989_v52, %v6048_v33 }
 0x543   :  { %v6991_v21 = vpop.f32.mrf.mxu1 }
 0x544   :  { %6263 = vst [vmem:[#allocation11 + $0xc0] sm:$0xff] %v6209_v9  ;;  %v6992_v27 = vadd.f32 %v6991_v21, %v6990_v25 }
 0x545   :  { %v6993_v40 = vpop.f32.mrf.mxu1 }
 0x546   :  { %v6212_v15 = vadd.f32 %v6992_v27, %v6051_v54 }
 0x547   :  { %v6994_v14 = vpop.f32.mrf.mxu1 }
 0x548   :  { %6264 = vst [vmem:[#allocation11 + $0xc8] sm:$0xff] %v6212_v15  ;;  %v6995_v62 = vadd.f32 %v6994_v14, %v6993_v40 }
 0x549   :  { %v6996_v51 = vpop.f32.mrf.mxu1 }
 0x54a   :  { %v6217_v63 = vadd.f32 %v6995_v62, %v6056_v28 }
 0x54b   :  { %v6997_v0 = vpop.f32.mrf.mxu1 }
 0x54c   :  { %6265 = vst [vmem:[#allocation11 + $0xd0] sm:$0xff] %v6217_v63  ;;  %v6998_v37 = vadd.f32 %v6997_v0, %v6996_v51 }
 0x54d   :  { %v6999_v6 = vpop.f32.mrf.mxu1 }
 0x54e   :  { %v6220_v61 = vadd.f32 %v6998_v37, %v6059_v20 }
 0x54f   :  { %v7000_v30 = vpop.f32.mrf.mxu1 }
 0x550   :  { %6266 = vst [vmem:[#allocation11 + $0xd8] sm:$0xff] %v6220_v61  ;;  %v7001_v47 = vadd.f32 %v7000_v30, %v6999_v6 }
 0x551   :  { %v7002_v60 = vpop.f32.mrf.mxu1 }
 0x552   :  { %v6225_v16 = vadd.f32 %v7001_v47, %v6064_v36 }
 0x553   :  { %v7003_v46 = vpop.f32.mrf.mxu1 }
 0x554   :  { %6267 = vst [vmem:[#allocation11 + $0xe0] sm:$0xff] %v6225_v16  ;;  %v7004_v24 = vadd.f32 %v7003_v46, %v7002_v60 }
 0x555   :  { %v7005_v1 = vpop.f32.mrf.mxu1 }
 0x556   :  { %v6228_v31 = vadd.f32 %v7004_v24, %v6067_v53 }
 0x557   :  { %v7006_v55 = vpop.f32.mrf.mxu1 }
 0x558   :  { %6268 = vst [vmem:[#allocation11 + $0xe8] sm:$0xff] %v6228_v31  ;;  %v7007_v8 = vadd.f32 %v7006_v55, %v7005_v1 }
 0x559   :  { %v7008_v29 = vpop.f32.mrf.mxu1 }
 0x55a   :  { %v6233_v59 = vadd.f32 %v7007_v8, %v6072_v39 }
 0x55b   :  { %v7009_v42 = vpop.f32.mrf.mxu1 }
 0x55c   :  { %6269 = vst [vmem:[#allocation11 + $0xf0] sm:$0xff] %v6233_v59  ;;  %v7010_v17 = vadd.f32 %v7009_v42, %v7008_v29 }
 0x55e   :  { %v6236_v32 = vadd.f32 %v7010_v17, %v6075_v13 }
 0x560   :  { %6270 = vst [vmem:[#allocation11 + $0xf8] sm:$0xff] %v6236_v32 }
 0x561   :  { %7970 = shalt.err (!%p7967_p1)
}
 0x562   :  { %s8000_s9 = smov 128   ;;  %s8001_s10 = smov 8  }
 0x563   :  { %6282 = dma.vmem_to_hbm [thread:$0]  %s6277_s30, 4096, %s9646_s7, [#allocation4], %s8000_s9, %s8000_s9, %s8001_s10  }
 0x564   :  { %7985 = dma.done.wait [#allocation4], 4096  }
 0x565   :  { %7986 = vsyncadd [#allocation4], 4294963200 }
 0x566   :  { %6286 = vsyncpa [#allocation3], 1 }
 0x567   :  { %6287 = vsyncpa [#allocation6], 1 }
 0x568   :  { %6288 = vsyncpa [#allocation9], 1 }
 0x569   :  { %6289 = vsyncpa [#allocation4], 1 }

</bundles_post_ra>
